<compile_context>
chip_gen: v7x
topology: tpu7x:2x2x1
jax: 0.10.0
libtpu: 0.0.40
codegen_flags: <defaults>
</compile_context>

<pallas_src>
import functools

import jax
import jax.numpy as jnp
import numpy as np
from jax.experimental import pallas as pl
from jax.experimental.pallas import tpu as pltpu

_LANE = 128   # TPU lane width; channels are padded to a multiple of this.


def _round_up(x, m):
    return (x + m - 1) // m * m


def _tpu_vmem_and_cores():
    """(physical VMEM bytes, TensorCores per chip) with safe fallbacks."""
    vmem = 64 * 1024 * 1024          # v7x worst case
    cores = 1
    try:
        info = pltpu.get_tpu_info()
        vmem = int(getattr(info, "vmem_capacity_bytes", vmem))
        cores = int(getattr(info, "tensorcore_count",
                            getattr(info, "num_cores",
                                    getattr(info, "core_count", cores))))
    except Exception:
        pass                          # interpret mode / detection failure: keep defaults
    return vmem, max(1, cores)


_VMEM_PHYS, _NUM_CORES = _tpu_vmem_and_cores()
# Scoped VMEM requested from Mosaic, and the smaller budget tiles are sized against.
_VMEM_LIMIT_BYTES = min(int(_VMEM_PHYS * 3 // 4), 100 * 1024 * 1024)
_VMEM_TILE_BUDGET = int(_VMEM_LIMIT_BYTES * 3 // 4)


def _pick_cout_tile(cin_p, cout_p, ebytes):
    """Full Cout when the (double-buffered) weight block fits comfortably: its
    block index is then constant, so weights are DMA'd from HBM exactly once
    instead of once per (batch, H-tile)."""
    if 2 * 9 * cin_p * cout_p * ebytes <= _VMEM_TILE_BUDGET // 3:
        return cout_p
    # Fallback for very wide layers: MXU-native tiles.
    # TODO(synk): prefer 128 on v5e (128-wide MXU, single vector-store slot).
    if cout_p % 256 == 0:
        return 256
    return _LANE


def _conv_vmem_use(th, W, cin_p, tcout, d, ebytes):
    return (2 * th * W * tcout * ebytes              # output block (double-buffered)
            + 2 * 9 * cin_p * tcout * ebytes         # weight block (double-buffered)
            + 3 * (th + 2 * d) * W * cin_p * ebytes  # column-shifted input copies
            + th * W * tcout * 4                     # f32 accumulator (compiler temp)
            + 2 * tcout * 4)                         # bias


def _pick_conv_tile_h(H, W, cin_p, tcout, d, ebytes, batch):
    """Largest divisor of H (>= dilation) whose blocks fit the VMEM budget; on
    2-TensorCore chips with batch == 1, prefer >= 2 H tiles so both cores work,
    but never shrink the MXU M dimension (TH*W) below 256."""
    divs = [k for k in range(H, 0, -1) if H % k == 0 and (k >= d or k == H)]
    fitting = [k for k in divs
               if _conv_vmem_use(k, W, cin_p, tcout, d, ebytes) <= _VMEM_TILE_BUDGET]
    if not fitting:
        return divs[-1]
    pick = fitting[0]
    if _NUM_CORES >= 2 and batch == 1 and len(fitting) > 1 and pick == H:
        alt = fitting[1]
        if alt * W >= 256:
            pick = alt
    return pick


# -----------------------------------------------------------------------------
# Conv 3x3 (stride 1, padding = dilation) + bias + ReLU.
# Grid = (batch, H-tile, Cout-tile); Cout is the innermost ("arbitrary") axis so
# the haloed / column-shifted input scratch loaded at co == 0 is reused for every
# Cout tile.  Do NOT reorder the grid axes without changing the reuse logic.
# -----------------------------------------------------------------------------
def _conv3x3_bias_relu_kernel(x_hbm, w_ref, b_ref, o_ref, xw, sem, *, dilation):
    d = dilation
    n, th, co = pl.program_id(0), pl.program_id(1), pl.program_id(2)
    n_h = pl.num_programs(1)

    _, TH, W, TCout = o_ref.shape
    Cin = xw.shape[-1]
    HP = TH + 2 * d

    # ---- load + column-shift the haloed input tile once per (n, th) ------------
    @pl.when(co == 0)
    def _load_tile():
        row0 = pl.multiple_of(th * TH, TH)

        # main rows of the tile -> xw[1][d : d+TH]
        pltpu.make_async_copy(x_hbm.at[n, pl.ds(row0, TH)],
                              xw.at[1, pl.ds(d, TH)], sem.at[0]).start()

        zrow = jnp.zeros((d, W, Cin), xw.dtype)

        @pl.when(th > 0)                        # top halo rows from the tile above
        def _():
            pltpu.make_async_copy(x_hbm.at[n, pl.ds(row0 - d, d)],
                                  xw.at[1, pl.ds(0, d)], sem.at[1]).start()

        @pl.when(th == 0)                       # image top: zero padding rows
        def _():
            xw[1, 0:d, :, :] = zrow

        @pl.when(th < n_h - 1)                  # bottom halo rows from the tile below
        def _():
            pltpu.make_async_copy(x_hbm.at[n, pl.ds(row0 + TH, d)],
                                  xw.at[1, pl.ds(TH + d, d)], sem.at[2]).start()

        @pl.when(th == n_h - 1)                 # image bottom: zero padding rows
        def _():
            xw[1, TH + d:TH + 2 * d, :, :] = zrow

        # Wait on everything that was issued (DMAs overlap instead of serializing).
        pltpu.make_async_copy(x_hbm.at[n, pl.ds(0, TH)],
                              xw.at[1, pl.ds(d, TH)], sem.at[0]).wait()

        @pl.when(th > 0)
        def _():
            pltpu.make_async_copy(x_hbm.at[n, pl.ds(0, d)],
                                  xw.at[1, pl.ds(0, d)], sem.at[1]).wait()

        @pl.when(th < n_h - 1)
        def _():
            pltpu.make_async_copy(x_hbm.at[n, pl.ds(0, d)],
                                  xw.at[1, pl.ds(TH + d, d)], sem.at[2]).wait()

        # Column-shifted copies (padding = d zero columns at the image borders);
        # built once per (n, th) instead of materializing a slice per tap.
        zcol = jnp.zeros((HP, d, Cin), xw.dtype)
        xw[0, :, 0:d, :] = zcol
        xw[0, :, d:W, :] = xw[1, :, 0:W - d, :]
        xw[2, :, 0:W - d, :] = xw[1, :, d:W, :]
        xw[2, :, W - d:W, :] = zcol

    # ---- 9 shifted-tap matmuls accumulated in values (f32) ---------------------
    def tap(kh, kw):
        xs = xw[kw, kh * d:kh * d + TH, :, :]    # contiguous leading-dim slice
        xs = xs.reshape(TH * W, Cin)
        return jnp.dot(xs, w_ref[kh, kw, :, :], preferred_element_type=jnp.float32)

    acc = tap(0, 0)
    for kh in range(3):
        for kw in range(3):
            if (kh, kw) != (0, 0):
                acc = acc + tap(kh, kw)

    # ---- fused bias + ReLU epilogue, cast to the activation dtype --------------
    r = jnp.maximum(acc + b_ref[...], 0.0)
    o_ref[...] = r.reshape(1, TH, W, TCout).astype(o_ref.dtype)


def conv3x3_bias_relu(x_nhwc, w_hwio, b2, *, dilation=1, tile_h=None, cout_tile=None):
    """x: (N,H,W,Cin_p) with Cin_p % 128 == 0; w: (3,3,Cin_p,Cout_p) in the same
    dtype as x; b2: (1, Cout_p) float32.  Returns (N,H,W,Cout_p)."""
    N, H, W, Cin_p = x_nhwc.shape
    Cout_p = w_hwio.shape[-1]
    d = dilation
    ebytes = jnp.dtype(x_nhwc.dtype).itemsize
    assert Cin_p % _LANE == 0 and Cout_p % _LANE == 0

    tcout = cout_tile if cout_tile is not None else _pick_cout_tile(Cin_p, Cout_p, ebytes)
    TH = tile_h if tile_h is not None else _pick_conv_tile_h(
        H, W, Cin_p, tcout, d, ebytes, N)
    assert H % TH == 0, (H, TH)
    n_h = H // TH
    assert n_h == 1 or TH >= d, (TH, d)          # halo DMAs read at most d rows away
    n_co = Cout_p // tcout

    kernel = functools.partial(_conv3x3_bias_relu_kernel, dilation=d)
    return pl.pallas_call(
        kernel,
        out_shape=jax.ShapeDtypeStruct((N, H, W, Cout_p), x_nhwc.dtype),
        grid_spec=pltpu.PrefetchScalarGridSpec(
            num_scalar_prefetch=0,
            grid=(N, n_h, n_co),                 # Cout innermost: input scratch resident
            in_specs=[
                pl.BlockSpec(memory_space=pl.ANY),                 # x: manual halo DMA
                # With n_co == 1 (the common case) this block index is constant, so
                # the weights are fetched from HBM exactly once for the whole call.
                # TODO(synk): pipeline_mode=pl.Buffered(1) would also drop its second
                # VMEM buffer.
                pl.BlockSpec((3, 3, Cin_p, tcout), lambda n, th, co: (0, 0, 0, co)),
                pl.BlockSpec((1, tcout), lambda n, th, co: (0, co)),
            ],
            out_specs=pl.BlockSpec((1, TH, W, tcout),
                                   lambda n, th, co: (n, th, 0, co)),
            scratch_shapes=[
                pltpu.VMEM((3, TH + 2 * d, W, Cin_p), x_nhwc.dtype),
                pltpu.SemaphoreType.DMA((3,)),
            ],
        ),
        compiler_params=pltpu.CompilerParams(
            dimension_semantics=("parallel", "parallel", "arbitrary"),
            vmem_limit_bytes=_VMEM_LIMIT_BYTES),
    )(x_nhwc, w_hwio, b2)
    # TODO(synk): double-buffer the input scratch and prefetch the next (n, th)
    # tile while the current one computes (the one remaining unpipelined DMA).


# -----------------------------------------------------------------------------
# MaxPool2d(kernel_size=2, stride=pool_stride, padding=0)
# -----------------------------------------------------------------------------
def _maxpool_k2s2_kernel(x_ref, o_ref):
    # x_ref: (1, THo, 2, Wo, 2*C) -- dim 2 is the row parity; the lane dim packs
    # [even-column C | odd-column C].  o_ref: (1, THo, Wo, C).
    C = o_ref.shape[-1]
    x = x_ref[0]                                     # (THo, 2, Wo, 2C)
    m = jnp.maximum(x[:, 0], x[:, 1])                # row-pair max    (THo, Wo, 2C)
    o_ref[0] = jnp.maximum(m[..., :C], m[..., C:])   # column-pair max (THo, Wo, C)


def _maxpool_k2s1_kernel(x_ref, o_ref):
    # TODO(synk): use pltpu.roll for the column-neighbour max (XLU slot) instead of
    # the sublane-unaligned x[:, 1:, :] slices.
    x = x_ref[0]
    o_ref[0] = jnp.maximum(jnp.maximum(x[:-1, :-1, :], x[:-1, 1:, :]),
                           jnp.maximum(x[1:, :-1, :], x[1:, 1:, :]))


def _pick_pool_tile_h(Ho, Wo, C, ebytes, batch):
    def vmem_use(t):
        return 2 * (t * 2 * Wo * 2 * C * ebytes) + 2 * (t * Wo * C * ebytes)
    divs = [k for k in range(Ho, 0, -1) if Ho % k == 0]
    fitting = [k for k in divs if vmem_use(k) <= _VMEM_TILE_BUDGET] or [divs[-1]]
    pick = fitting[0]
    if _NUM_CORES >= 2 and batch == 1 and len(fitting) > 1 and pick == Ho:
        pick = fitting[1]
    return pick


def maxpool2x2(x_nhwc, stride):
    N, H, W, C = x_nhwc.shape
    ebytes = jnp.dtype(x_nhwc.dtype).itemsize

    if stride == 2:
        Ho, Wo = (H - 2) // 2 + 1, (W - 2) // 2 + 1
        # Split the row parity into its own axis and fold the column parity into
        # the lane dim so the strided pool output is computed in-kernel with
        # lane-aligned slices only (pure view for even H/W; odd sizes insert one
        # XLA slice copy but stay correct).
        xr = x_nhwc[:, :2 * Ho, :2 * Wo, :].reshape(N, Ho, 2, Wo, 2 * C)
        THo = _pick_pool_tile_h(Ho, Wo, C, ebytes, N)
        return pl.pallas_call(
            _maxpool_k2s2_kernel,
            out_shape=jax.ShapeDtypeStruct((N, Ho, Wo, C), x_nhwc.dtype),
            grid_spec=pltpu.PrefetchScalarGridSpec(
                num_scalar_prefetch=0,
                grid=(N, Ho // THo),
                in_specs=[pl.BlockSpec((1, THo, 2, Wo, 2 * C),
                                       lambda n, t: (n, t, 0, 0, 0))],
                out_specs=pl.BlockSpec((1, THo, Wo, C), lambda n, t: (n, t, 0, 0)),
            ),
            compiler_params=pltpu.CompilerParams(
                dimension_semantics=("parallel", "parallel"),
                vmem_limit_bytes=_VMEM_LIMIT_BYTES),
        )(xr)

    # stride == 1: the dense (H-1, W-1) window maxima ARE the output (no waste).
    win = pl.pallas_call(
        _maxpool_k2s1_kernel,
        out_shape=jax.ShapeDtypeStruct((N, H - 1, W - 1, C), x_nhwc.dtype),
        grid_spec=pltpu.PrefetchScalarGridSpec(
            num_scalar_prefetch=0,
            grid=(N,),
            in_specs=[pl.BlockSpec((1, H, W, C), lambda n: (n, 0, 0, 0))],
            out_specs=pl.BlockSpec((1, H - 1, W - 1, C), lambda n: (n, 0, 0, 0)),
        ),
        compiler_params=pltpu.CompilerParams(
            dimension_semantics=("parallel",),
            vmem_limit_bytes=_VMEM_LIMIT_BYTES),
    )(x_nhwc)
    if stride == 1:
        return win
    # TODO(synk): stride >= 3 is unused by the VGG configs; subsample outside.
    Ho, Wo = (H - 2) // stride + 1, (W - 2) // stride + 1
    return win[:, ::stride, ::stride, :][:, :Ho, :Wo, :]


# -----------------------------------------------------------------------------
# PlainBlock wrapper (NCHW in / NCHW out, like the PyTorch module)
# -----------------------------------------------------------------------------
def plain_block_forward(x_nchw, params, *, dilation=1, has_pool=False,
                        pool_stride=1, compute_dtype=jnp.bfloat16, tile_h=None):
    # TODO(synk): in a full backbone, keep activations NHWC/channel-padded across
    # blocks and pre-transpose/pad the weights once at load time; the entry/exit
    # transposes below are an extra HBM round trip each.
    N, Cin, H, W = x_nchw.shape
    Cout = params[-1][0].shape[0]

    # NCHW -> NHWC (channels on lanes), channels padded to a multiple of 128 so
    # every load/store is lane-dense; padded channels stay exactly zero through
    # the block (zero weights + zero bias + ReLU).
    # TODO(synk): special-case the first conv (Cin = 3/4) with an im2col kernel
    # instead of padding Cin to 128 (the padded-K matmul is mostly zeros there).
    cin_p = _round_up(Cin, _LANE)
    x = jnp.transpose(x_nchw, (0, 2, 3, 1)).astype(compute_dtype)
    x = jnp.pad(x, ((0, 0), (0, 0), (0, 0), (0, cin_p - Cin)))

    prev_p = cin_p
    for (w_oihw, bias) in params:
        co, ci = w_oihw.shape[0], w_oihw.shape[1]
        co_p = _round_up(co, _LANE)
        w = jnp.transpose(w_oihw, (2, 3, 1, 0))                       # OIHW -> HWIO
        w = jnp.pad(w, ((0, 0), (0, 0), (0, prev_p - ci), (0, co_p - co)))
        w = w.astype(compute_dtype)
        b2 = jnp.pad(bias.astype(jnp.float32), (0, co_p - co)).reshape(1, co_p)
        x = conv3x3_bias_relu(x, w, b2, dilation=dilation, tile_h=tile_h)
        prev_p = co_p

    if has_pool:
        # TODO(synk): fuse the stride-2 pool into the last conv's epilogue to save
        # one padded-activation round trip through HBM.
        x = maxpool2x2(x, pool_stride)

    x = x[..., :Cout]                                                 # drop channel pad
    return jnp.transpose(x, (0, 3, 1, 2))                             # NHWC -> NCHW


def init_plain_block_params(key, in_channels, out_channels, num_conv):
    """c2_msra_fill-like init (kaiming_normal fan_out); small random biases."""
    params = []
    cin = in_channels
    fan_out = out_channels * 3 * 3
    std = (2.0 / fan_out) ** 0.5
    for _ in range(num_conv):
        key, kw, kb = jax.random.split(key, 3)
        w = std * jax.random.normal(kw, (out_channels, cin, 3, 3), jnp.float32)
        b = 0.01 * jax.random.normal(kb, (out_channels,), jnp.float32)
        params.append((w, b))
        cin = out_channels
    return params


# -----------------------------------------------------------------------------
# Pure-JAX reference (correctness check); cast_dtype simulates low-precision
# storage of inputs/weights/activations with f32 accumulation (matches kernel).
# -----------------------------------------------------------------------------
def plain_block_reference(x_nchw, params, *, dilation=1, has_pool=False,
                          pool_stride=1, cast_dtype=None):
    def q(a):
        return a if cast_dtype is None else a.astype(cast_dtype).astype(jnp.float32)

    x = q(x_nchw)
    for w, b in params:
        x = jax.lax.conv_general_dilated(
            x, q(w), window_strides=(1, 1),
            padding=((dilation, dilation), (dilation, dilation)),
            rhs_dilation=(dilation, dilation),
            dimension_numbers=("NCHW", "OIHW", "NCHW"))
        x = q(jnp.maximum(x + b[None, :, None, None], 0.0))
    if has_pool:
        x = jax.lax.reduce_window(
            x, -jnp.inf, jax.lax.max,
            window_dimensions=(1, 1, 2, 2),
            window_strides=(1, 1, pool_stride, pool_stride),
            padding="VALID")
    return x


if __name__ == "__main__":
    key = jax.random.PRNGKey(0)
    kxa, kpa, kxb, kpb = jax.random.split(key, 4)

    # Config A: PlainBlock(4 -> 8, num_conv=3, dilation=1, stride=2, has_pool=True)
    xA = jax.random.normal(kxa, (2, 4, 16, 16), jnp.float32)
    paramsA = init_plain_block_params(kpa, 4, 8, num_conv=3)
    refA = plain_block_reference(xA, paramsA, dilation=1, has_pool=True, pool_stride=2)

    fA = jax.jit(functools.partial(plain_block_forward, dilation=1, has_pool=True,
                                   pool_stride=2, compute_dtype=jnp.float32))
    outA = jax.block_until_ready(fA(xA, paramsA))
    np.testing.assert_allclose(np.asarray(outA), np.asarray(refA), rtol=1e-4, atol=1e-4)

    # small explicit H tiles: exercises the in-kernel halo DMAs (dilation = 1)
    fA4 = jax.jit(functools.partial(plain_block_forward, dilation=1, has_pool=True,
                                    pool_stride=2, compute_dtype=jnp.float32, tile_h=4))
    outA4 = jax.block_until_ready(fA4(xA, paramsA))
    np.testing.assert_allclose(np.asarray(outA4), np.asarray(refA), rtol=1e-4, atol=1e-4)

    # bf16 activations/weights with f32 accumulation, checked against a
    # bf16-quantized reference at a tolerance that would catch indexing bugs.
    refAq = plain_block_reference(xA, paramsA, dilation=1, has_pool=True,
                                  pool_stride=2, cast_dtype=jnp.bfloat16)
    fAb = jax.jit(functools.partial(plain_block_forward, dilation=1, has_pool=True,
                                    pool_stride=2, compute_dtype=jnp.bfloat16))
    outAb = jax.block_until_ready(fAb(xA, paramsA))
    np.testing.assert_allclose(np.asarray(outAb.astype(jnp.float32)),
                               np.asarray(refAq), rtol=5e-2, atol=5e-2)

    # Config B: PlainBlock(4 -> 8, num_conv=2, dilation=2, stride=1, has_pool=True)
    xB = jax.random.normal(kxb, (1, 4, 16, 16), jnp.float32)
    paramsB = init_plain_block_params(kpb, 4, 8, num_conv=2)
    refB = plain_block_reference(xB, paramsB, dilation=2, has_pool=True, pool_stride=1)

    fB = jax.jit(functools.partial(plain_block_forward, dilation=2, has_pool=True,
                                   pool_stride=1, compute_dtype=jnp.float32))
    outB = jax.block_until_ready(fB(xB, paramsB))
    np.testing.assert_allclose(np.asarray(outB), np.asarray(refB), rtol=1e-4, atol=1e-4)

    # dilation = 2 with explicit H tiles: exercises 2-row halo DMAs / zero fills
    fB8 = jax.jit(functools.partial(plain_block_forward, dilation=2, has_pool=True,
                                    pool_stride=1, compute_dtype=jnp.float32, tile_h=8))
    outB8 = jax.block_until_ready(fB8(xB, paramsB))
    np.testing.assert_allclose(np.asarray(outB8), np.asarray(refB), rtol=1e-4, atol=1e-4)

    print("KERNEL_OK")
</pallas_src>

<mosaic_0001>
module attributes {stable_mosaic.version = 11 : i64} {
  func.func @_conv3x3_bias_relu_kernel(%arg0: i32, %arg1: i32, %arg2: i32, %arg3: memref<2x16x16x128xf32, #tpu.memory_space<any>>, %arg4: memref<3x3x128x128xf32, #tpu.memory_space<vmem>>, %arg5: memref<1x128xf32, #tpu.memory_space<vmem>>, %arg6: memref<1x16x16x128xf32, #tpu.memory_space<vmem>>, %arg7: memref<3x18x16x128xf32, #tpu.memory_space<vmem>>, %arg8: memref<3x!tpu.dma_semaphore, #tpu.memory_space<semaphore_mem>>) attributes {dimension_semantics = [#tpu.dimension_semantics<parallel>, #tpu.dimension_semantics<parallel>, #tpu.dimension_semantics<arbitrary>], iteration_bounds = array<i64: 2, 1, 1>, scalar_prefetch = 0 : i64, scratch_operands = 2 : i64, tpu.core_type = #tpu.core_type<tc>, window_params = [{}, {transform_indices = @transform_1, window_bounds = array<i64: 3, 3, 128, 128>}, {transform_indices = @transform_2, window_bounds = array<i64: 1, 128>}, {transform_indices = @transform_3, window_bounds = array<i64: 1, 16, 16, 128>}]} {
    %c0_i32 = arith.constant 0 : i32
    %0 = arith.cmpi eq, %arg2, %c0_i32 : i32
    %1 = arith.extui %0 : i1 to i32
    %c0_i32_0 = arith.constant 0 : i32
    %2 = arith.cmpi ne, %1, %c0_i32_0 : i32
    scf.if %2 {
      %c16_i32 = arith.constant 16 : i32
      %72 = arith.muli %arg1, %c16_i32 : i32
      %73 = tpu.assume_multiple %72, 16 : i32
      %c1_i32 = arith.constant 1 : i32
      %c0_i32_85 = arith.constant 0 : i32
      %c0_i32_86 = arith.constant 0 : i32
      %c0_i32_87 = arith.constant 0 : i32
      %74 = tpu.memref_slice %arg3[%arg0, %73, %c0_i32_86, %c0_i32_87] : memref<2x16x16x128xf32, #tpu.memory_space<any>> -> memref<1x16x16x128xf32, #tpu.memory_space<any>>
      %75 = tpu.memref_squeeze %74 : memref<1x16x16x128xf32, #tpu.memory_space<any>> -> memref<16x16x128xf32, #tpu.memory_space<any>>
      %c1_i32_88 = arith.constant 1 : i32
      %c0_i32_89 = arith.constant 0 : i32
      %c0_i32_90 = arith.constant 0 : i32
      %76 = tpu.memref_slice %arg7[%c1_i32, %c1_i32_88, %c0_i32_89, %c0_i32_90] : memref<3x18x16x128xf32, #tpu.memory_space<vmem>> -> memref<1x16x16x128xf32, #tpu.memory_space<vmem>>
      %77 = tpu.memref_squeeze %76 : memref<1x16x16x128xf32, #tpu.memory_space<vmem>> -> memref<16x16x128xf32, #tpu.memory_space<vmem>>
      %78 = tpu.memref_slice %arg8[%c0_i32_85] : memref<3x!tpu.dma_semaphore, #tpu.memory_space<semaphore_mem>> -> memref<1x!tpu.dma_semaphore, #tpu.memory_space<semaphore_mem>>
      %79 = tpu.memref_squeeze %78 : memref<1x!tpu.dma_semaphore, #tpu.memory_space<semaphore_mem>> -> memref<!tpu.dma_semaphore, #tpu.memory_space<semaphore_mem>>
      tpu.enqueue_dma source(%75 : memref<16x16x128xf32, #tpu.memory_space<any>>) target(%77 : memref<16x16x128xf32, #tpu.memory_space<vmem>>) target_semaphore(%79 : memref<!tpu.dma_semaphore, #tpu.memory_space<semaphore_mem>>)
      %cst_91 = arith.constant 0.000000e+00 : f32
      %80 = vector.broadcast %cst_91 : f32 to vector<1x16x128xf32>
      %c0_i32_92 = arith.constant 0 : i32
      %81 = arith.cmpi sgt, %arg1, %c0_i32_92 : i32
      %82 = arith.extui %81 : i1 to i32
      %c0_i32_93 = arith.constant 0 : i32
      %83 = arith.cmpi ne, %82, %c0_i32_93 : i32
      scf.if %83 {
        %c1_i32_136 = arith.constant 1 : i32
        %122 = arith.subi %73, %c1_i32_136 : i32
        %c1_i32_137 = arith.constant 1 : i32
        %c1_i32_138 = arith.constant 1 : i32
        %c0_i32_139 = arith.constant 0 : i32
        %c0_i32_140 = arith.constant 0 : i32
        %123 = tpu.memref_slice %arg3[%arg0, %122, %c0_i32_139, %c0_i32_140] : memref<2x16x16x128xf32, #tpu.memory_space<any>> -> memref<1x1x16x128xf32, #tpu.memory_space<any>>
        %124 = tpu.memref_squeeze %123 : memref<1x1x16x128xf32, #tpu.memory_space<any>> -> memref<1x16x128xf32, #tpu.memory_space<any>>
        %c0_i32_141 = arith.constant 0 : i32
        %c0_i32_142 = arith.constant 0 : i32
        %c0_i32_143 = arith.constant 0 : i32
        %125 = tpu.memref_slice %arg7[%c1_i32_137, %c0_i32_141, %c0_i32_142, %c0_i32_143] : memref<3x18x16x128xf32, #tpu.memory_space<vmem>> -> memref<1x1x16x128xf32, #tpu.memory_space<vmem>>
        %126 = tpu.memref_squeeze %125 : memref<1x1x16x128xf32, #tpu.memory_space<vmem>> -> memref<1x16x128xf32, #tpu.memory_space<vmem>>
        %127 = tpu.memref_slice %arg8[%c1_i32_138] : memref<3x!tpu.dma_semaphore, #tpu.memory_space<semaphore_mem>> -> memref<1x!tpu.dma_semaphore, #tpu.memory_space<semaphore_mem>>
        %128 = tpu.memref_squeeze %127 : memref<1x!tpu.dma_semaphore, #tpu.memory_space<semaphore_mem>> -> memref<!tpu.dma_semaphore, #tpu.memory_space<semaphore_mem>>
        tpu.enqueue_dma source(%124 : memref<1x16x128xf32, #tpu.memory_space<any>>) target(%126 : memref<1x16x128xf32, #tpu.memory_space<vmem>>) target_semaphore(%128 : memref<!tpu.dma_semaphore, #tpu.memory_space<semaphore_mem>>)
      } else {
      }
      %c0_i32_94 = arith.constant 0 : i32
      %84 = arith.cmpi eq, %arg1, %c0_i32_94 : i32
      %85 = arith.extui %84 : i1 to i32
      %c0_i32_95 = arith.constant 0 : i32
      %86 = arith.cmpi ne, %85, %c0_i32_95 : i32
      scf.if %86 {
        %c1_136 = arith.constant 1 : index
        %c0_137 = arith.constant 0 : index
        %c0_138 = arith.constant 0 : index
        %c0_139 = arith.constant 0 : index
        %122 = vector.load %arg7[%c1_136, %c0_137, %c0_138, %c0_139] : memref<3x18x16x128xf32, #tpu.memory_space<vmem>>, vector<1x1x16x128xf32>
        %123 = vector.shape_cast %122 : vector<1x1x16x128xf32> to vector<1x16x128xf32>
        %124 = vector.shape_cast %80 : vector<1x16x128xf32> to vector<1x1x16x128xf32>
        tpu.vector_store %arg7[%c1_136, %c0_137, %c0_138, %c0_139], %124 {strides = array<i32>} : memref<3x18x16x128xf32, #tpu.memory_space<vmem>>, vector<1x1x16x128xf32>,
      } else {
      }
      %c0_i32_96 = arith.constant 0 : i32
      %87 = arith.cmpi slt, %arg1, %c0_i32_96 : i32
      %88 = arith.extui %87 : i1 to i32
      %c0_i32_97 = arith.constant 0 : i32
      %89 = arith.cmpi ne, %88, %c0_i32_97 : i32
      scf.if %89 {
        %c16_i32_136 = arith.constant 16 : i32
        %122 = arith.addi %73, %c16_i32_136 : i32
        %c1_i32_137 = arith.constant 1 : i32
        %c2_i32 = arith.constant 2 : i32
        %c0_i32_138 = arith.constant 0 : i32
        %c0_i32_139 = arith.constant 0 : i32
        %123 = tpu.memref_slice %arg3[%arg0, %122, %c0_i32_138, %c0_i32_139] : memref<2x16x16x128xf32, #tpu.memory_space<any>> -> memref<1x1x16x128xf32, #tpu.memory_space<any>>
        %124 = tpu.memref_squeeze %123 : memref<1x1x16x128xf32, #tpu.memory_space<any>> -> memref<1x16x128xf32, #tpu.memory_space<any>>
        %c17_i32 = arith.constant 17 : i32
        %c0_i32_140 = arith.constant 0 : i32
        %c0_i32_141 = arith.constant 0 : i32
        %125 = tpu.memref_slice %arg7[%c1_i32_137, %c17_i32, %c0_i32_140, %c0_i32_141] : memref<3x18x16x128xf32, #tpu.memory_space<vmem>> -> memref<1x1x16x128xf32, #tpu.memory_space<vmem>>
        %126 = tpu.memref_squeeze %125 : memref<1x1x16x128xf32, #tpu.memory_space<vmem>> -> memref<1x16x128xf32, #tpu.memory_space<vmem>>
        %127 = tpu.memref_slice %arg8[%c2_i32] : memref<3x!tpu.dma_semaphore, #tpu.memory_space<semaphore_mem>> -> memref<1x!tpu.dma_semaphore, #tpu.memory_space<semaphore_mem>>
        %128 = tpu.memref_squeeze %127 : memref<1x!tpu.dma_semaphore, #tpu.memory_space<semaphore_mem>> -> memref<!tpu.dma_semaphore, #tpu.memory_space<semaphore_mem>>
        tpu.enqueue_dma source(%124 : memref<1x16x128xf32, #tpu.memory_space<any>>) target(%126 : memref<1x16x128xf32, #tpu.memory_space<vmem>>) target_semaphore(%128 : memref<!tpu.dma_semaphore, #tpu.memory_space<semaphore_mem>>)
      } else {
      }
      %c0_i32_98 = arith.constant 0 : i32
      %90 = arith.cmpi eq, %arg1, %c0_i32_98 : i32
      %91 = arith.extui %90 : i1 to i32
      %c0_i32_99 = arith.constant 0 : i32
      %92 = arith.cmpi ne, %91, %c0_i32_99 : i32
      scf.if %92 {
        %c1_136 = arith.constant 1 : index
        %c17 = arith.constant 17 : index
        %c0_137 = arith.constant 0 : index
        %c0_138 = arith.constant 0 : index
        %122 = vector.load %arg7[%c1_136, %c17, %c0_137, %c0_138] : memref<3x18x16x128xf32, #tpu.memory_space<vmem>>, vector<1x1x16x128xf32>
        %123 = vector.shape_cast %122 : vector<1x1x16x128xf32> to vector<1x16x128xf32>
        %124 = vector.shape_cast %80 : vector<1x16x128xf32> to vector<1x1x16x128xf32>
        tpu.vector_store %arg7[%c1_136, %c17, %c0_137, %c0_138], %124 {strides = array<i32>} : memref<3x18x16x128xf32, #tpu.memory_space<vmem>>, vector<1x1x16x128xf32>,
      } else {
      }
      %c1_i32_100 = arith.constant 1 : i32
      %c0_i32_101 = arith.constant 0 : i32
      %c0_i32_102 = arith.constant 0 : i32
      %c0_i32_103 = arith.constant 0 : i32
      %c0_i32_104 = arith.constant 0 : i32
      %93 = tpu.memref_slice %arg3[%arg0, %c0_i32_102, %c0_i32_103, %c0_i32_104] : memref<2x16x16x128xf32, #tpu.memory_space<any>> -> memref<1x16x16x128xf32, #tpu.memory_space<any>>
      %94 = tpu.memref_squeeze %93 : memref<1x16x16x128xf32, #tpu.memory_space<any>> -> memref<16x16x128xf32, #tpu.memory_space<any>>
      %c1_i32_105 = arith.constant 1 : i32
      %c0_i32_106 = arith.constant 0 : i32
      %c0_i32_107 = arith.constant 0 : i32
      %95 = tpu.memref_slice %arg7[%c1_i32_100, %c1_i32_105, %c0_i32_106, %c0_i32_107] : memref<3x18x16x128xf32, #tpu.memory_space<vmem>> -> memref<1x16x16x128xf32, #tpu.memory_space<vmem>>
      %96 = tpu.memref_squeeze %95 : memref<1x16x16x128xf32, #tpu.memory_space<vmem>> -> memref<16x16x128xf32, #tpu.memory_space<vmem>>
      %97 = tpu.memref_slice %arg8[%c0_i32_101] : memref<3x!tpu.dma_semaphore, #tpu.memory_space<semaphore_mem>> -> memref<1x!tpu.dma_semaphore, #tpu.memory_space<semaphore_mem>>
      %98 = tpu.memref_squeeze %97 : memref<1x!tpu.dma_semaphore, #tpu.memory_space<semaphore_mem>> -> memref<!tpu.dma_semaphore, #tpu.memory_space<semaphore_mem>>
      tpu.wait_dma2 semaphore(%98 : memref<!tpu.dma_semaphore, #tpu.memory_space<semaphore_mem>>) src(%94 : memref<16x16x128xf32, #tpu.memory_space<any>>) dst(%96 : memref<16x16x128xf32, #tpu.memory_space<vmem>>)
      %c0_i32_108 = arith.constant 0 : i32
      %99 = arith.cmpi sgt, %arg1, %c0_i32_108 : i32
      %100 = arith.extui %99 : i1 to i32
      %c0_i32_109 = arith.constant 0 : i32
      %101 = arith.cmpi ne, %100, %c0_i32_109 : i32
      scf.if %101 {
        %c1_i32_136 = arith.constant 1 : i32
        %c1_i32_137 = arith.constant 1 : i32
        %c0_i32_138 = arith.constant 0 : i32
        %c0_i32_139 = arith.constant 0 : i32
        %c0_i32_140 = arith.constant 0 : i32
        %122 = tpu.memref_slice %arg3[%arg0, %c0_i32_138, %c0_i32_139, %c0_i32_140] : memref<2x16x16x128xf32, #tpu.memory_space<any>> -> memref<1x1x16x128xf32, #tpu.memory_space<any>>
        %123 = tpu.memref_squeeze %122 : memref<1x1x16x128xf32, #tpu.memory_space<any>> -> memref<1x16x128xf32, #tpu.memory_space<any>>
        %c0_i32_141 = arith.constant 0 : i32
        %c0_i32_142 = arith.constant 0 : i32
        %c0_i32_143 = arith.constant 0 : i32
        %124 = tpu.memref_slice %arg7[%c1_i32_136, %c0_i32_141, %c0_i32_142, %c0_i32_143] : memref<3x18x16x128xf32, #tpu.memory_space<vmem>> -> memref<1x1x16x128xf32, #tpu.memory_space<vmem>>
        %125 = tpu.memref_squeeze %124 : memref<1x1x16x128xf32, #tpu.memory_space<vmem>> -> memref<1x16x128xf32, #tpu.memory_space<vmem>>
        %126 = tpu.memref_slice %arg8[%c1_i32_137] : memref<3x!tpu.dma_semaphore, #tpu.memory_space<semaphore_mem>> -> memref<1x!tpu.dma_semaphore, #tpu.memory_space<semaphore_mem>>
        %127 = tpu.memref_squeeze %126 : memref<1x!tpu.dma_semaphore, #tpu.memory_space<semaphore_mem>> -> memref<!tpu.dma_semaphore, #tpu.memory_space<semaphore_mem>>
        tpu.wait_dma2 semaphore(%127 : memref<!tpu.dma_semaphore, #tpu.memory_space<semaphore_mem>>) src(%123 : memref<1x16x128xf32, #tpu.memory_space<any>>) dst(%125 : memref<1x16x128xf32, #tpu.memory_space<vmem>>)
      } else {
      }
      %c0_i32_110 = arith.constant 0 : i32
      %102 = arith.cmpi slt, %arg1, %c0_i32_110 : i32
      %103 = arith.extui %102 : i1 to i32
      %c0_i32_111 = arith.constant 0 : i32
      %104 = arith.cmpi ne, %103, %c0_i32_111 : i32
      scf.if %104 {
        %c1_i32_136 = arith.constant 1 : i32
        %c2_i32 = arith.constant 2 : i32
        %c0_i32_137 = arith.constant 0 : i32
        %c0_i32_138 = arith.constant 0 : i32
        %c0_i32_139 = arith.constant 0 : i32
        %122 = tpu.memref_slice %arg3[%arg0, %c0_i32_137, %c0_i32_138, %c0_i32_139] : memref<2x16x16x128xf32, #tpu.memory_space<any>> -> memref<1x1x16x128xf32, #tpu.memory_space<any>>
        %123 = tpu.memref_squeeze %122 : memref<1x1x16x128xf32, #tpu.memory_space<any>> -> memref<1x16x128xf32, #tpu.memory_space<any>>
        %c17_i32 = arith.constant 17 : i32
        %c0_i32_140 = arith.constant 0 : i32
        %c0_i32_141 = arith.constant 0 : i32
        %124 = tpu.memref_slice %arg7[%c1_i32_136, %c17_i32, %c0_i32_140, %c0_i32_141] : memref<3x18x16x128xf32, #tpu.memory_space<vmem>> -> memref<1x1x16x128xf32, #tpu.memory_space<vmem>>
        %125 = tpu.memref_squeeze %124 : memref<1x1x16x128xf32, #tpu.memory_space<vmem>> -> memref<1x16x128xf32, #tpu.memory_space<vmem>>
        %126 = tpu.memref_slice %arg8[%c2_i32] : memref<3x!tpu.dma_semaphore, #tpu.memory_space<semaphore_mem>> -> memref<1x!tpu.dma_semaphore, #tpu.memory_space<semaphore_mem>>
        %127 = tpu.memref_squeeze %126 : memref<1x!tpu.dma_semaphore, #tpu.memory_space<semaphore_mem>> -> memref<!tpu.dma_semaphore, #tpu.memory_space<semaphore_mem>>
        tpu.wait_dma2 semaphore(%127 : memref<!tpu.dma_semaphore, #tpu.memory_space<semaphore_mem>>) src(%123 : memref<1x16x128xf32, #tpu.memory_space<any>>) dst(%125 : memref<1x16x128xf32, #tpu.memory_space<vmem>>)
      } else {
      }
      %cst_112 = arith.constant 0.000000e+00 : f32
      %105 = vector.broadcast %cst_112 : f32 to vector<18x1x128xf32>
      %c0_113 = arith.constant 0 : index
      %c0_114 = arith.constant 0 : index
      %c0_115 = arith.constant 0 : index
      %c0_116 = arith.constant 0 : index
      %106 = vector.load %arg7[%c0_113, %c0_114, %c0_115, %c0_116] : memref<3x18x16x128xf32, #tpu.memory_space<vmem>>, vector<1x18x1x128xf32>
      %107 = vector.shape_cast %106 : vector<1x18x1x128xf32> to vector<18x1x128xf32>
      %108 = vector.shape_cast %105 : vector<18x1x128xf32> to vector<1x18x1x128xf32>
      tpu.vector_store %arg7[%c0_113, %c0_114, %c0_115, %c0_116], %108 {strides = array<i32>} : memref<3x18x16x128xf32, #tpu.memory_space<vmem>>, vector<1x18x1x128xf32>,
      %c1_117 = arith.constant 1 : index
      %c0_118 = arith.constant 0 : index
      %c0_119 = arith.constant 0 : index
      %c0_120 = arith.constant 0 : index
      %109 = vector.load %arg7[%c1_117, %c0_118, %c0_119, %c0_120] : memref<3x18x16x128xf32, #tpu.memory_space<vmem>>, vector<1x18x15x128xf32>
      %110 = vector.shape_cast %109 : vector<1x18x15x128xf32> to vector<18x15x128xf32>
      %c0_121 = arith.constant 0 : index
      %c0_122 = arith.constant 0 : index
      %c1_123 = arith.constant 1 : index
      %c0_124 = arith.constant 0 : index
      %111 = vector.load %arg7[%c0_121, %c0_122, %c1_123, %c0_124] : memref<3x18x16x128xf32, #tpu.memory_space<vmem>>, vector<1x18x15x128xf32>
      %112 = vector.shape_cast %111 : vector<1x18x15x128xf32> to vector<18x15x128xf32>
      %113 = vector.shape_cast %110 : vector<18x15x128xf32> to vector<1x18x15x128xf32>
      tpu.vector_store %arg7[%c0_121, %c0_122, %c1_123, %c0_124], %113 {strides = array<i32>} : memref<3x18x16x128xf32, #tpu.memory_space<vmem>>, vector<1x18x15x128xf32>,
      %c1_125 = arith.constant 1 : index
      %c0_126 = arith.constant 0 : index
      %c1_127 = arith.constant 1 : index
      %c0_128 = arith.constant 0 : index
      %114 = vector.load %arg7[%c1_125, %c0_126, %c1_127, %c0_128] : memref<3x18x16x128xf32, #tpu.memory_space<vmem>>, vector<1x18x15x128xf32>
      %115 = vector.shape_cast %114 : vector<1x18x15x128xf32> to vector<18x15x128xf32>
      %c2_129 = arith.constant 2 : index
      %c0_130 = arith.constant 0 : index
      %c0_131 = arith.constant 0 : index
      %c0_132 = arith.constant 0 : index
      %116 = vector.load %arg7[%c2_129, %c0_130, %c0_131, %c0_132] : memref<3x18x16x128xf32, #tpu.memory_space<vmem>>, vector<1x18x15x128xf32>
      %117 = vector.shape_cast %116 : vector<1x18x15x128xf32> to vector<18x15x128xf32>
      %118 = vector.shape_cast %115 : vector<18x15x128xf32> to vector<1x18x15x128xf32>
      tpu.vector_store %arg7[%c2_129, %c0_130, %c0_131, %c0_132], %118 {strides = array<i32>} : memref<3x18x16x128xf32, #tpu.memory_space<vmem>>, vector<1x18x15x128xf32>,
      %c2_133 = arith.constant 2 : index
      %c0_134 = arith.constant 0 : index
      %c15 = arith.constant 15 : index
      %c0_135 = arith.constant 0 : index
      %119 = vector.load %arg7[%c2_133, %c0_134, %c15, %c0_135] : memref<3x18x16x128xf32, #tpu.memory_space<vmem>>, vector<1x18x1x128xf32>
      %120 = vector.shape_cast %119 : vector<1x18x1x128xf32> to vector<18x1x128xf32>
      %121 = vector.shape_cast %105 : vector<18x1x128xf32> to vector<1x18x1x128xf32>
      tpu.vector_store %arg7[%c2_133, %c0_134, %c15, %c0_135], %121 {strides = array<i32>} : memref<3x18x16x128xf32, #tpu.memory_space<vmem>>, vector<1x18x1x128xf32>,
    } else {
    }
    %c0 = arith.constant 0 : index
    %c0_1 = arith.constant 0 : index
    %c0_2 = arith.constant 0 : index
    %c0_3 = arith.constant 0 : index
    %3 = vector.load %arg7[%c0, %c0_1, %c0_2, %c0_3] : memref<3x18x16x128xf32, #tpu.memory_space<vmem>>, vector<1x16x16x128xf32>
    %4 = vector.shape_cast %3 : vector<1x16x16x128xf32> to vector<16x16x128xf32>
    %5 = vector.shape_cast %4 : vector<16x16x128xf32> to vector<256x128xf32>
    %c0_4 = arith.constant 0 : index
    %c0_5 = arith.constant 0 : index
    %c0_6 = arith.constant 0 : index
    %c0_7 = arith.constant 0 : index
    %6 = vector.load %arg4[%c0_4, %c0_5, %c0_6, %c0_7] : memref<3x3x128x128xf32, #tpu.memory_space<vmem>>, vector<1x1x128x128xf32>
    %7 = vector.shape_cast %6 : vector<1x1x128x128xf32> to vector<128x128xf32>
    %cst = arith.constant dense<0.000000e+00> : vector<256x128xf32>
    %8 = tpu.matmul %5, %7, %cst {dimension_numbers = #tpu.dot_dimension_numbers<[1], [0], [0], [1], [0, 0, 1, 1], [], []>} : vector<256x128xf32>, vector<128x128xf32>, vector<256x128xf32> -> vector<256x128xf32>
    %c1 = arith.constant 1 : index
    %c0_8 = arith.constant 0 : index
    %c0_9 = arith.constant 0 : index
    %c0_10 = arith.constant 0 : index
    %9 = vector.load %arg7[%c1, %c0_8, %c0_9, %c0_10] : memref<3x18x16x128xf32, #tpu.memory_space<vmem>>, vector<1x16x16x128xf32>
    %10 = vector.shape_cast %9 : vector<1x16x16x128xf32> to vector<16x16x128xf32>
    %11 = vector.shape_cast %10 : vector<16x16x128xf32> to vector<256x128xf32>
    %c0_11 = arith.constant 0 : index
    %c1_12 = arith.constant 1 : index
    %c0_13 = arith.constant 0 : index
    %c0_14 = arith.constant 0 : index
    %12 = vector.load %arg4[%c0_11, %c1_12, %c0_13, %c0_14] : memref<3x3x128x128xf32, #tpu.memory_space<vmem>>, vector<1x1x128x128xf32>
    %13 = vector.shape_cast %12 : vector<1x1x128x128xf32> to vector<128x128xf32>
    %cst_15 = arith.constant dense<0.000000e+00> : vector<256x128xf32>
    %14 = tpu.matmul %11, %13, %cst_15 {dimension_numbers = #tpu.dot_dimension_numbers<[1], [0], [0], [1], [0, 0, 1, 1], [], []>} : vector<256x128xf32>, vector<128x128xf32>, vector<256x128xf32> -> vector<256x128xf32>
    %15 = arith.addf %8, %14 : vector<256x128xf32>
    %c2 = arith.constant 2 : index
    %c0_16 = arith.constant 0 : index
    %c0_17 = arith.constant 0 : index
    %c0_18 = arith.constant 0 : index
    %16 = vector.load %arg7[%c2, %c0_16, %c0_17, %c0_18] : memref<3x18x16x128xf32, #tpu.memory_space<vmem>>, vector<1x16x16x128xf32>
    %17 = vector.shape_cast %16 : vector<1x16x16x128xf32> to vector<16x16x128xf32>
    %18 = vector.shape_cast %17 : vector<16x16x128xf32> to vector<256x128xf32>
    %c0_19 = arith.constant 0 : index
    %c2_20 = arith.constant 2 : index
    %c0_21 = arith.constant 0 : index
    %c0_22 = arith.constant 0 : index
    %19 = vector.load %arg4[%c0_19, %c2_20, %c0_21, %c0_22] : memref<3x3x128x128xf32, #tpu.memory_space<vmem>>, vector<1x1x128x128xf32>
    %20 = vector.shape_cast %19 : vector<1x1x128x128xf32> to vector<128x128xf32>
    %cst_23 = arith.constant dense<0.000000e+00> : vector<256x128xf32>
    %21 = tpu.matmul %18, %20, %cst_23 {dimension_numbers = #tpu.dot_dimension_numbers<[1], [0], [0], [1], [0, 0, 1, 1], [], []>} : vector<256x128xf32>, vector<128x128xf32>, vector<256x128xf32> -> vector<256x128xf32>
    %22 = arith.addf %15, %21 : vector<256x128xf32>
    %c0_24 = arith.constant 0 : index
    %c1_25 = arith.constant 1 : index
    %c0_26 = arith.constant 0 : index
    %c0_27 = arith.constant 0 : index
    %23 = vector.load %arg7[%c0_24, %c1_25, %c0_26, %c0_27] : memref<3x18x16x128xf32, #tpu.memory_space<vmem>>, vector<1x16x16x128xf32>
    %24 = vector.shape_cast %23 : vector<1x16x16x128xf32> to vector<16x16x128xf32>
    %25 = vector.shape_cast %24 : vector<16x16x128xf32> to vector<256x128xf32>
    %c1_28 = arith.constant 1 : index
    %c0_29 = arith.constant 0 : index
    %c0_30 = arith.constant 0 : index
    %c0_31 = arith.constant 0 : index
    %26 = vector.load %arg4[%c1_28, %c0_29, %c0_30, %c0_31] : memref<3x3x128x128xf32, #tpu.memory_space<vmem>>, vector<1x1x128x128xf32>
    %27 = vector.shape_cast %26 : vector<1x1x128x128xf32> to vector<128x128xf32>
    %cst_32 = arith.constant dense<0.000000e+00> : vector<256x128xf32>
    %28 = tpu.matmul %25, %27, %cst_32 {dimension_numbers = #tpu.dot_dimension_numbers<[1], [0], [0], [1], [0, 0, 1, 1], [], []>} : vector<256x128xf32>, vector<128x128xf32>, vector<256x128xf32> -> vector<256x128xf32>
    %29 = arith.addf %22, %28 : vector<256x128xf32>
    %c1_33 = arith.constant 1 : index
    %c1_34 = arith.constant 1 : index
    %c0_35 = arith.constant 0 : index
    %c0_36 = arith.constant 0 : index
    %30 = vector.load %arg7[%c1_33, %c1_34, %c0_35, %c0_36] : memref<3x18x16x128xf32, #tpu.memory_space<vmem>>, vector<1x16x16x128xf32>
    %31 = vector.shape_cast %30 : vector<1x16x16x128xf32> to vector<16x16x128xf32>
    %32 = vector.shape_cast %31 : vector<16x16x128xf32> to vector<256x128xf32>
    %c1_37 = arith.constant 1 : index
    %c1_38 = arith.constant 1 : index
    %c0_39 = arith.constant 0 : index
    %c0_40 = arith.constant 0 : index
    %33 = vector.load %arg4[%c1_37, %c1_38, %c0_39, %c0_40] : memref<3x3x128x128xf32, #tpu.memory_space<vmem>>, vector<1x1x128x128xf32>
    %34 = vector.shape_cast %33 : vector<1x1x128x128xf32> to vector<128x128xf32>
    %cst_41 = arith.constant dense<0.000000e+00> : vector<256x128xf32>
    %35 = tpu.matmul %32, %34, %cst_41 {dimension_numbers = #tpu.dot_dimension_numbers<[1], [0], [0], [1], [0, 0, 1, 1], [], []>} : vector<256x128xf32>, vector<128x128xf32>, vector<256x128xf32> -> vector<256x128xf32>
    %36 = arith.addf %29, %35 : vector<256x128xf32>
    %c2_42 = arith.constant 2 : index
    %c1_43 = arith.constant 1 : index
    %c0_44 = arith.constant 0 : index
    %c0_45 = arith.constant 0 : index
    %37 = vector.load %arg7[%c2_42, %c1_43, %c0_44, %c0_45] : memref<3x18x16x128xf32, #tpu.memory_space<vmem>>, vector<1x16x16x128xf32>
    %38 = vector.shape_cast %37 : vector<1x16x16x128xf32> to vector<16x16x128xf32>
    %39 = vector.shape_cast %38 : vector<16x16x128xf32> to vector<256x128xf32>
    %c1_46 = arith.constant 1 : index
    %c2_47 = arith.constant 2 : index
    %c0_48 = arith.constant 0 : index
    %c0_49 = arith.constant 0 : index
    %40 = vector.load %arg4[%c1_46, %c2_47, %c0_48, %c0_49] : memref<3x3x128x128xf32, #tpu.memory_space<vmem>>, vector<1x1x128x128xf32>
    %41 = vector.shape_cast %40 : vector<1x1x128x128xf32> to vector<128x128xf32>
    %cst_50 = arith.constant dense<0.000000e+00> : vector<256x128xf32>
    %42 = tpu.matmul %39, %41, %cst_50 {dimension_numbers = #tpu.dot_dimension_numbers<[1], [0], [0], [1], [0, 0, 1, 1], [], []>} : vector<256x128xf32>, vector<128x128xf32>, vector<256x128xf32> -> vector<256x128xf32>
    %43 = arith.addf %36, %42 : vector<256x128xf32>
    %c0_51 = arith.constant 0 : index
    %c2_52 = arith.constant 2 : index
    %c0_53 = arith.constant 0 : index
    %c0_54 = arith.constant 0 : index
    %44 = vector.load %arg7[%c0_51, %c2_52, %c0_53, %c0_54] : memref<3x18x16x128xf32, #tpu.memory_space<vmem>>, vector<1x16x16x128xf32>
    %45 = vector.shape_cast %44 : vector<1x16x16x128xf32> to vector<16x16x128xf32>
    %46 = vector.shape_cast %45 : vector<16x16x128xf32> to vector<256x128xf32>
    %c2_55 = arith.constant 2 : index
    %c0_56 = arith.constant 0 : index
    %c0_57 = arith.constant 0 : index
    %c0_58 = arith.constant 0 : index
    %47 = vector.load %arg4[%c2_55, %c0_56, %c0_57, %c0_58] : memref<3x3x128x128xf32, #tpu.memory_space<vmem>>, vector<1x1x128x128xf32>
    %48 = vector.shape_cast %47 : vector<1x1x128x128xf32> to vector<128x128xf32>
    %cst_59 = arith.constant dense<0.000000e+00> : vector<256x128xf32>
    %49 = tpu.matmul %46, %48, %cst_59 {dimension_numbers = #tpu.dot_dimension_numbers<[1], [0], [0], [1], [0, 0, 1, 1], [], []>} : vector<256x128xf32>, vector<128x128xf32>, vector<256x128xf32> -> vector<256x128xf32>
    %50 = arith.addf %43, %49 : vector<256x128xf32>
    %c1_60 = arith.constant 1 : index
    %c2_61 = arith.constant 2 : index
    %c0_62 = arith.constant 0 : index
    %c0_63 = arith.constant 0 : index
    %51 = vector.load %arg7[%c1_60, %c2_61, %c0_62, %c0_63] : memref<3x18x16x128xf32, #tpu.memory_space<vmem>>, vector<1x16x16x128xf32>
    %52 = vector.shape_cast %51 : vector<1x16x16x128xf32> to vector<16x16x128xf32>
    %53 = vector.shape_cast %52 : vector<16x16x128xf32> to vector<256x128xf32>
    %c2_64 = arith.constant 2 : index
    %c1_65 = arith.constant 1 : index
    %c0_66 = arith.constant 0 : index
    %c0_67 = arith.constant 0 : index
    %54 = vector.load %arg4[%c2_64, %c1_65, %c0_66, %c0_67] : memref<3x3x128x128xf32, #tpu.memory_space<vmem>>, vector<1x1x128x128xf32>
    %55 = vector.shape_cast %54 : vector<1x1x128x128xf32> to vector<128x128xf32>
    %cst_68 = arith.constant dense<0.000000e+00> : vector<256x128xf32>
    %56 = tpu.matmul %53, %55, %cst_68 {dimension_numbers = #tpu.dot_dimension_numbers<[1], [0], [0], [1], [0, 0, 1, 1], [], []>} : vector<256x128xf32>, vector<128x128xf32>, vector<256x128xf32> -> vector<256x128xf32>
    %57 = arith.addf %50, %56 : vector<256x128xf32>
    %c2_69 = arith.constant 2 : index
    %c2_70 = arith.constant 2 : index
    %c0_71 = arith.constant 0 : index
    %c0_72 = arith.constant 0 : index
    %58 = vector.load %arg7[%c2_69, %c2_70, %c0_71, %c0_72] : memref<3x18x16x128xf32, #tpu.memory_space<vmem>>, vector<1x16x16x128xf32>
    %59 = vector.shape_cast %58 : vector<1x16x16x128xf32> to vector<16x16x128xf32>
    %60 = vector.shape_cast %59 : vector<16x16x128xf32> to vector<256x128xf32>
    %c2_73 = arith.constant 2 : index
    %c2_74 = arith.constant 2 : index
    %c0_75 = arith.constant 0 : index
    %c0_76 = arith.constant 0 : index
    %61 = vector.load %arg4[%c2_73, %c2_74, %c0_75, %c0_76] : memref<3x3x128x128xf32, #tpu.memory_space<vmem>>, vector<1x1x128x128xf32>
    %62 = vector.shape_cast %61 : vector<1x1x128x128xf32> to vector<128x128xf32>
    %cst_77 = arith.constant dense<0.000000e+00> : vector<256x128xf32>
    %63 = tpu.matmul %60, %62, %cst_77 {dimension_numbers = #tpu.dot_dimension_numbers<[1], [0], [0], [1], [0, 0, 1, 1], [], []>} : vector<256x128xf32>, vector<128x128xf32>, vector<256x128xf32> -> vector<256x128xf32>
    %64 = arith.addf %57, %63 : vector<256x128xf32>
    %c0_78 = arith.constant 0 : index
    %c0_79 = arith.constant 0 : index
    %65 = vector.load %arg5[%c0_78, %c0_79] : memref<1x128xf32, #tpu.memory_space<vmem>>, vector<1x128xf32>
    %66 = vector.broadcast %65 : vector<1x128xf32> to vector<256x128xf32>
    %67 = arith.addf %64, %66 : vector<256x128xf32>
    %cst_80 = arith.constant 0.000000e+00 : f32
    %68 = vector.broadcast %cst_80 : f32 to vector<256x128xf32>
    %69 = arith.maximumf %67, %68 : vector<256x128xf32>
    %70 = vector.shape_cast %69 : vector<256x128xf32> to vector<1x16x16x128xf32>
    %c0_81 = arith.constant 0 : index
    %c0_82 = arith.constant 0 : index
    %c0_83 = arith.constant 0 : index
    %c0_84 = arith.constant 0 : index
    %71 = vector.load %arg6[%c0_81, %c0_82, %c0_83, %c0_84] : memref<1x16x16x128xf32, #tpu.memory_space<vmem>>, vector<1x16x16x128xf32>
    tpu.vector_store %arg6[%c0_81, %c0_82, %c0_83, %c0_84], %70 {strides = array<i32>} : memref<1x16x16x128xf32, #tpu.memory_space<vmem>>, vector<1x16x16x128xf32>,
    return
  }
  func.func @transform_1(%arg0: i32, %arg1: i32, %arg2: i32) -> (i32, i32, i32, i32) {
    %c0_i32 = arith.constant 0 : i32
    %c0_i32_0 = arith.constant 0 : i32
    %c0_i32_1 = arith.constant 0 : i32
    %c0_i32_2 = arith.constant 0 : i32
    return %c0_i32, %c0_i32_0, %c0_i32_1, %arg2 : i32, i32, i32, i32
  }
  func.func @transform_2(%arg0: i32, %arg1: i32, %arg2: i32) -> (i32, i32) {
    %c0_i32 = arith.constant 0 : i32
    %c0_i32_0 = arith.constant 0 : i32
    return %c0_i32, %arg2 : i32, i32
  }
  func.func @transform_3(%arg0: i32, %arg1: i32, %arg2: i32) -> (i32, i32, i32, i32) {
    %c0_i32 = arith.constant 0 : i32
    %c0_i32_0 = arith.constant 0 : i32
    return %arg0, %arg1, %c0_i32, %arg2 : i32, i32, i32, i32
  }
}

module attributes {stable_mosaic.version = 11 : i64} {
  func.func @_maxpool_k2s2_kernel(%arg0: i32, %arg1: i32, %arg2: memref<1x8x2x8x256xf32, #tpu.memory_space<vmem>>, %arg3: memref<1x8x8x128xf32, #tpu.memory_space<vmem>>) attributes {dimension_semantics = [#tpu.dimension_semantics<parallel>, #tpu.dimension_semantics<parallel>], iteration_bounds = array<i64: 2, 1>, scalar_prefetch = 0 : i64, scratch_operands = 0 : i64, tpu.core_type = #tpu.core_type<tc>, window_params = [{transform_indices = @transform_0, window_bounds = array<i64: 1, 8, 2, 8, 256>}, {transform_indices = @transform_1, window_bounds = array<i64: 1, 8, 8, 128>}]} {
    %c0 = arith.constant 0 : index
    %c0_0 = arith.constant 0 : index
    %c0_1 = arith.constant 0 : index
    %c0_2 = arith.constant 0 : index
    %c0_3 = arith.constant 0 : index
    %0 = vector.load %arg2[%c0, %c0_0, %c0_1, %c0_2, %c0_3] : memref<1x8x2x8x256xf32, #tpu.memory_space<vmem>>, vector<1x8x2x8x256xf32>
    %1 = vector.shape_cast %0 : vector<1x8x2x8x256xf32> to vector<8x2x8x256xf32>
    %2 = vector.extract_strided_slice %1 {offsets = [0, 0, 0, 0], sizes = [8, 1, 8, 256], strides = [1, 1, 1, 1]} : vector<8x2x8x256xf32> to vector<8x1x8x256xf32>
    %3 = vector.shape_cast %2 : vector<8x1x8x256xf32> to vector<8x8x256xf32>
    %4 = vector.extract_strided_slice %1 {offsets = [0, 1, 0, 0], sizes = [8, 1, 8, 256], strides = [1, 1, 1, 1]} : vector<8x2x8x256xf32> to vector<8x1x8x256xf32>
    %5 = vector.shape_cast %4 : vector<8x1x8x256xf32> to vector<8x8x256xf32>
    %6 = arith.maximumf %3, %5 : vector<8x8x256xf32>
    %7 = vector.extract_strided_slice %6 {offsets = [0, 0, 0], sizes = [8, 8, 128], strides = [1, 1, 1]} : vector<8x8x256xf32> to vector<8x8x128xf32>
    %8 = vector.extract_strided_slice %6 {offsets = [0, 0, 128], sizes = [8, 8, 128], strides = [1, 1, 1]} : vector<8x8x256xf32> to vector<8x8x128xf32>
    %9 = arith.maximumf %7, %8 : vector<8x8x128xf32>
    %c0_4 = arith.constant 0 : index
    %c0_5 = arith.constant 0 : index
    %c0_6 = arith.constant 0 : index
    %c0_7 = arith.constant 0 : index
    %10 = vector.load %arg3[%c0_4, %c0_5, %c0_6, %c0_7] : memref<1x8x8x128xf32, #tpu.memory_space<vmem>>, vector<1x8x8x128xf32>
    %11 = vector.shape_cast %10 : vector<1x8x8x128xf32> to vector<8x8x128xf32>
    %12 = vector.shape_cast %9 : vector<8x8x128xf32> to vector<1x8x8x128xf32>
    tpu.vector_store %arg3[%c0_4, %c0_5, %c0_6, %c0_7], %12 {strides = array<i32>} : memref<1x8x8x128xf32, #tpu.memory_space<vmem>>, vector<1x8x8x128xf32>,
    return
  }
  func.func @transform_0(%arg0: i32, %arg1: i32) -> (i32, i32, i32, i32, i32) {
    %c0_i32 = arith.constant 0 : i32
    %c0_i32_0 = arith.constant 0 : i32
    %c0_i32_1 = arith.constant 0 : i32
    %c0_i32_2 = arith.constant 0 : i32
    return %arg0, %arg1, %c0_i32, %c0_i32_0, %c0_i32_1 : i32, i32, i32, i32, i32
  }
  func.func @transform_1(%arg0: i32, %arg1: i32) -> (i32, i32, i32, i32) {
    %c0_i32 = arith.constant 0 : i32
    %c0_i32_0 = arith.constant 0 : i32
    %c0_i32_1 = arith.constant 0 : i32
    return %arg0, %arg1, %c0_i32, %c0_i32_0 : i32, i32, i32, i32
  }
}

</mosaic_0001>

<bundles_post_ra>
// kernel: plain_block_forward.7
= control target key start
LH: loop header
LB: loop body
LE: loop exit
PB: predicated region body
PF: predicated region fallthrough
CT: control target
= control target key end

     0   :  { %s384_s6 = smov 0   ;;  %s386_s7 = smov 0   ;;  %s461_s0 = inlined_call_operand.vmem [shape: f32[2,8,2,8,256], index: 0, kind: input, shape index: {}]   ;;  %s462_s1 = inlined_call_operand.vmem [shape: f32[2,8,8,128], index: 1, kind: output, shape index: {}]  }
   0x1   :  { %s388_s8 = smov 0  }
   0x2 LB: > { %s23_s9 = sadd.s32 1, %s368_s7  ;;  %p317_p0 = scmp.ge.s32.totalorder %s372_s8, 1  ;;  %s372_s8 = sphi %s388_s8, %s11_s8   ;;  %s368_s7 = sphi %s386_s7, %s464_s7   ;;  %s364_s6 = sphi %s384_s6, %s463_s6  }
   0x3   : > { %p25_p1 = scmp.ge.s32.totalorder %s23_s9, 2  ;;  %p109_p2 = scmp.lt.s32.totalorder %s372_s8, 3 }
   0x5   : > { %s466_s9 = smov (%p25_p1, %s23_s9), 0  ;;  %p110_p3 = pnand %p317_p0, %p109_p2 }
   0x6   : > { %p139_p4 = scmp.lt.s32.totalorder (!%p110_p3), %s364_s6, 1 }
   0x7   : > { %113 = sbr.rel (%p110_p3) target bundleno = 33 (0x21), region = 24 }
   0xe   : > { %s468_s6 = smov (!%p139_p4, %s364_s6), 1 }
   0xf   : > { %s324_s10 = sshll.u32 %s468_s6, 8  ;;  %s325_s14 = sshll.u32 %s468_s6, 6 }
  0x10   : > { %s405_s13 = scalar_lea.vmem %s461_s0, %s324_s10  ;;  %s419_s17 = scalar_lea.vmem %s462_s1, %s325_s14 }
  0x11   : > { %v159_v0 = vld [vmem:[%s405_s13] sm:$0xff]  ;;  %v160_v1 = vld [vmem:[%s405_s13 + $0x8] sm:$0xff]  ;;  %v161_v2 = vld [vmem:[%s405_s13 + $0x10] sm:$0xff] }
  0x12   : > { %v162_v3 = vld [vmem:[%s405_s13 + $0x18] sm:$0xff]  ;;  %v191_v4 = vmax.f32 %v159_v0, %v161_v2  ;;  %v163_v5 = vld [vmem:[%s405_s13 + $0x20] sm:$0xff]  ;;  %v164_v6 = vld [vmem:[%s405_s13 + $0x28] sm:$0xff] }
  0x13   : > { %v192_v7 = vmax.f32 %v160_v1, %v162_v3  ;;  %v165_v8 = vld [vmem:[%s405_s13 + $0x30] sm:$0xff]  ;;  %v166_v9 = vld [vmem:[%s405_s13 + $0x38] sm:$0xff]  ;;  %v167_v10 = vld [vmem:[%s405_s13 + $0x40] sm:$0xff] }
  0x14   : > { %v193_v11 = vmax.f32 %v163_v5, %v165_v8  ;;  %v194_v12 = vmax.f32 %v164_v6, %v166_v9  ;;  %v168_v13 = vld [vmem:[%s405_s13 + $0x48] sm:$0xff]  ;;  %v169_v14 = vld [vmem:[%s405_s13 + $0x50] sm:$0xff]  ;;  %v170_v15 = vld [vmem:[%s405_s13 + $0x58] sm:$0xff] }
  0x15   : > { %v207_v16 = vmax.f32 %v191_v4, %v192_v7  ;;  %v195_v17 = vmax.f32 %v167_v10, %v169_v14  ;;  %v196_v18 = vmax.f32 %v168_v13, %v170_v15  ;;  %v171_v19 = vld [vmem:[%s405_s13 + $0x60] sm:$0xff]  ;;  %v172_v20 = vld [vmem:[%s405_s13 + $0x68] sm:$0xff]  ;;  %v173_v21 = vld [vmem:[%s405_s13 + $0x70] sm:$0xff] }
  0x16   : > { %v208_v22 = vmax.f32 %v193_v11, %v194_v12  ;;  %v174_v23 = vld [vmem:[%s405_s13 + $0x78] sm:$0xff]  ;;  %v197_v24 = vmax.f32 %v171_v19, %v173_v21  ;;  %v175_v25 = vld [vmem:[%s405_s13 + $0x80] sm:$0xff]  ;;  %v176_v26 = vld [vmem:[%s405_s13 + $0x88] sm:$0xff] }
  0x17   : > { %215 = vst [vmem:[%s419_s17] sm:$0xff] %v207_v16  ;;  %v209_v27 = vmax.f32 %v195_v17, %v196_v18  ;;  %v198_v28 = vmax.f32 %v172_v20, %v174_v23  ;;  %v177_v29 = vld [vmem:[%s405_s13 + $0x90] sm:$0xff]  ;;  %v178_v30 = vld [vmem:[%s405_s13 + $0x98] sm:$0xff]  ;;  %v179_v31 = vld [vmem:[%s405_s13 + $0xa0] sm:$0xff] }
  0x18   : > { %216 = vst [vmem:[%s419_s17 + $0x8] sm:$0xff] %v208_v22  ;;  %v199_v32 = vmax.f32 %v175_v25, %v177_v29  ;;  %v200_v33 = vmax.f32 %v176_v26, %v178_v30  ;;  %v180_v34 = vld [vmem:[%s405_s13 + $0xa8] sm:$0xff]  ;;  %v181_v35 = vld [vmem:[%s405_s13 + $0xb0] sm:$0xff]  ;;  %v182_v36 = vld [vmem:[%s405_s13 + $0xb8] sm:$0xff] }
  0x19   : > { %217 = vst [vmem:[%s419_s17 + $0x10] sm:$0xff] %v209_v27  ;;  %v210_v37 = vmax.f32 %v197_v24, %v198_v28  ;;  %v201_v38 = vmax.f32 %v179_v31, %v181_v35  ;;  %v202_v39 = vmax.f32 %v180_v34, %v182_v36  ;;  %v183_v40 = vld [vmem:[%s405_s13 + $0xc0] sm:$0xff]  ;;  %v184_v41 = vld [vmem:[%s405_s13 + $0xc8] sm:$0xff]  ;;  %v185_v42 = vld [vmem:[%s405_s13 + $0xd0] sm:$0xff] }
  0x1a   : > { %v211_v43 = vmax.f32 %v199_v32, %v200_v33  ;;  %v186_v44 = vld [vmem:[%s405_s13 + $0xd8] sm:$0xff]  ;;  %v203_v45 = vmax.f32 %v183_v40, %v185_v42  ;;  %v187_v46 = vld [vmem:[%s405_s13 + $0xe0] sm:$0xff]  ;;  %v188_v47 = vld [vmem:[%s405_s13 + $0xe8] sm:$0xff] }
  0x1b   : > { %218 = vst [vmem:[%s419_s17 + $0x18] sm:$0xff] %v210_v37  ;;  %v212_v48 = vmax.f32 %v201_v38, %v202_v39  ;;  %v204_v49 = vmax.f32 %v184_v41, %v186_v44  ;;  %v189_v50 = vld [vmem:[%s405_s13 + $0xf0] sm:$0xff]  ;;  %v190_v51 = vld [vmem:[%s405_s13 + $0xf8] sm:$0xff] }
  0x1c   : > { %219 = vst [vmem:[%s419_s17 + $0x20] sm:$0xff] %v211_v43  ;;  %v205_v52 = vmax.f32 %v187_v46, %v189_v50  ;;  %v206_v53 = vmax.f32 %v188_v47, %v190_v51 }
  0x1d   : > { %220 = vst [vmem:[%s419_s17 + $0x28] sm:$0xff] %v212_v48  ;;  %v213_v54 = vmax.f32 %v203_v45, %v204_v49 }
  0x1e   : > { %v214_v55 = vmax.f32 %v205_v52, %v206_v53 }
  0x1f   : > { %221 = vst [vmem:[%s419_s17 + $0x30] sm:$0xff] %v213_v54 }
  0x20   : > { %222 = vst [vmem:[%s419_s17 + $0x38] sm:$0xff] %v214_v55 }
  0x21 PF: > { %s11_s8 = sadd.s32 1, %s372_s8   ;;  %s463_s6 = smov %s368_s7 }
  0x22   : > { %p8_p5 = scmp.ge.s32.totalorder %s11_s8, 4   ;;  %s464_s7 = smov %s466_s9 }
  0x24   :  { %10 = sbr.rel (!%p8_p5) target bundleno = 2 (0x2), region = 54 }

// kernel: plain_block_forward.4
= control target key start
LH: loop header
LB: loop body
LE: loop exit
PB: predicated region body
PF: predicated region fallthrough
CT: control target
= control target key end

     0   :  { %s5548_s12 = smov 0   ;;  %s5550_s13 = smov 0   ;;  %s6622_s0 = inlined_call_operand.vmem [shape: f32[2,16,16,128], index: 0, kind: input, shape index: {}]   ;;  %s6623_s1 = inlined_call_operand.vmem [shape: f32[3,3,128,128], index: 1, kind: input, shape index: {}]   ;;  %s6624_s2 = inlined_call_operand.vmem [shape: f32[1,128], index: 2, kind: input, shape index: {}]   ;;  %s6625_s3 = inlined_call_operand.vmem [shape: f32[2,16,16,128], index: 3, kind: output, shape index: {}]  }
   0x1   :  { %s5552_s14 = smov 0  }
   0x2 LB: > { %s32_s15 = sadd.s32 1, %s5521_s13  ;;  %p3611_p0 = scmp.ge.s32.totalorder %s5525_s14, 1  ;;  %s5525_s14 = sphi %s5552_s14, %s13_s14   ;;  %s5521_s13 = sphi %s5550_s13, %s6650_s13   ;;  %s5517_s12 = sphi %s5548_s12, %s6649_s12  }
   0x3   : > { %p34_p1 = scmp.ge.s32.totalorder %s32_s15, 2  ;;  %p143_p2 = scmp.lt.s32.totalorder %s5525_s14, 3 }
   0x5   : > { %s6652_s15 = smov (%p34_p1, %s32_s15), 0  ;;  %p144_p3 = pnand %p3611_p0, %p143_p2 }
   0x7   : > { %147 = sbr.rel (%p144_p3) target bundleno = 577 (0x241), region = 28 }
   0xe   : > { %p183_p4 = scmp.lt.s32.totalorder %s5517_s12, 1  ;;  %s3614_s16 = sshll.u32 %s5517_s12, 8 }
   0xf   : > { %s5569_s19 = scalar_lea.vmem %s6622_s0, %s3614_s16 }
  0x10   : > { %s6654_s12 = smov (!%p183_p4, %s5517_s12), 1  ;;  %v238_v0 = vld [vmem:[%s5569_s19] sm:$0xff]  ;;  %v240_v1 = vld [vmem:[%s5569_s19 + $0x8] sm:$0xff]  ;;  %v242_v2 = vld [vmem:[%s5569_s19 + $0x10] sm:$0xff] }
  0x11   : > { %239 = vst [vmem:[#allocation2 + $0x130] sm:$0xff] %v238_v0  ;;  %241 = vst [vmem:[#allocation2 + $0x138] sm:$0xff] %v240_v1  ;;  %v244_v3 = vld [vmem:[%s5569_s19 + $0x18] sm:$0xff]  ;;  %v246_v4 = vld [vmem:[%s5569_s19 + $0x20] sm:$0xff]  ;;  %s3753_s20 = sshll.u32 %s6654_s12, 8 }
  0x12   : > { %243 = vst [vmem:[#allocation2 + $0x140] sm:$0xff] %v242_v2  ;;  %v248_v5 = vld [vmem:[%s5569_s19 + $0x28] sm:$0xff]  ;;  %245 = vst [vmem:[#allocation2 + $0x148] sm:$0xff] %v244_v3  ;;  %v250_v6 = vld [vmem:[%s5569_s19 + $0x30] sm:$0xff]  ;;  %s5583_s23 = scalar_lea.vmem %s6625_s3, %s3753_s20 }
  0x13   : > { %247 = vst [vmem:[#allocation2 + $0x150] sm:$0xff] %v246_v4  ;;  %249 = vst [vmem:[#allocation2 + $0x158] sm:$0xff] %v248_v5  ;;  %v252_v7 = vld [vmem:[%s5569_s19 + $0x38] sm:$0xff]  ;;  %v254_v8 = vld [vmem:[%s5569_s19 + $0x40] sm:$0xff] }
  0x14   : > { %251 = vst [vmem:[#allocation2 + $0x160] sm:$0xff] %v250_v6  ;;  %253 = vst [vmem:[#allocation2 + $0x168] sm:$0xff] %v252_v7  ;;  %v256_v9 = vld [vmem:[%s5569_s19 + $0x48] sm:$0xff]  ;;  %v258_v10 = vld [vmem:[%s5569_s19 + $0x50] sm:$0xff] }
  0x15   : > { %255 = vst [vmem:[#allocation2 + $0x170] sm:$0xff] %v254_v8  ;;  %v260_v11 = vld [vmem:[%s5569_s19 + $0x58] sm:$0xff]  ;;  %257 = vst [vmem:[#allocation2 + $0x178] sm:$0xff] %v256_v9  ;;  %v262_v12 = vld [vmem:[%s5569_s19 + $0x60] sm:$0xff] }
  0x16   : > { %259 = vst [vmem:[#allocation2 + $0x180] sm:$0xff] %v258_v10  ;;  %261 = vst [vmem:[#allocation2 + $0x188] sm:$0xff] %v260_v11  ;;  %v264_v13 = vld [vmem:[%s5569_s19 + $0x68] sm:$0xff]  ;;  %v266_v14 = vld [vmem:[%s5569_s19 + $0x70] sm:$0xff] }
  0x17   : > { %263 = vst [vmem:[#allocation2 + $0x190] sm:$0xff] %v262_v12  ;;  %265 = vst [vmem:[#allocation2 + $0x198] sm:$0xff] %v264_v13  ;;  %v268_v15 = vld [vmem:[%s5569_s19 + $0x78] sm:$0xff]  ;;  %v270_v16 = vld [vmem:[%s5569_s19 + $0x80] sm:$0xff] }
  0x18   : > { %267 = vst [vmem:[#allocation2 + $0x1a0] sm:$0xff] %v266_v14  ;;  %v272_v17 = vld [vmem:[%s5569_s19 + $0x88] sm:$0xff]  ;;  %269 = vst [vmem:[#allocation2 + $0x1a8] sm:$0xff] %v268_v15  ;;  %v274_v18 = vld [vmem:[%s5569_s19 + $0x90] sm:$0xff] }
  0x19   : > { %271 = vst [vmem:[#allocation2 + $0x1b0] sm:$0xff] %v270_v16  ;;  %273 = vst [vmem:[#allocation2 + $0x1b8] sm:$0xff] %v272_v17  ;;  %v276_v19 = vld [vmem:[%s5569_s19 + $0x98] sm:$0xff]  ;;  %v278_v20 = vld [vmem:[%s5569_s19 + $0xa0] sm:$0xff] }
  0x1a   : > { %275 = vst [vmem:[#allocation2 + $0x1c0] sm:$0xff] %v274_v18  ;;  %277 = vst [vmem:[#allocation2 + $0x1c8] sm:$0xff] %v276_v19  ;;  %v280_v21 = vld [vmem:[%s5569_s19 + $0xa8] sm:$0xff]  ;;  %v282_v22 = vld [vmem:[%s5569_s19 + $0xb0] sm:$0xff] }
  0x1b   : > { %279 = vst [vmem:[#allocation2 + $0x1d0] sm:$0xff] %v278_v20  ;;  %v284_v23 = vld [vmem:[%s5569_s19 + $0xb8] sm:$0xff]  ;;  %281 = vst [vmem:[#allocation2 + $0x1d8] sm:$0xff] %v280_v21  ;;  %v286_v24 = vld [vmem:[%s5569_s19 + $0xc0] sm:$0xff] }
  0x1c   : > { %283 = vst [vmem:[#allocation2 + $0x1e0] sm:$0xff] %v282_v22  ;;  %285 = vst [vmem:[#allocation2 + $0x1e8] sm:$0xff] %v284_v23  ;;  %v288_v25 = vld [vmem:[%s5569_s19 + $0xc8] sm:$0xff]  ;;  %v290_v26 = vld [vmem:[%s5569_s19 + $0xd0] sm:$0xff] }
  0x1d   : > { %287 = vst [vmem:[#allocation2 + $0x1f0] sm:$0xff] %v286_v24  ;;  %289 = vst [vmem:[#allocation2 + $0x1f8] sm:$0xff] %v288_v25  ;;  %v292_v27 = vld [vmem:[%s5569_s19 + $0xd8] sm:$0xff]  ;;  %v294_v28 = vld [vmem:[%s5569_s19 + $0xe0] sm:$0xff] }
  0x1e   : > { %291 = vst [vmem:[#allocation2 + $0x200] sm:$0xff] %v290_v26  ;;  %v296_v29 = vld [vmem:[%s5569_s19 + $0xe8] sm:$0xff]  ;;  %293 = vst [vmem:[#allocation2 + $0x208] sm:$0xff] %v292_v27  ;;  %v298_v30 = vld [vmem:[%s5569_s19 + $0xf0] sm:$0xff] }
  0x1f   : > { %295 = vst [vmem:[#allocation2 + $0x210] sm:$0xff] %v294_v28  ;;  %297 = vst [vmem:[#allocation2 + $0x218] sm:$0xff] %v296_v29  ;;  %v300_v31 = vld [vmem:[%s5569_s19 + $0xf8] sm:$0xff] }
  0x20   : > { %299 = vst [vmem:[#allocation2 + $0x220] sm:$0xff] %v298_v30  ;;  %301 = vst [vmem:[#allocation2 + $0x228] sm:$0xff] %v300_v31 }
  0x21   : > { %309 = vsyncadd [#allocation3], 4096  ;;  %v5527_v32 = vmov 0.0  }
  0x22   : > { %369 = vst [vmem:[#allocation2 + $0x120] sm:$0xff] %v5527_v32  ;;  %370 = vst [vmem:[#allocation2 + $0x128] sm:$0xff] %v5527_v32 }
  0x23   : > { %429 = vst [vmem:[#allocation2 + $0x230] sm:$0xff] %v5527_v32  ;;  %430 = vst [vmem:[#allocation2 + $0x238] sm:$0xff] %v5527_v32 }
  0x24   : > { %5513 = dma.done.wait [#allocation3], 4096 }
  0x25   : > { %5514 = vsyncadd [#allocation3], 4294963200  ;;  %451 = vst [vmem:[#allocation2] sm:$0x1] %v5527_v32  ;;  %v3619_v33 = vld [vmem:[%s6623_s1 + $0x80] sm:$0xff]  ;;  %v3620_v34 = vld [vmem:[%s6623_s1 + $0x88] sm:$0xff] }
  0x26   : > { %452 = vst [vmem:[#allocation2 + $0x10] sm:$0x1] %v5527_v32  ;;  %453 = vst [vmem:[#allocation2 + $0x20] sm:$0x1] %v5527_v32  ;;  %v3667_v35 = vld [vmem:[%s6623_s1 + $0x200] sm:$0xff]  ;;  %v4906_v36 = vpack.c.bf16 %v3620_v34, %v3619_v33  ;;  %v3668_v37 = vld [vmem:[%s6623_s1 + $0x208] sm:$0xff] }
  0x27   : > { %454 = vst [vmem:[#allocation2 + $0x30] sm:$0x1] %v5527_v32  ;;  %455 = vst [vmem:[#allocation2 + $0x40] sm:$0x1] %v5527_v32  ;;  %v3621_v38 = vld [vmem:[%s6623_s1 + $0x90] sm:$0xff]  ;;  %v3622_v39 = vld [vmem:[%s6623_s1 + $0x98] sm:$0xff]  ;;  %v5626_v40 = vpack.c.bf16 %v3668_v37, %v3667_v35 }
  0x28   : > { %456 = vst [vmem:[#allocation2 + $0x50] sm:$0x1] %v5527_v32  ;;  %457 = vst [vmem:[#allocation2 + $0x60] sm:$0x1] %v5527_v32  ;;  %v4910_v41 = vpack.c.bf16 %v3622_v39, %v3621_v38  ;;  %v3669_v42 = vld [vmem:[%s6623_s1 + $0x210] sm:$0xff]  ;;  %v3670_v43 = vld [vmem:[%s6623_s1 + $0x218] sm:$0xff]  ;;  %4907 = vmatprep.subr.bf16.mxu1 %v4906_v36 }
  0x29   : > { %458 = vst [vmem:[#allocation2 + $0x70] sm:$0x1] %v5527_v32  ;;  %459 = vst [vmem:[#allocation2 + $0x80] sm:$0x1] %v5527_v32  ;;  %v3623_v44 = vld [vmem:[%s6623_s1 + $0xa0] sm:$0xff]  ;;  %v5637_v45 = vpack.c.bf16 %v3670_v43, %v3669_v42  ;;  %v3624_v46 = vld [vmem:[%s6623_s1 + $0xa8] sm:$0xff]  ;;  %5035 = vmatprep.subr.bf16.mxu0 %v5626_v40  ;;  %4909 = vmatpush3.bf16.msra.mxu1 %v4906_v36 }
  0x2a   : > { %460 = vst [vmem:[#allocation2 + $0x90] sm:$0x1] %v5527_v32  ;;  %461 = vst [vmem:[#allocation2 + $0xa0] sm:$0x1] %v5527_v32  ;;  %v3671_v47 = vld [vmem:[%s6623_s1 + $0x220] sm:$0xff]  ;;  %v3672_v48 = vld [vmem:[%s6623_s1 + $0x228] sm:$0xff]  ;;  %5037 = vmatpush3.bf16.msra.mxu0 %v5626_v40  ;;  %4911 = vmatprep.subr.bf16.mxu1 %v4910_v41  ;;  %v4914_v49 = vpack.c.bf16 %v3624_v46, %v3623_v44 }
  0x2b   : > { %462 = vst [vmem:[#allocation2 + $0xb0] sm:$0x1] %v5527_v32  ;;  %463 = vst [vmem:[#allocation2 + $0xc0] sm:$0x1] %v5527_v32  ;;  %5039 = vmatprep.subr.bf16.mxu0 %v5637_v45  ;;  %v5651_v50 = vpack.c.bf16 %v3672_v48, %v3671_v47  ;;  %v3625_v51 = vld [vmem:[%s6623_s1 + $0xb0] sm:$0xff]  ;;  %v3626_v52 = vld [vmem:[%s6623_s1 + $0xb8] sm:$0xff] }
  0x2c   : > { %464 = vst [vmem:[#allocation2 + $0xd0] sm:$0x1] %v5527_v32  ;;  %465 = vst [vmem:[#allocation2 + $0xe0] sm:$0x1] %v5527_v32  ;;  %v3673_v53 = vld [vmem:[%s6623_s1 + $0x230] sm:$0xff]  ;;  %v3674_v54 = vld [vmem:[%s6623_s1 + $0x238] sm:$0xff]  ;;  %v4918_v55 = vpack.c.bf16 %v3626_v52, %v3625_v51 }
  0x2d   : > { %466 = vst [vmem:[#allocation2 + $0xf0] sm:$0x1] %v5527_v32  ;;  %467 = vst [vmem:[#allocation2 + $0x100] sm:$0x1] %v5527_v32  ;;  %4913 = vmatpush3.bf16.msra.mxu1 %v4910_v41  ;;  %v5667_v56 = vpack.c.bf16 %v3674_v54, %v3673_v53  ;;  %v3627_v57 = vld [vmem:[%s6623_s1 + $0xc0] sm:$0xff]  ;;  %v3628_v58 = vld [vmem:[%s6623_s1 + $0xc8] sm:$0xff] }
  0x2e   : > { %468 = vst [vmem:[#allocation2 + $0x110] sm:$0x1] %v5527_v32  ;;  %615 = vst [vmem:[#allocation2 + $0x24f] sm:$0x1] %v5527_v32  ;;  %5041 = vmatpush3.bf16.msra.mxu0 %v5637_v45  ;;  %4915 = vmatprep.subr.bf16.mxu1 %v4914_v49  ;;  %v682_v59 = vld [vmem:[#allocation2 + $0x120] sm:$0xff]  ;;  %v3676_v61 = vld [vmem:[%s6623_s1 + $0x248] sm:$0xff]  ;;  %v4922_v63 = vpack.c.bf16 %v3628_v58, %v3627_v57 }
  0x2f   : > { %616 = vst [vmem:[#allocation2 + $0x25f] sm:$0x1] %v5527_v32  ;;  %617 = vst [vmem:[#allocation2 + $0x26f] sm:$0x1] %v5527_v32  ;;  %5043 = vmatprep.subr.bf16.mxu0 %v5651_v50  ;;  %v3675_v60 = vld [vmem:[%s6623_s1 + $0x240] sm:$0xff]  ;;  %4218 = vmatprep.mubr.f32.mxu1 %v682_v59  ;;  %v5681_v62 = vld [vmem:[#allocation2 + $0x130] sm:$0xff] }
  0x30   : > { %618 = vst [vmem:[#allocation2 + $0x27f] sm:$0x1] %v5527_v32  ;;  %619 = vst [vmem:[#allocation2 + $0x28f] sm:$0x1] %v5527_v32  ;;  %4538 = vmatprep.mubr.f32.mxu0 %v5681_v62  ;;  %v5686_v0 = vld [vmem:[#allocation2 + $0x140] sm:$0xff]  ;;  %v5689_v1 = vpack.c.bf16 %v3676_v61, %v3675_v60  ;;  %v3629_v2 = vld [vmem:[%s6623_s1 + $0xd0] sm:$0xff] }
  0x31   : > { %620 = vst [vmem:[#allocation2 + $0x29f] sm:$0x1] %v5527_v32  ;;  %621 = vst [vmem:[#allocation2 + $0x2af] sm:$0x1] %v5527_v32  ;;  %4917 = vmatpush3.bf16.msra.mxu1 %v4914_v49  ;;  %v3630_v3 = vld [vmem:[%s6623_s1 + $0xd8] sm:$0xff]  ;;  %v5697_v4 = vld [vmem:[#allocation2 + $0x150] sm:$0xff] }
  0x32   : > { %622 = vst [vmem:[#allocation2 + $0x2bf] sm:$0x1] %v5527_v32  ;;  %623 = vst [vmem:[#allocation2 + $0x2cf] sm:$0x1] %v5527_v32  ;;  %5045 = vmatpush3.bf16.msra.mxu0 %v5651_v50  ;;  %4919 = vmatprep.subr.bf16.mxu1 %v4918_v55  ;;  %v3677_v5 = vld [vmem:[%s6623_s1 + $0x250] sm:$0xff]  ;;  %v3678_v6 = vld [vmem:[%s6623_s1 + $0x258] sm:$0xff]  ;;  %v4926_v8 = vpack.c.bf16 %v3630_v3, %v3629_v2 }
  0x33   : > { %624 = vst [vmem:[#allocation2 + $0x2df] sm:$0x1] %v5527_v32  ;;  %625 = vst [vmem:[#allocation2 + $0x2ef] sm:$0x1] %v5527_v32  ;;  %5047 = vmatprep.subr.bf16.mxu0 %v5667_v56  ;;  %v5707_v7 = vld [vmem:[#allocation2 + $0x160] sm:$0xff]  ;;  %v5712_v9 = vpack.c.bf16 %v3678_v6, %v3677_v5  ;;  %v3632_v11 = vld [vmem:[%s6623_s1 + $0xe8] sm:$0xff] }
  0x34   : > { %626 = vst [vmem:[#allocation2 + $0x2ff] sm:$0x1] %v5527_v32  ;;  %627 = vst [vmem:[#allocation2 + $0x30f] sm:$0x1] %v5527_v32  ;;  %v3631_v10 = vld [vmem:[%s6623_s1 + $0xe0] sm:$0xff]  ;;  %v5720_v12 = vld [vmem:[#allocation2 + $0x170] sm:$0xff] }
  0x35   : > { %628 = vst [vmem:[#allocation2 + $0x31f] sm:$0x1] %v5527_v32  ;;  %629 = vst [vmem:[#allocation2 + $0x32f] sm:$0x1] %v5527_v32  ;;  %4921 = vmatpush3.bf16.msra.mxu1 %v4918_v55  ;;  %v3679_v13 = vld [vmem:[%s6623_s1 + $0x260] sm:$0xff]  ;;  %v3680_v14 = vld [vmem:[%s6623_s1 + $0x268] sm:$0xff]  ;;  %v4930_v16 = vpack.c.bf16 %v3632_v11, %v3631_v10 }
  0x36   : > { %630 = vst [vmem:[#allocation2 + $0x33f] sm:$0x1] %v5527_v32  ;;  %631 = vst [vmem:[#allocation2 + $0x34f] sm:$0x1] %v5527_v32  ;;  %5049 = vmatpush3.bf16.msra.mxu0 %v5667_v56  ;;  %4923 = vmatprep.subr.bf16.mxu1 %v4922_v63  ;;  %v5729_v15 = vld [vmem:[#allocation2 + $0x180] sm:$0xff]  ;;  %v5732_v17 = vld [vmem:[#allocation2 + $0x190] sm:$0xff]  ;;  %v5736_v18 = vpack.c.bf16 %v3680_v14, %v3679_v13 }
  0x37   : > { %632 = vst [vmem:[#allocation2 + $0x35f] sm:$0x1] %v5527_v32  ;;  %506 = vst [vmem:[#allocation2 + $0x1] sm:$0xff] %v682_v59  ;;  %5051 = vmatprep.subr.bf16.mxu0 %v5689_v1  ;;  %v3633_v19 = vld [vmem:[%s6623_s1 + $0xf0] sm:$0xff]  ;;  %v3634_v20 = vld [vmem:[%s6623_s1 + $0xf8] sm:$0xff] }
  0x38   : > { %508 = vst [vmem:[#allocation2 + $0x11] sm:$0xff] %v5681_v62  ;;  %510 = vst [vmem:[#allocation2 + $0x21] sm:$0xff] %v5686_v0  ;;  %v3681_v21 = vld [vmem:[%s6623_s1 + $0x270] sm:$0xff]  ;;  %v3682_v22 = vld [vmem:[%s6623_s1 + $0x278] sm:$0xff]  ;;  %v4934_v25 = vpack.c.bf16 %v3634_v20, %v3633_v19 }
  0x39   : > { %512 = vst [vmem:[#allocation2 + $0x31] sm:$0xff] %v5697_v4  ;;  %514 = vst [vmem:[#allocation2 + $0x41] sm:$0xff] %v5707_v7  ;;  %4925 = vmatpush3.bf16.msra.mxu1 %v4922_v63  ;;  %v5751_v23 = vld [vmem:[#allocation2 + $0x1a0] sm:$0xff]  ;;  %v5753_v24 = vld [vmem:[#allocation2 + $0x131] sm:$0xff]  ;;  %v5762_v28 = vpack.c.bf16 %v3682_v22, %v3681_v21 }
  0x3a   : > { %516 = vst [vmem:[#allocation2 + $0x51] sm:$0xff] %v5720_v12  ;;  %5053 = vmatpush3.bf16.msra.mxu0 %v5689_v1  ;;  %4927 = vmatprep.subr.bf16.mxu1 %v4926_v8  ;;  %518 = vst [vmem:[#allocation2 + $0x61] sm:$0xff] %v5729_v15  ;;  %v665_v26 = vld [vmem:[%s6623_s1] sm:$0xff]  ;;  %v545_v27 = vld [vmem:[#allocation2 + $0x139] sm:$0x7f] }
  0x3b   : > { %5055 = vmatprep.subr.bf16.mxu0 %v5712_v9  ;;  %6635 = vst [vmem:[#allocation8_spill] sm:$0xff] %v5736_v18  ;;  %520 = vst [vmem:[#allocation2 + $0x71] sm:$0xff] %v5732_v17  ;;  %v666_v29 = vld [vmem:[%s6623_s1 + $0x8] sm:$0xff]  ;;  %v3683_v30 = vld [vmem:[%s6623_s1 + $0x280] sm:$0xff] }
  0x3c   : > { %522 = vst [vmem:[#allocation2 + $0x81] sm:$0xff] %v5751_v23  ;;  %581 = vst [vmem:[#allocation2 + $0x250] sm:$0xff] %v5753_v24  ;;  %v5770_v31 = vld [vmem:[#allocation2 + $0x1b0] sm:$0xff]  ;;  %v3684_v32 = vld [vmem:[%s6623_s1 + $0x288] sm:$0xff]  ;;  %v4938_v37 = vpack.c.bf16 %v666_v29, %v665_v26 }
  0x3d   : > { %4929 = vmatpush3.bf16.msra.mxu1 %v4926_v8  ;;  %6636 = vst [vmem:[#allocation9_spill] sm:$0xff] %v5762_v28  ;;  %582 = vst [vmem:[#allocation2 + $0x258] sm:$0x7f] %v545_v27  ;;  %v5775_v33 = vld [vmem:[#allocation2 + $0x141] sm:$0xff]  ;;  %v547_v34 = vld [vmem:[#allocation2 + $0x149] sm:$0x7f]  ;;  %v5066_v41 = vpack.c.bf16 %v3684_v32, %v3683_v30 }
  0x3e   : > { %5057 = vmatpush3.bf16.msra.mxu0 %v5712_v9  ;;  %4931 = vmatprep.subr.bf16.mxu1 %v4930_v16  ;;  %524 = vst [vmem:[#allocation2 + $0x91] sm:$0xff] %v5770_v31  ;;  %583 = vst [vmem:[#allocation2 + $0x260] sm:$0xff] %v5775_v33  ;;  %v5779_v35 = vld [vmem:[#allocation2 + $0x1c0] sm:$0xff]  ;;  %v5781_v36 = vld [vmem:[#allocation2 + $0x151] sm:$0xff] }
  0x3f   : > { %5059 = vmatprep.subr.bf16.mxu0 %v5736_v18  ;;  %584 = vst [vmem:[#allocation2 + $0x268] sm:$0x7f] %v547_v34  ;;  %585 = vst [vmem:[#allocation2 + $0x270] sm:$0xff] %v5781_v36  ;;  %v549_v38 = vld [vmem:[#allocation2 + $0x159] sm:$0x7f]  ;;  %v683_v39 = vld [vmem:[#allocation2 + $0x128] sm:$0xff] }
  0x40   : > { %526 = vst [vmem:[#allocation2 + $0xa1] sm:$0xff] %v5779_v35  ;;  %v3685_v42 = vld [vmem:[%s6623_s1 + $0x290] sm:$0xff]  ;;  %v3686_v43 = vld [vmem:[%s6623_s1 + $0x298] sm:$0xff]  ;;  %586 = vst [vmem:[#allocation2 + $0x278] sm:$0x7f] %v549_v38 }
  0x41   : > { %4933 = vmatpush3.bf16.msra.mxu1 %v4930_v16  ;;  %v5793_v44 = vld [vmem:[#allocation2 + $0x1d0] sm:$0xff]  ;;  %v5798_v47 = vld [vmem:[#allocation2 + $0x161] sm:$0xff]  ;;  %v551_v48 = vld [vmem:[#allocation2 + $0x169] sm:$0x7f]  ;;  %v5070_v54 = vpack.c.bf16 %v3686_v43, %v3685_v42 }
  0x42   : > { %5061 = vmatpush3.bf16.msra.mxu0 %v5736_v18  ;;  %4935 = vmatprep.subr.bf16.mxu1 %v4934_v25  ;;  %v667_v46 = vld [vmem:[%s6623_s1 + $0x10] sm:$0xff]  ;;  %528 = vst [vmem:[#allocation2 + $0xb1] sm:$0xff] %v5793_v44  ;;  %v668_v49 = vld [vmem:[%s6623_s1 + $0x18] sm:$0xff]  ;;  %587 = vst [vmem:[#allocation2 + $0x280] sm:$0xff] %v5798_v47 }
  0x43   : > { %5063 = vmatprep.subr.bf16.mxu0 %v5762_v28  ;;  %588 = vst [vmem:[#allocation2 + $0x288] sm:$0x7f] %v551_v48  ;;  %v5805_v51 = vld [vmem:[#allocation2 + $0x1e0] sm:$0xff]  ;;  %v5807_v52 = vld [vmem:[#allocation2 + $0x171] sm:$0xff]  ;;  %v3688_v57 = vld [vmem:[%s6623_s1 + $0x2a8] sm:$0xff]  ;;  %v4942_v59 = vpack.c.bf16 %v668_v49, %v667_v46 }
  0x44   : > { %v1797_v53 = vld [vmem:[#allocation2 + $0x138] sm:$0xff]  ;;  %589 = vst [vmem:[#allocation2 + $0x290] sm:$0xff] %v5807_v52  ;;  %530 = vst [vmem:[#allocation2 + $0xc1] sm:$0xff] %v5805_v51  ;;  %v3687_v55 = vld [vmem:[%s6623_s1 + $0x2a0] sm:$0xff] }
  0x45   : > { %4937 = vmatpush3.bf16.msra.mxu1 %v4934_v25  ;;  %v553_v58 = vld [vmem:[#allocation2 + $0x179] sm:$0x7f]  ;;  %v669_v60 = vld [vmem:[%s6623_s1 + $0x20] sm:$0xff]  ;;  %v5821_v61 = vld [vmem:[#allocation2 + $0x1f0] sm:$0xff]  ;;  %v5074_v10 = vpack.c.bf16 %v3688_v57, %v3687_v55 }
  0x46   : > { %5065 = vmatpush3.bf16.msra.mxu0 %v5762_v28  ;;  %4939 = vmatprep.subr.bf16.mxu1 %v4938_v37  ;;  %590 = vst [vmem:[#allocation2 + $0x298] sm:$0x7f] %v553_v58  ;;  %v5823_v63 = vld [vmem:[#allocation2 + $0x181] sm:$0xff]  ;;  %v555_v3 = vld [vmem:[#allocation2 + $0x189] sm:$0x7f]  ;;  %532 = vst [vmem:[#allocation2 + $0xd1] sm:$0xff] %v5821_v61 }
  0x47   : > { %5067 = vmatprep.subr.bf16.mxu0 %v5066_v41  ;;  %v670_v2 = vld [vmem:[%s6623_s1 + $0x28] sm:$0xff]  ;;  %591 = vst [vmem:[#allocation2 + $0x2a0] sm:$0xff] %v5823_v63  ;;  %v5829_v5 = vld [vmem:[#allocation2 + $0x200] sm:$0xff]  ;;  %592 = vst [vmem:[#allocation2 + $0x2a8] sm:$0x7f] %v555_v3 }
  0x48   : > { %4219 = vmatmul.mubr.f32.vlgmr.msra.gmra.mrb[0].mxu1 %v683_v39  ;;  %v1799_v6 = vld [vmem:[#allocation2 + $0x148] sm:$0xff]  ;;  %v5833_v8 = vld [vmem:[#allocation2 + $0x191] sm:$0xff]  ;;  %534 = vst [vmem:[#allocation2 + $0xe1] sm:$0xff] %v5829_v5  ;;  %v557_v11 = vld [vmem:[#allocation2 + $0x199] sm:$0x7f]  ;;  %v4946_v14 = vpack.c.bf16 %v670_v2, %v669_v60 }
  0x49   : > { %4539 = vmatmul.mubr.f32.vlgmr.msra.gmra.mrb[0].mxu0 %v1797_v53  ;;  %4941 = vmatpush3.bf16.msra.mxu1 %v4938_v37  ;;  %593 = vst [vmem:[#allocation2 + $0x2b0] sm:$0xff] %v5833_v8  ;;  %v3689_v13 = vld [vmem:[%s6623_s1 + $0x2b0] sm:$0xff]  ;;  %594 = vst [vmem:[#allocation2 + $0x2b8] sm:$0x7f] %v557_v11  ;;  %v672_v19 = vld [vmem:[%s6623_s1 + $0x38] sm:$0xff] }
  0x4a   : > { %5069 = vmatpush3.bf16.msra.mxu0 %v5066_v41  ;;  %4221 = vmatprep.mubr.f32.mxu1 %v5681_v62  ;;  %v3690_v62 = vld [vmem:[%s6623_s1 + $0x2b8] sm:$0xff]  ;;  %v671_v16 = vld [vmem:[%s6623_s1 + $0x30] sm:$0xff]  ;;  %v5853_v21 = vld [vmem:[#allocation2 + $0x1a1] sm:$0xff] }
  0x4b   : > { %4541 = vmatprep.mubr.f32.mxu0 %v5686_v0  ;;  %5071 = vmatprep.subr.bf16.mxu0 %v5070_v54  ;;  %v5851_v20 = vld [vmem:[#allocation2 + $0x210] sm:$0xff]  ;;  %v1801_v22 = vld [vmem:[#allocation2 + $0x158] sm:$0xff]  ;;  %595 = vst [vmem:[#allocation2 + $0x2c0] sm:$0xff] %v5853_v21  ;;  %v559_v25 = vld [vmem:[#allocation2 + $0x1a9] sm:$0x7f]  ;;  %v4950_v32 = vpack.c.bf16 %v672_v19, %v671_v16 }
  0x4c   : > { %4222 = vmatmul.mubr.f32.gmra.mrb[2].mxu1 %v1797_v53  ;;  %4943 = vmatprep.subr.bf16.mxu1 %v4942_v59  ;;  %v5857_v26 = vld [vmem:[#allocation2 + $0x1b1] sm:$0xff]  ;;  %536 = vst [vmem:[#allocation2 + $0xf1] sm:$0xff] %v5851_v20  ;;  %596 = vst [vmem:[#allocation2 + $0x2c8] sm:$0x7f] %v559_v25  ;;  %v471_v27 = vld [vmem:[#allocation2 + $0x128] sm:$0x7f] }
  0x4d   : > { %4542 = vmatmul.mubr.f32.gmra.mrb[2].mxu0 %v1799_v6  ;;  %4224 = vmatprep.mubr.f32.mxu1 %v5686_v0  ;;  %v5078_v0 = vpack.c.bf16 %v3690_v62, %v3689_v13  ;;  %597 = vst [vmem:[#allocation2 + $0x2d0] sm:$0xff] %v5857_v26  ;;  %v3691_v29 = vld [vmem:[%s6623_s1 + $0x2c0] sm:$0xff]  ;;  %v3692_v30 = vld [vmem:[%s6623_s1 + $0x2c8] sm:$0xff]  ;;  %507 = vst [vmem:[#allocation2 + $0x9] sm:$0x7f] %v471_v27 }
  0x4e   : > { %5073 = vmatpush3.bf16.msra.mxu0 %v5070_v54  ;;  %4544 = vmatprep.mubr.f32.mxu0 %v5697_v4  ;;  %v561_v34 = vld [vmem:[#allocation2 + $0x1b9] sm:$0x7f]  ;;  %v1803_v37 = vld [vmem:[#allocation2 + $0x168] sm:$0xff]  ;;  %v673_v38 = vld [vmem:[%s6623_s1 + $0x40] sm:$0xff]  ;;  %v5082_v46 = vpack.c.bf16 %v3692_v30, %v3691_v29 }
  0x4f   : > { %5075 = vmatprep.subr.bf16.mxu0 %v5074_v10  ;;  %4945 = vmatpush3.bf16.msra.mxu1 %v4942_v59  ;;  %v674_v39 = vld [vmem:[%s6623_s1 + $0x48] sm:$0xff]  ;;  %598 = vst [vmem:[#allocation2 + $0x2d8] sm:$0x7f] %v561_v34  ;;  %v473_v42 = vld [vmem:[#allocation2 + $0x138] sm:$0x7f]  ;;  %v3693_v48 = vld [vmem:[%s6623_s1 + $0x2d0] sm:$0xff] }
  0x50   : > { %4225 = vmatmul.mubr.f32.gmra.mrb[4].mxu1 %v1799_v6  ;;  %4947 = vmatprep.subr.bf16.mxu1 %v4946_v14  ;;  %v5875_v41 = vld [vmem:[#allocation2 + $0x1c1] sm:$0xff]  ;;  %v563_v43 = vld [vmem:[#allocation2 + $0x1c9] sm:$0x7f]  ;;  %509 = vst [vmem:[#allocation2 + $0x19] sm:$0x7f] %v473_v42  ;;  %v3694_v49 = vld [vmem:[%s6623_s1 + $0x2d8] sm:$0xff]  ;;  %v4954_v53 = vpack.c.bf16 %v674_v39, %v673_v38 }
  0x51   : > { %4545 = vmatmul.mubr.f32.gmra.mrb[4].mxu0 %v1801_v22  ;;  %4227 = vmatprep.mubr.f32.mxu1 %v5697_v4  ;;  %599 = vst [vmem:[#allocation2 + $0x2e0] sm:$0xff] %v5875_v41  ;;  %600 = vst [vmem:[#allocation2 + $0x2e8] sm:$0x7f] %v563_v43  ;;  %v5878_v4 = vld [vmem:[#allocation2 + $0x1d1] sm:$0xff]  ;;  %v475_v54 = vld [vmem:[#allocation2 + $0x148] sm:$0x7f]  ;;  %v5086_v2 = vpack.c.bf16 %v3694_v49, %v3693_v48 }
  0x52   : > { %5077 = vmatpush3.bf16.msra.mxu0 %v5074_v10  ;;  %4547 = vmatprep.mubr.f32.mxu0 %v5707_v7  ;;  %601 = vst [vmem:[#allocation2 + $0x2f0] sm:$0xff] %v5878_v4  ;;  %v675_v55 = vld [vmem:[%s6623_s1 + $0x50] sm:$0xff]  ;;  %v676_v57 = vld [vmem:[%s6623_s1 + $0x58] sm:$0xff]  ;;  %511 = vst [vmem:[#allocation2 + $0x29] sm:$0x7f] %v475_v54 }
  0x53   : > { %5079 = vmatprep.subr.bf16.mxu0 %v5078_v0  ;;  %4949 = vmatpush3.bf16.msra.mxu1 %v4946_v14  ;;  %v565_v58 = vld [vmem:[#allocation2 + $0x1d9] sm:$0x7f]  ;;  %v5895_v60 = vld [vmem:[#allocation2 + $0x1e1] sm:$0xff]  ;;  %v567_v3 = vld [vmem:[#allocation2 + $0x1e9] sm:$0x7f]  ;;  %v4958_v11 = vpack.c.bf16 %v676_v57, %v675_v55 }
  0x54   : > { %4228 = vmatmul.mubr.f32.gmra.mrb[6].mxu1 %v1801_v22  ;;  %4951 = vmatprep.subr.bf16.mxu1 %v4950_v32  ;;  %v1805_v59 = vld [vmem:[#allocation2 + $0x178] sm:$0xff]  ;;  %602 = vst [vmem:[#allocation2 + $0x2f8] sm:$0x7f] %v565_v58  ;;  %603 = vst [vmem:[#allocation2 + $0x300] sm:$0xff] %v5895_v60  ;;  %v3695_v6 = vld [vmem:[%s6623_s1 + $0x2e0] sm:$0xff] }
  0x55   : > { %4548 = vmatmul.mubr.f32.gmra.mrb[6].mxu0 %v1803_v37  ;;  %4230 = vmatprep.mubr.f32.mxu1 %v5707_v7  ;;  %v477_v7 = vld [vmem:[#allocation2 + $0x158] sm:$0x7f]  ;;  %v3696_v10 = vld [vmem:[%s6623_s1 + $0x2e8] sm:$0xff]  ;;  %604 = vst [vmem:[#allocation2 + $0x308] sm:$0x7f] %v567_v3  ;;  %v677_v62 = vld [vmem:[%s6623_s1 + $0x60] sm:$0xff] }
  0x56   : > { %5081 = vmatpush3.bf16.msra.mxu0 %v5078_v0  ;;  %4550 = vmatprep.mubr.f32.mxu0 %v5720_v12  ;;  %513 = vst [vmem:[#allocation2 + $0x39] sm:$0x7f] %v477_v7  ;;  %v5904_v13 = vld [vmem:[#allocation2 + $0x1f1] sm:$0xff]  ;;  %v678_v14 = vld [vmem:[%s6623_s1 + $0x68] sm:$0xff]  ;;  %v569_v22 = vld [vmem:[#allocation2 + $0x1f9] sm:$0x7f]  ;;  %v5090_v25 = vpack.c.bf16 %v3696_v10, %v3695_v6 }
  0x57   : > { %5083 = vmatprep.subr.bf16.mxu0 %v5082_v46  ;;  %4953 = vmatpush3.bf16.msra.mxu1 %v4950_v32  ;;  %605 = vst [vmem:[#allocation2 + $0x310] sm:$0xff] %v5904_v13  ;;  %v479_v16 = vld [vmem:[#allocation2 + $0x168] sm:$0x7f]  ;;  %606 = vst [vmem:[#allocation2 + $0x318] sm:$0x7f] %v569_v22  ;;  %v3698_v0 = vld [vmem:[%s6623_s1 + $0x2f8] sm:$0xff]  ;;  %v4962_v27 = vpack.c.bf16 %v678_v14, %v677_v62 }
  0x58   : > { %4231 = vmatmul.mubr.f32.gmra.mrb[8].mxu1 %v1803_v37  ;;  %4955 = vmatprep.subr.bf16.mxu1 %v4954_v53  ;;  %v1807_v19 = vld [vmem:[#allocation2 + $0x188] sm:$0xff]  ;;  %515 = vst [vmem:[#allocation2 + $0x49] sm:$0x7f] %v479_v16  ;;  %v481_v30 = vld [vmem:[#allocation2 + $0x178] sm:$0x7f]  ;;  %v679_v32 = vld [vmem:[%s6623_s1 + $0x70] sm:$0xff] }
  0x59   : > { %4551 = vmatmul.mubr.f32.gmra.mrb[8].mxu0 %v1805_v59  ;;  %4233 = vmatprep.mubr.f32.mxu1 %v5720_v12  ;;  %v3697_v12 = vld [vmem:[%s6623_s1 + $0x2f0] sm:$0xff]  ;;  %v5921_v29 = vld [vmem:[#allocation2 + $0x201] sm:$0xff]  ;;  %v680_v34 = vld [vmem:[%s6623_s1 + $0x78] sm:$0xff]  ;;  %517 = vst [vmem:[#allocation2 + $0x59] sm:$0x7f] %v481_v30 }
  0x5a   : > { %5085 = vmatpush3.bf16.msra.mxu0 %v5082_v46  ;;  %4553 = vmatprep.mubr.f32.mxu0 %v5729_v15  ;;  %607 = vst [vmem:[#allocation2 + $0x320] sm:$0xff] %v5921_v29  ;;  %v571_v37 = vld [vmem:[#allocation2 + $0x209] sm:$0x7f]  ;;  %v1809_v38 = vld [vmem:[#allocation2 + $0x198] sm:$0xff]  ;;  %v5094_v42 = vpack.c.bf16 %v3698_v0, %v3697_v12  ;;  %v3699_v43 = vld [vmem:[%s6623_s1 + $0x300] sm:$0xff]  ;;  %v4966_v48 = vpack.c.bf16 %v680_v34, %v679_v32 }
  0x5b   : > { %5087 = vmatprep.subr.bf16.mxu0 %v5086_v2  ;;  %4957 = vmatpush3.bf16.msra.mxu1 %v4954_v53  ;;  %608 = vst [vmem:[#allocation2 + $0x328] sm:$0x7f] %v571_v37  ;;  %v5932_v39 = vld [vmem:[#allocation2 + $0x211] sm:$0xff]  ;;  %v3700_v46 = vld [vmem:[%s6623_s1 + $0x308] sm:$0xff]  ;;  %v573_v49 = vld [vmem:[#allocation2 + $0x219] sm:$0x7f] }
  0x5c   : > { %4234 = vmatmul.mubr.f32.gmra.mrb[10].mxu1 %v1805_v59  ;;  %4959 = vmatprep.subr.bf16.mxu1 %v4958_v11  ;;  %609 = vst [vmem:[#allocation2 + $0x330] sm:$0xff] %v5932_v39  ;;  %v3635_v53 = vld [vmem:[%s6623_s1 + $0x100] sm:$0xff]  ;;  %v3636_v54 = vld [vmem:[%s6623_s1 + $0x108] sm:$0xff]  ;;  %610 = vst [vmem:[#allocation2 + $0x338] sm:$0x7f] %v573_v49 }
  0x5d   : > { %4554 = vmatmul.mubr.f32.gmra.mrb[10].mxu0 %v1807_v19  ;;  %4236 = vmatprep.mubr.f32.mxu1 %v5729_v15  ;;  %v483_v15 = vld [vmem:[#allocation2 + $0x188] sm:$0x7f]  ;;  %v485_v58 = vld [vmem:[#allocation2 + $0x198] sm:$0x7f]  ;;  %v3701_v7 = vld [vmem:[%s6623_s1 + $0x310] sm:$0xff]  ;;  %v5958_v6 = vpack.c.bf16 %v3636_v54, %v3635_v53 }
  0x5e   : > { %5089 = vmatpush3.bf16.msra.mxu0 %v5086_v2  ;;  %4556 = vmatprep.mubr.f32.mxu0 %v5732_v17  ;;  %519 = vst [vmem:[#allocation2 + $0x69] sm:$0x7f] %v483_v15  ;;  %v5948_v55 = vld [vmem:[#allocation2 + $0x221] sm:$0xff]  ;;  %v575_v59 = vld [vmem:[#allocation2 + $0x229] sm:$0x7f]  ;;  %v3702_v3 = vld [vmem:[%s6623_s1 + $0x318] sm:$0xff] }
  0x5f   : > { %5091 = vmatprep.subr.bf16.mxu0 %v5090_v25  ;;  %4961 = vmatpush3.bf16.msra.mxu1 %v4958_v11  ;;  %v1811_v57 = vld [vmem:[#allocation2 + $0x1a8] sm:$0xff]  ;;  %611 = vst [vmem:[#allocation2 + $0x340] sm:$0xff] %v5948_v55  ;;  %521 = vst [vmem:[#allocation2 + $0x79] sm:$0x7f] %v485_v58  ;;  %v5962_v10 = vld [vmem:[#allocation2 + $0x258] sm:$0xff]  ;;  %v5102_v62 = vpack.c.bf16 %v3702_v3, %v3701_v7 }
  0x60   : > { %4237 = vmatmul.mubr.f32.gmra.mrb[12].mxu1 %v1807_v19  ;;  %4963 = vmatprep.subr.bf16.mxu1 %v4962_v27  ;;  %612 = vst [vmem:[#allocation2 + $0x348] sm:$0x7f] %v575_v59  ;;  %v487_v2 = vld [vmem:[#allocation2 + $0x1a8] sm:$0x7f]  ;;  %v489_v11 = vld [vmem:[#allocation2 + $0x1b8] sm:$0x7f] }
  0x61   : > { %4557 = vmatmul.mubr.f32.gmra.mrb[12].mxu0 %v1809_v38  ;;  %4239 = vmatprep.mubr.f32.mxu1 %v5732_v17  ;;  %v5098_v17 = vpack.c.bf16 %v3700_v46, %v3699_v43  ;;  %523 = vst [vmem:[#allocation2 + $0x89] sm:$0x7f] %v487_v2  ;;  %525 = vst [vmem:[#allocation2 + $0x99] sm:$0x7f] %v489_v11  ;;  %v491_v14 = vld [vmem:[#allocation2 + $0x1c8] sm:$0x7f] }
  0x62   : > { %5093 = vmatpush3.bf16.msra.mxu0 %v5090_v25  ;;  %4559 = vmatprep.mubr.f32.mxu0 %v5751_v23  ;;  %v3703_v16 = vld [vmem:[%s6623_s1 + $0x320] sm:$0xff]  ;;  %527 = vst [vmem:[#allocation2 + $0xa9] sm:$0x7f] %v491_v14  ;;  %v493_v19 = vld [vmem:[#allocation2 + $0x1d8] sm:$0x7f]  ;;  %v5974_v22 = vld [vmem:[#allocation2 + $0x268] sm:$0xff] }
  0x63   : > { %5095 = vmatprep.subr.bf16.mxu0 %v5094_v42  ;;  %4965 = vmatpush3.bf16.msra.mxu1 %v4962_v27  ;;  %529 = vst [vmem:[#allocation2 + $0xb9] sm:$0x7f] %v493_v19  ;;  %v495_v25 = vld [vmem:[#allocation2 + $0x1e8] sm:$0x7f]  ;;  %v3705_v0 = vld [vmem:[%s6623_s1 + $0x330] sm:$0xff]  ;;  %v5985_v32 = vld [vmem:[#allocation2 + $0x278] sm:$0xff] }
  0x64   : > { %4240 = vmatmul.mubr.f32.gmra.mrb[14].mxu1 %v1809_v38  ;;  %4967 = vmatprep.subr.bf16.mxu1 %v4966_v48  ;;  %531 = vst [vmem:[#allocation2 + $0xc9] sm:$0x7f] %v495_v25  ;;  %v497_v27 = vld [vmem:[#allocation2 + $0x1f8] sm:$0x7f]  ;;  %v499_v30 = vld [vmem:[#allocation2 + $0x208] sm:$0x7f] }
  0x65   : > { %4560 = vmatmul.mubr.f32.gmra.mrb[14].mxu0 %v1811_v57  ;;  %4242 = vmatprep.mubr.f32.mxu1 %v5751_v23  ;;  %v3704_v23 = vld [vmem:[%s6623_s1 + $0x328] sm:$0xff]  ;;  %533 = vst [vmem:[#allocation2 + $0xd9] sm:$0x7f] %v497_v27  ;;  %535 = vst [vmem:[#allocation2 + $0xe9] sm:$0x7f] %v499_v30  ;;  %v3707_v37 = vld [vmem:[%s6623_s1 + $0x340] sm:$0xff] }
  0x66   : > { %5097 = vmatpush3.bf16.msra.mxu0 %v5094_v42  ;;  %4618 = vmatprep.mubr.f32.mxu0 %v5753_v24  ;;  %v701_v24 = vld [vmem:[#allocation2 + $0x1b8] sm:$0xff]  ;;  %v5106_v12 = vpack.c.bf16 %v3704_v23, %v3703_v16  ;;  %v5993_v15 = vld [vmem:[#allocation2 + $0x121] sm:$0xff]  ;;  %v543_v42 = vld [vmem:[#allocation2 + $0x129] sm:$0x7f] }
  0x67   : > { %5099 = vmatprep.subr.bf16.mxu0 %v5098_v17  ;;  %4969 = vmatpush3.bf16.msra.mxu1 %v4966_v48  ;;  %v501_v38 = vld [vmem:[#allocation2 + $0x218] sm:$0x7f]  ;;  %v5998_v43 = vld [vmem:[#allocation2 + $0x288] sm:$0xff]  ;;  %580 = vst [vmem:[#allocation2 + $0x248] sm:$0x7f] %v543_v42  ;;  %v3709_v48 = vld [vmem:[%s6623_s1 + $0x350] sm:$0xff] }
  0x68   : > { %4243 = vmatmul.mubr.f32.gmra.mrb[16].mxu1 %v1811_v57  ;;  %4971 = vmatprep.subr.bf16.mxu1 %v5958_v6  ;;  %537 = vst [vmem:[#allocation2 + $0xf9] sm:$0x7f] %v501_v38  ;;  %v6009_v49 = vld [vmem:[#allocation2 + $0x298] sm:$0xff]  ;;  %v6011_v53 = vld [vmem:[#allocation2 + $0x220] sm:$0xff]  ;;  %v503_v57 = vld [vmem:[#allocation2 + $0x228] sm:$0x7f] }
  0x69   : > { %4619 = vmatmul.mubr.f32.vlgmr.msra.gmra.mrb[0].mxu0 %v5962_v10  ;;  %4245 = vmatprep.mubr.f32.mxu1 %v5770_v31  ;;  %v3706_v31 = vld [vmem:[%s6623_s1 + $0x338] sm:$0xff]  ;;  %6637 = vst [vmem:[#allocation10_spill] sm:$0xff] %v6011_v53  ;;  %538 = vst [vmem:[#allocation2 + $0x101] sm:$0xff] %v6011_v53  ;;  %v3711_v58 = vld [vmem:[%s6623_s1 + $0x360] sm:$0xff] }
  0x6a   : > { %5101 = vmatpush3.bf16.msra.mxu0 %v5098_v17  ;;  %4621 = vmatprep.mubr.f32.mxu0 %v5775_v33  ;;  %v703_v33 = vld [vmem:[#allocation2 + $0x1c8] sm:$0xff]  ;;  %v5110_v34 = vpack.c.bf16 %v3706_v31, %v3705_v0  ;;  %539 = vst [vmem:[#allocation2 + $0x109] sm:$0x7f] %v503_v57  ;;  %v6022_v59 = vld [vmem:[#allocation2 + $0x230] sm:$0xff]  ;;  %v505_v17 = vld [vmem:[#allocation2 + $0x238] sm:$0x7f] }
  0x6b   : > { %5103 = vmatprep.subr.bf16.mxu0 %v5102_v62  ;;  %6638 = vst [vmem:[#allocation11_spill] sm:$0xff] %v6022_v59  ;;  %v6025_v2 = vld [vmem:[#allocation2 + $0x2a8] sm:$0xff]  ;;  %540 = vst [vmem:[#allocation2 + $0x111] sm:$0xff] %v6022_v59  ;;  %v3713_v3 = vld [vmem:[%s6623_s1 + $0x370] sm:$0xff] }
  0x6c   : > { %4246 = vmatmul.mubr.f32.gmra.mrb[18].mxu1 %v701_v24  ;;  %541 = vst [vmem:[#allocation2 + $0x119] sm:$0x7f] %v505_v17  ;;  %v6037_v11 = vld [vmem:[#allocation2 + $0x2b8] sm:$0xff]  ;;  %v3715_v14 = vld [vmem:[%s6623_s1 + $0x380] sm:$0xff]  ;;  %v3716_v16 = vld [vmem:[%s6623_s1 + $0x388] sm:$0xff] }
  0x6d   : > { %4622 = vmatmul.mubr.f32.gmra.mrb[2].mxu0 %v5974_v22  ;;  %4248 = vmatprep.mubr.f32.mxu1 %v5779_v35  ;;  %v3708_v35 = vld [vmem:[%s6623_s1 + $0x348] sm:$0xff]  ;;  %v633_v23 = vld [vmem:[#allocation2] sm:$0xff]  ;;  %v6050_v24 = vpack.c.bf16 %v3716_v16, %v3715_v14  ;;  %v3637_v19 = vld [vmem:[%s6623_s1 + $0x110] sm:$0xff] }
  0x6e   : > { %4624 = vmatprep.mubr.f32.mxu0 %v5781_v36  ;;  %5105 = vmatpush3.bf16.msra.mxu0 %v5102_v62  ;;  %v705_v36 = vld [vmem:[#allocation2 + $0x1d8] sm:$0xff]  ;;  %v5114_v46 = vpack.c.bf16 %v3708_v35, %v3707_v37  ;;  %v3639_v31 = vld [vmem:[%s6623_s1 + $0x120] sm:$0xff]  ;;  %v6077_v27 = vld [vmem:[#allocation2 + $0x2e8] sm:$0xff] }
  0x6f   : > { %5107 = vmatprep.subr.bf16.mxu0 %v5106_v12  ;;  %v3638_v25 = vld [vmem:[%s6623_s1 + $0x118] sm:$0xff]  ;;  %v6079_v30 = vld [vmem:[#allocation2 + $0x20] sm:$0xff]  ;;  %v3641_v37 = vld [vmem:[%s6623_s1 + $0x130] sm:$0xff] }
  0x70   : > { %4249 = vmatmul.mubr.f32.gmra.mrb[20].mxu1 %v703_v33  ;;  %v4974_v0 = vpack.c.bf16 %v3638_v25, %v3637_v19  ;;  %v3640_v33 = vld [vmem:[%s6623_s1 + $0x128] sm:$0xff]  ;;  %v6093_v38 = vld [vmem:[#allocation2 + $0x2f8] sm:$0xff]  ;;  %v6143_v16 = vld [vmem:[#allocation2 + $0x60] sm:$0xff] }
  0x71   : > { %4625 = vmatmul.mubr.f32.gmra.mrb[4].mxu0 %v5985_v32  ;;  %4251 = vmatprep.mubr.f32.mxu1 %v5793_v44  ;;  %v3710_v44 = vld [vmem:[%s6623_s1 + $0x358] sm:$0xff]  ;;  %v6090_v35 = vld [vmem:[#allocation2 + $0x28] sm:$0xff] }
  0x72   : > { %4627 = vmatprep.mubr.f32.mxu0 %v5798_v47  ;;  %5109 = vmatpush3.bf16.msra.mxu0 %v5106_v12  ;;  %v707_v47 = vld [vmem:[#allocation2 + $0x1e8] sm:$0xff]  ;;  %v5118_v54 = vpack.c.bf16 %v3710_v44, %v3709_v48  ;;  %v6062_v12 = vld [vmem:[#allocation2 + $0x10] sm:$0xff]  ;;  %v6106_v44 = vld [vmem:[#allocation2 + $0x38] sm:$0xff] }
  0x73   : > { %5111 = vmatprep.subr.bf16.mxu0 %v5110_v34  ;;  %v3644_v48 = vld [vmem:[%s6623_s1 + $0x148] sm:$0xff]  ;;  %v6125_v17 = vld [vmem:[#allocation2 + $0x318] sm:$0xff] }
  0x74   : > { %4252 = vmatmul.mubr.f32.gmra.mrb[22].mxu1 %v705_v36  ;;  %v6095_v36 = vld [vmem:[#allocation2 + $0x30] sm:$0xff]  ;;  %v6141_v14 = vld [vmem:[#allocation2 + $0x328] sm:$0xff]  ;;  %v3650_v19 = vld [vmem:[%s6623_s1 + $0x178] sm:$0xff] }
  0x75   : > { %4628 = vmatmul.mubr.f32.gmra.mrb[6].mxu0 %v5998_v43  ;;  %4254 = vmatprep.mubr.f32.mxu1 %v5805_v51  ;;  %v3712_v51 = vld [vmem:[%s6623_s1 + $0x368] sm:$0xff]  ;;  %v6257_v59 = vld [vmem:[#allocation2 + $0xd8] sm:$0xff] }
  0x76   : > { %4630 = vmatprep.mubr.f32.mxu0 %v5807_v52  ;;  %5113 = vmatpush3.bf16.msra.mxu0 %v5110_v34  ;;  %v709_v52 = vld [vmem:[#allocation2 + $0x1f8] sm:$0xff]  ;;  %v5122_v7 = vpack.c.bf16 %v3712_v51, %v3711_v58  ;;  %v4978_v34 = vpack.c.bf16 %v3640_v33, %v3639_v31  ;;  %v3645_v58 = vld [vmem:[%s6623_s1 + $0x150] sm:$0xff]  ;;  %v6154_v25 = vld [vmem:[#allocation2 + $0x68] sm:$0xff] }
  0x77   : > { %5115 = vmatprep.subr.bf16.mxu0 %v5114_v46  ;;  %v3646_v51 = vld [vmem:[%s6623_s1 + $0x158] sm:$0xff]  ;;  %v3651_v33 = vld [vmem:[%s6623_s1 + $0x180] sm:$0xff]  ;;  %v3728_v28 = vld [vmem:[%s6623_s1 + $0x3e8] sm:$0xff] }
  0x78   : > { %4255 = vmatmul.mubr.f32.gmra.mrb[24].mxu1 %v707_v47  ;;  %v6109_v47 = vld [vmem:[#allocation2 + $0x308] sm:$0xff]  ;;  %v3730_v18 = vld [vmem:[%s6623_s1 + $0x3f8] sm:$0xff] }
  0x79   : > { %4631 = vmatmul.mubr.f32.gmra.mrb[8].mxu0 %v6009_v49  ;;  %4257 = vmatprep.mubr.f32.mxu1 %v5821_v61  ;;  %v3714_v61 = vld [vmem:[%s6623_s1 + $0x378] sm:$0xff]  ;;  %v6271_v53 = vld [vmem:[#allocation2 + $0xe8] sm:$0xff] }
  0x7a   : > { %4633 = vmatprep.mubr.f32.mxu0 %v5823_v63  ;;  %5117 = vmatpush3.bf16.msra.mxu0 %v5114_v46  ;;  %v711_v63 = vld [vmem:[#allocation2 + $0x208] sm:$0xff]  ;;  %v5126_v62 = vpack.c.bf16 %v3714_v61, %v3713_v3  ;;  %v3643_v46 = vld [vmem:[%s6623_s1 + $0x140] sm:$0xff]  ;;  %v4990_v3 = vpack.c.bf16 %v3646_v51, %v3645_v58  ;;  %v6188_v58 = vld [vmem:[#allocation2 + $0x90] sm:$0xff] }
  0x7b   : > { %5119 = vmatprep.subr.bf16.mxu0 %v5118_v54  ;;  %v4986_v57 = vpack.c.bf16 %v3644_v48, %v3643_v46  ;;  %v3647_v61 = vld [vmem:[%s6623_s1 + $0x160] sm:$0xff]  ;;  %v3717_v48 = vld [vmem:[%s6623_s1 + $0x390] sm:$0xff] }
  0x7c   : > { %4258 = vmatmul.mubr.f32.gmra.mrb[26].mxu1 %v709_v52  ;;  %v6122_v52 = vld [vmem:[#allocation2 + $0x48] sm:$0xff] }
  0x7d   : > { %4634 = vmatmul.mubr.f32.gmra.mrb[10].mxu0 %v6025_v2  ;;  %4260 = vmatprep.mubr.f32.mxu1 %v5829_v5  ;;  %v713_v5 = vld [vmem:[#allocation2 + $0x218] sm:$0xff] }
  0x7e   : > { %4636 = vmatprep.mubr.f32.mxu0 %v5833_v8  ;;  %5121 = vmatpush3.bf16.msra.mxu0 %v5118_v54  ;;  %v6048_v8 = vld [vmem:[#allocation2 + $0x2c8] sm:$0xff]  ;;  %v6111_v54 = vld [vmem:[#allocation2 + $0x40] sm:$0xff] }
  0x7f   : > { %5123 = vmatprep.subr.bf16.mxu0 %v5122_v7 }
  0x80   : > { %4261 = vmatmul.mubr.f32.gmra.mrb[28].mxu1 %v711_v63  ;;  %v3648_v63 = vld [vmem:[%s6623_s1 + $0x168] sm:$0xff] }
  0x81   : > { %4637 = vmatmul.mubr.f32.gmra.mrb[12].mxu0 %v6037_v11  ;;  %4263 = vmatprep.mubr.f32.mxu1 %v5851_v20  ;;  %v634_v20 = vld [vmem:[#allocation2 + $0x8] sm:$0xff] }
  0x82   : > { %4639 = vmatprep.mubr.f32.mxu0 %v5853_v21  ;;  %5125 = vmatpush3.bf16.msra.mxu0 %v5122_v7  ;;  %v6060_v21 = vld [vmem:[#allocation2 + $0x2d8] sm:$0xff]  ;;  %v6127_v7 = vld [vmem:[#allocation2 + $0x50] sm:$0xff] }
  0x83   : > { %5127 = vmatprep.subr.bf16.mxu0 %v5126_v62 }
  0x84   : > { %4264 = vmatmul.mubr.f32.gmra.mrb[30].mxu1 %v713_v5  ;;  %v4994_v5 = vpack.c.bf16 %v3648_v63, %v3647_v61  ;;  %v3720_v61 = vld [vmem:[%s6623_s1 + $0x3a8] sm:$0xff]  ;;  %v6200_v63 = vld [vmem:[#allocation2 + $0x98] sm:$0xff] }
  0x85   : > { %4640 = vmatmul.mubr.f32.gmra.mrb[14].mxu0 %v6048_v8  ;;  %4298 = vmatprep.mubr.f32.mxu1 %v633_v23  ;;  %v3649_v23 = vld [vmem:[%s6623_s1 + $0x170] sm:$0xff] }
  0x86   : > { %4642 = vmatprep.mubr.f32.mxu0 %v5857_v26  ;;  %5129 = vmatpush3.bf16.msra.mxu0 %v5126_v62  ;;  %v6073_v26 = vld [vmem:[#allocation2 + $0x18] sm:$0xff]  ;;  %v4998_v31 = vpack.c.bf16 %v3650_v19, %v3649_v23  ;;  %v3721_v19 = vld [vmem:[%s6623_s1 + $0x3b0] sm:$0xff] }
  0x87   : > { %5131 = vmatprep.subr.bf16.mxu0 %v6050_v24  ;;  %v6138_v62 = vld [vmem:[#allocation2 + $0x58] sm:$0xff] }
  0x88   : > { %4299 = vmatmul.mubr.f32.vlgmr.msra.gmra.mrb[0].mxu1 %v634_v20  ;;  %v6157_v20 = vld [vmem:[#allocation2 + $0x338] sm:$0xff] }
  0x89   : > { %4643 = vmatmul.mubr.f32.gmra.mrb[16].mxu0 %v6060_v21  ;;  %4973 = vmatpush3.bf16.msra.mxu1 %v5958_v6  ;;  %v3642_v6 = vld [vmem:[%s6623_s1 + $0x138] sm:$0xff] }
  0x8a   : > { %4301 = vmatprep.mubr.f32.mxu1 %v6062_v12  ;;  %4645 = vmatprep.mubr.f32.mxu0 %v5875_v41  ;;  %v4982_v42 = vpack.c.bf16 %v3642_v6, %v3641_v37  ;;  %v6170_v37 = vld [vmem:[#allocation2 + $0x78] sm:$0xff]  ;;  %v2134_v6 = vld [vmem:[#allocation2 + $0x348] sm:$0xff] }
  0x8b   : > { %4975 = vmatprep.subr.bf16.mxu1 %v4974_v0  ;;  %6639 = vst [vmem:[#allocation12_spill] sm:$0xff] %v6170_v37 }
  0x8c   : > { %4302 = vmatmul.mubr.f32.gmra.mrb[2].mxu1 %v6073_v26 }
  0x8d   : > { %4646 = vmatmul.mubr.f32.gmra.mrb[18].mxu0 %v6077_v27  ;;  %4304 = vmatprep.mubr.f32.mxu1 %v6079_v30 }
  0x8e   : > { %4648 = vmatprep.mubr.f32.mxu0 %v5878_v4  ;;  %4977 = vmatpush3.bf16.msra.mxu1 %v4974_v0  ;;  %v6159_v0 = vld [vmem:[#allocation2 + $0x70] sm:$0xff] }
  0x8f   : > { %4979 = vmatprep.subr.bf16.mxu1 %v4978_v34 }
  0x90   : > { %4305 = vmatmul.mubr.f32.gmra.mrb[4].mxu1 %v6090_v35 }
  0x91   : > { %4649 = vmatmul.mubr.f32.gmra.mrb[20].mxu0 %v6093_v38  ;;  %4307 = vmatprep.mubr.f32.mxu1 %v6095_v36 }
  0x92   : > { %4651 = vmatprep.mubr.f32.mxu0 %v5895_v60  ;;  %4981 = vmatpush3.bf16.msra.mxu1 %v4978_v34  ;;  %v3652_v34 = vld [vmem:[%s6623_s1 + $0x188] sm:$0xff] }
  0x93   : > { %4983 = vmatprep.subr.bf16.mxu1 %v4982_v42  ;;  %v6175_v46 = vpack.c.bf16 %v3652_v34, %v3651_v33  ;;  %v6218_v33 = vld [vmem:[#allocation2 + $0xb0] sm:$0xff] }
  0x94   : > { %4308 = vmatmul.mubr.f32.gmra.mrb[6].mxu1 %v6106_v44 }
  0x95   : > { %4652 = vmatmul.mubr.f32.gmra.mrb[22].mxu0 %v6109_v47  ;;  %4310 = vmatprep.mubr.f32.mxu1 %v6111_v54 }
  0x96   : > { %4654 = vmatprep.mubr.f32.mxu0 %v5904_v13  ;;  %4985 = vmatpush3.bf16.msra.mxu1 %v4982_v42  ;;  %v6173_v42 = vld [vmem:[#allocation2 + $0x80] sm:$0xff] }
  0x97   : > { %4987 = vmatprep.subr.bf16.mxu1 %v4986_v57  ;;  %6640 = vst [vmem:[#allocation13_spill] sm:$0xff] %v6173_v42 }
  0x98   : > { %4311 = vmatmul.mubr.f32.gmra.mrb[8].mxu1 %v6122_v52 }
  0x99   : > { %4655 = vmatmul.mubr.f32.gmra.mrb[24].mxu0 %v6125_v17  ;;  %4313 = vmatprep.mubr.f32.mxu1 %v6127_v7 }
  0x9a   : > { %4657 = vmatprep.mubr.f32.mxu0 %v5921_v29  ;;  %4989 = vmatpush3.bf16.msra.mxu1 %v4986_v57  ;;  %v3718_v57 = vld [vmem:[%s6623_s1 + $0x398] sm:$0xff] }
  0x9b   : > { %4991 = vmatprep.subr.bf16.mxu1 %v4990_v3  ;;  %v5134_v51 = vpack.c.bf16 %v3718_v57, %v3717_v48  ;;  %v3724_v48 = vld [vmem:[%s6623_s1 + $0x3c8] sm:$0xff]  ;;  %v6229_v57 = vld [vmem:[#allocation2 + $0xb8] sm:$0xff] }
  0x9c   : > { %4314 = vmatmul.mubr.f32.gmra.mrb[10].mxu1 %v6138_v62 }
  0x9d   : > { %4658 = vmatmul.mubr.f32.gmra.mrb[26].mxu0 %v6141_v14  ;;  %4316 = vmatprep.mubr.f32.mxu1 %v6143_v16 }
  0x9e   : > { %4660 = vmatprep.mubr.f32.mxu0 %v5932_v39  ;;  %4993 = vmatpush3.bf16.msra.mxu1 %v4990_v3  ;;  %v3719_v3 = vld [vmem:[%s6623_s1 + $0x3a0] sm:$0xff] }
  0x9f   : > { %4995 = vmatprep.subr.bf16.mxu1 %v4994_v5  ;;  %v5138_v23 = vpack.c.bf16 %v3720_v61, %v3719_v3  ;;  %v3725_v61 = vld [vmem:[%s6623_s1 + $0x3d0] sm:$0xff] }
  0xa0   : > { %4317 = vmatmul.mubr.f32.gmra.mrb[12].mxu1 %v6154_v25 }
  0xa1   : > { %4661 = vmatmul.mubr.f32.gmra.mrb[28].mxu0 %v6157_v20  ;;  %4319 = vmatprep.mubr.f32.mxu1 %v6159_v0 }
  0xa2   : > { %4663 = vmatprep.mubr.f32.mxu0 %v5948_v55  ;;  %4997 = vmatpush3.bf16.msra.mxu1 %v4994_v5  ;;  %v6185_v55 = vld [vmem:[#allocation2 + $0x88] sm:$0xff]  ;;  %v6204_v5 = vld [vmem:[#allocation2 + $0xa0] sm:$0xff] }
  0xa3   : > { %4999 = vmatprep.subr.bf16.mxu1 %v4998_v31  ;;  %6641 = vst [vmem:[#allocation14_spill] sm:$0xff] %v6185_v55 }
  0xa4   : > { %4320 = vmatmul.mubr.f32.gmra.mrb[14].mxu1 %v6170_v37 }
  0xa5   : > { %4664 = vmatmul.mubr.f32.gmra.mrb[30].mxu0 %v2134_v6  ;;  %4322 = vmatprep.mubr.f32.mxu1 %v6173_v42  ;;  %v3723_v6 = vld [vmem:[%s6623_s1 + $0x3c0] sm:$0xff] }
  0xa6   : > { %4698 = vmatprep.mubr.f32.mxu0 %v6079_v30  ;;  %5001 = vmatpush3.bf16.msra.mxu1 %v4998_v31  ;;  %v3722_v31 = vld [vmem:[%s6623_s1 + $0x3b8] sm:$0xff]  ;;  %v5146_v3 = vpack.c.bf16 %v3724_v48, %v3723_v6  ;;  %v3727_v48 = vld [vmem:[%s6623_s1 + $0x3e0] sm:$0xff] }
  0xa7   : > { %5003 = vmatprep.subr.bf16.mxu1 %v6175_v46  ;;  %v5142_v34 = vpack.c.bf16 %v3722_v31, %v3721_v19  ;;  %v3726_v19 = vld [vmem:[%s6623_s1 + $0x3d8] sm:$0xff]  ;;  %v6243_v31 = vld [vmem:[#allocation2 + $0xc8] sm:$0xff] }
  0xa8   : > { %4323 = vmatmul.mubr.f32.gmra.mrb[16].mxu1 %v6185_v55  ;;  %v5150_v6 = vpack.c.bf16 %v3726_v19, %v3725_v61  ;;  %v5154_v61 = vpack.c.bf16 %v3728_v28, %v3727_v48  ;;  %v3729_v19 = vld [vmem:[%s6623_s1 + $0x3f0] sm:$0xff]  ;;  %v3731_v48 = vld [vmem:[%s6623_s1 + $0x400] sm:$0xff] }
  0xa9   : > { %4699 = vmatmul.mubr.f32.vlgmr.msra.gmra.mrb[0].mxu0 %v6090_v35  ;;  %4325 = vmatprep.mubr.f32.mxu1 %v6188_v58  ;;  %v5158_v28 = vpack.c.bf16 %v3730_v18, %v3729_v19  ;;  %v3654_v19 = vld [vmem:[%s6623_s1 + $0x198] sm:$0xff] }
  0xaa   : > { %5133 = vmatpush3.bf16.msra.mxu0 %v6050_v24  ;;  %4701 = vmatprep.mubr.f32.mxu0 %v6095_v36  ;;  %v6215_v24 = vld [vmem:[#allocation2 + $0xa8] sm:$0xff] }
  0xab   : > { %5135 = vmatprep.subr.bf16.mxu0 %v5134_v51 }
  0xac   : > { %4326 = vmatmul.mubr.f32.gmra.mrb[18].mxu1 %v6200_v63 }
  0xad   : > { %4702 = vmatmul.mubr.f32.gmra.mrb[2].mxu0 %v6106_v44  ;;  %4328 = vmatprep.mubr.f32.mxu1 %v6204_v5 }
  0xae   : > { %4704 = vmatprep.mubr.f32.mxu0 %v6111_v54  ;;  %5137 = vmatpush3.bf16.msra.mxu0 %v5134_v51  ;;  %v6232_v51 = vld [vmem:[#allocation2 + $0xc0] sm:$0xff] }
  0xaf   : > { %5139 = vmatprep.subr.bf16.mxu0 %v5138_v23 }
  0xb0   : > { %4329 = vmatmul.mubr.f32.gmra.mrb[20].mxu1 %v6215_v24 }
  0xb1   : > { %4705 = vmatmul.mubr.f32.gmra.mrb[4].mxu0 %v6122_v52  ;;  %4331 = vmatprep.mubr.f32.mxu1 %v6218_v33 }
  0xb2   : > { %4707 = vmatprep.mubr.f32.mxu0 %v6127_v7  ;;  %5141 = vmatpush3.bf16.msra.mxu0 %v5138_v23  ;;  %v6246_v23 = vld [vmem:[#allocation2 + $0xd0] sm:$0xff] }
  0xb3   : > { %5143 = vmatprep.subr.bf16.mxu0 %v5142_v34 }
  0xb4   : > { %4332 = vmatmul.mubr.f32.gmra.mrb[22].mxu1 %v6229_v57 }
  0xb5   : > { %4708 = vmatmul.mubr.f32.gmra.mrb[6].mxu0 %v6138_v62  ;;  %4334 = vmatprep.mubr.f32.mxu1 %v6232_v51 }
  0xb6   : > { %4710 = vmatprep.mubr.f32.mxu0 %v6143_v16  ;;  %5145 = vmatpush3.bf16.msra.mxu0 %v5142_v34  ;;  %v6260_v34 = vld [vmem:[#allocation2 + $0xe0] sm:$0xff] }
  0xb7   : > { %5147 = vmatprep.subr.bf16.mxu0 %v5146_v3 }
  0xb8   : > { %4335 = vmatmul.mubr.f32.gmra.mrb[24].mxu1 %v6243_v31 }
  0xb9   : > { %4711 = vmatmul.mubr.f32.gmra.mrb[8].mxu0 %v6154_v25  ;;  %4337 = vmatprep.mubr.f32.mxu1 %v6246_v23 }
  0xba   : > { %4713 = vmatprep.mubr.f32.mxu0 %v6159_v0  ;;  %5149 = vmatpush3.bf16.msra.mxu0 %v5146_v3  ;;  %v6274_v3 = vld [vmem:[#allocation2 + $0xf0] sm:$0xff] }
  0xbb   : > { %5151 = vmatprep.subr.bf16.mxu0 %v5150_v6 }
  0xbc   : > { %4338 = vmatmul.mubr.f32.gmra.mrb[26].mxu1 %v6257_v59 }
  0xbd   : > { %4714 = vmatmul.mubr.f32.gmra.mrb[10].mxu0 %v6170_v37  ;;  %4340 = vmatprep.mubr.f32.mxu1 %v6260_v34  ;;  %v3732_v37 = vld [vmem:[%s6623_s1 + $0x408] sm:$0xff] }
  0xbe   : > { %4716 = vmatprep.mubr.f32.mxu0 %v6173_v42  ;;  %5153 = vmatpush3.bf16.msra.mxu0 %v5150_v6  ;;  %v6285_v42 = vld [vmem:[#allocation2 + $0xf8] sm:$0xff]  ;;  %v6288_v18 = vpack.c.bf16 %v3732_v37, %v3731_v48  ;;  %v3653_v6 = vld [vmem:[%s6623_s1 + $0x190] sm:$0xff]  ;;  %v3656_v48 = vld [vmem:[%s6623_s1 + $0x1a8] sm:$0xff] }
  0xbf   : > { %5155 = vmatprep.subr.bf16.mxu0 %v5154_v61  ;;  %v5006_v37 = vpack.c.bf16 %v3654_v19, %v3653_v6  ;;  %v3658_v6 = vld [vmem:[%s6623_s1 + $0x1b8] sm:$0xff]  ;;  %v5492_v19 = vld [vmem:[#allocation2 + $0x260] sm:$0xff] }
  0xc0   : > { %4341 = vmatmul.mubr.f32.gmra.mrb[28].mxu1 %v6271_v53 }
  0xc1   : > { %4717 = vmatmul.mubr.f32.gmra.mrb[12].mxu0 %v6185_v55  ;;  %4343 = vmatprep.mubr.f32.mxu1 %v6274_v3  ;;  %v1183_v55 = vld [vmem:[#allocation2 + $0x248] sm:$0xff] }
  0xc2   : > { %4719 = vmatprep.mubr.f32.mxu0 %v6188_v58  ;;  %5157 = vmatpush3.bf16.msra.mxu0 %v5154_v61  ;;  %v3655_v61 = vld [vmem:[%s6623_s1 + $0x1a0] sm:$0xff] }
  0xc3   : > { %5159 = vmatprep.subr.bf16.mxu0 %v5158_v28 }
  0xc4   : > { %4344 = vmatmul.mubr.f32.gmra.mrb[30].mxu1 %v6285_v42 }
  0xc5   : > { %4720 = vmatmul.mubr.f32.gmra.mrb[14].mxu0 %v6200_v63  ;;  %4378 = vmatprep.mubr.f32.mxu1 %v5993_v15  ;;  %v5491_v15 = vld [vmem:[#allocation2 + $0x250] sm:$0xff] }
  0xc6   : > { %4722 = vmatprep.mubr.f32.mxu0 %v6204_v5  ;;  %5161 = vmatpush3.bf16.msra.mxu0 %v5158_v28  ;;  %v5010_v28 = vpack.c.bf16 %v3656_v48, %v3655_v61  ;;  %v3660_v61 = vld [vmem:[%s6623_s1 + $0x1c8] sm:$0xff]  ;;  %v5493_v48 = vld [vmem:[#allocation2 + $0x270] sm:$0xff] }
  0xc7   : > { %5163 = vmatprep.subr.bf16.mxu0 %v6288_v18 }
  0xc8   : > { %4379 = vmatmul.mubr.f32.vlgmr.msra.gmra.mrb[0].mxu1 %v1183_v55  ;;  %v3657_v55 = vld [vmem:[%s6623_s1 + $0x1b0] sm:$0xff] }
  0xc9   : > { %4723 = vmatmul.mubr.f32.gmra.mrb[16].mxu0 %v6215_v24  ;;  %5005 = vmatpush3.bf16.msra.mxu1 %v6175_v46  ;;  %v5014_v46 = vpack.c.bf16 %v3658_v6, %v3657_v55  ;;  %v5494_v55 = vld [vmem:[#allocation2 + $0x280] sm:$0xff]  ;;  %v3664_v6 = vld [vmem:[%s6623_s1 + $0x1e8] sm:$0xff] }
  0xca   : > { %4381 = vmatprep.mubr.f32.mxu1 %v5491_v15  ;;  %4725 = vmatprep.mubr.f32.mxu0 %v6218_v33  ;;  %v3662_v15 = vld [vmem:[%s6623_s1 + $0x1d8] sm:$0xff] }
  0xcb   : > { %5007 = vmatprep.subr.bf16.mxu1 %v5006_v37 }
  0xcc   : > { %4382 = vmatmul.mubr.f32.gmra.mrb[2].mxu1 %v5962_v10  ;;  %v3659_v10 = vld [vmem:[%s6623_s1 + $0x1c0] sm:$0xff] }
  0xcd   : > { %4726 = vmatmul.mubr.f32.gmra.mrb[18].mxu0 %v6229_v57  ;;  %4384 = vmatprep.mubr.f32.mxu1 %v5492_v19  ;;  %v5495_v19 = vld [vmem:[#allocation2 + $0x290] sm:$0xff] }
  0xce   : > { %4728 = vmatprep.mubr.f32.mxu0 %v6232_v51  ;;  %5009 = vmatpush3.bf16.msra.mxu1 %v5006_v37  ;;  %v5018_v37 = vpack.c.bf16 %v3660_v61, %v3659_v10  ;;  %v3666_v61 = vld [vmem:[%s6623_s1 + $0x1f8] sm:$0xff] }
  0xcf   : > { %5011 = vmatprep.subr.bf16.mxu1 %v5010_v28 }
  0xd0   : > { %4385 = vmatmul.mubr.f32.gmra.mrb[4].mxu1 %v5974_v22  ;;  %v3661_v22 = vld [vmem:[%s6623_s1 + $0x1d0] sm:$0xff] }
  0xd1   : > { %4729 = vmatmul.mubr.f32.gmra.mrb[20].mxu0 %v6243_v31  ;;  %4387 = vmatprep.mubr.f32.mxu1 %v5493_v48  ;;  %v577_v48 = vld [vmem:[#allocation2 + $0x239] sm:$0x7f] }
  0xd2   : > { %4731 = vmatprep.mubr.f32.mxu0 %v6246_v23  ;;  %5013 = vmatpush3.bf16.msra.mxu1 %v5010_v28  ;;  %v5022_v28 = vpack.c.bf16 %v3662_v15, %v3661_v22  ;;  %v5496_v22 = vld [vmem:[#allocation2 + $0x2a0] sm:$0xff]  ;;  %614 = vst [vmem:[#allocation2 + $0x358] sm:$0x7f] %v577_v48  ;;  %v2719_v48 = vld [vmem:[#allocation2 + $0x150] sm:$0xff] }
  0xd3   : > { %5015 = vmatprep.subr.bf16.mxu1 %v5014_v46 }
  0xd4   : > { %4388 = vmatmul.mubr.f32.gmra.mrb[6].mxu1 %v5985_v32  ;;  %v3663_v32 = vld [vmem:[%s6623_s1 + $0x1e0] sm:$0xff] }
  0xd5   : > { %4732 = vmatmul.mubr.f32.gmra.mrb[22].mxu0 %v6257_v59  ;;  %4390 = vmatprep.mubr.f32.mxu1 %v5494_v55  ;;  %v5026_v10 = vpack.c.bf16 %v3664_v6, %v3663_v32  ;;  %v5497_v55 = vld [vmem:[#allocation2 + $0x2b0] sm:$0xff]  ;;  %v2441_v6 = vld [vmem:[#allocation2 + $0x118] sm:$0xff] }
  0xd6   : > { %4734 = vmatprep.mubr.f32.mxu0 %v6260_v34  ;;  %5017 = vmatpush3.bf16.msra.mxu1 %v5014_v46  ;;  %v6346_v46 = vld [vmem:[#allocation2 + $0x100] sm:$0xff]  ;;  %v6361_v32 = vld [vmem:[#allocation2 + $0x231] sm:$0xff] }
  0xd7   : > { %5019 = vmatprep.subr.bf16.mxu1 %v5018_v37 }
  0xd8   : > { %4391 = vmatmul.mubr.f32.gmra.mrb[8].mxu1 %v5998_v43  ;;  %v3665_v43 = vld [vmem:[%s6623_s1 + $0x1f0] sm:$0xff] }
  0xd9   : > { %4735 = vmatmul.mubr.f32.gmra.mrb[24].mxu0 %v6271_v53  ;;  %4393 = vmatprep.mubr.f32.mxu1 %v5495_v19  ;;  %v5030_v15 = vpack.c.bf16 %v3666_v61, %v3665_v43  ;;  %v2717_v19 = vld [vmem:[#allocation2 + $0x140] sm:$0xff]  ;;  %v2718_v61 = vld [vmem:[#allocation2 + $0x148] sm:$0xff] }
  0xda   : > { %4737 = vmatprep.mubr.f32.mxu0 %v6274_v3  ;;  %5021 = vmatpush3.bf16.msra.mxu1 %v5018_v37  ;;  %v6357_v37 = vld [vmem:[#allocation2 + $0x108] sm:$0xff]  ;;  %v5498_v43 = vld [vmem:[#allocation2 + $0x2c0] sm:$0xff] }
  0xdb   : > { %5023 = vmatprep.subr.bf16.mxu1 %v5022_v28 }
  0xdc   : > { %4394 = vmatmul.mubr.f32.gmra.mrb[10].mxu1 %v6009_v49  ;;  %v2440_v49 = vld [vmem:[#allocation2 + $0x110] sm:$0xff] }
  0xdd   : > { %4738 = vmatmul.mubr.f32.gmra.mrb[26].mxu0 %v6285_v42  ;;  %4396 = vmatprep.mubr.f32.mxu1 %v5496_v22  ;;  %v3736_v22 = vld [vmem:[%s6623_s1 + $0x428] sm:$0xff] }
  0xde   : > { %4740 = vmatprep.mubr.f32.mxu0 %v6346_v46  ;;  %5025 = vmatpush3.bf16.msra.mxu1 %v5022_v28  ;;  %v3733_v28 = vld [vmem:[%s6623_s1 + $0x410] sm:$0xff] }
  0xdf   : > { %5027 = vmatprep.subr.bf16.mxu1 %v5026_v10 }
  0xe0   : > { %4397 = vmatmul.mubr.f32.gmra.mrb[12].mxu1 %v6025_v2  ;;  %v3734_v2 = vld [vmem:[%s6623_s1 + $0x418] sm:$0xff] }
  0xe1   : > { %4741 = vmatmul.mubr.f32.gmra.mrb[28].mxu0 %v6357_v37  ;;  %4399 = vmatprep.mubr.f32.mxu1 %v5497_v55  ;;  %v2721_v55 = vld [vmem:[#allocation2 + $0x160] sm:$0xff] }
  0xe2   : > { %4743 = vmatprep.mubr.f32.mxu0 %v2440_v49  ;;  %5029 = vmatpush3.bf16.msra.mxu1 %v5026_v10  ;;  %v5166_v10 = vpack.c.bf16 %v3734_v2, %v3733_v28  ;;  %v5499_v49 = vld [vmem:[#allocation2 + $0x2d0] sm:$0xff] }
  0xe3   : > { %5031 = vmatprep.subr.bf16.mxu1 %v5030_v15  ;;  %v2723_v28 = vld [vmem:[#allocation2 + $0x170] sm:$0xff] }
  0xe4   : > { %4400 = vmatmul.mubr.f32.gmra.mrb[14].mxu1 %v6037_v11  ;;  %v3735_v11 = vld [vmem:[%s6623_s1 + $0x420] sm:$0xff] }
  0xe5   : > { %4744 = vmatmul.mubr.f32.gmra.mrb[30].mxu0 %v2441_v6  ;;  %4402 = vmatprep.mubr.f32.mxu1 %v5498_v43  ;;  %v5170_v6 = vpack.c.bf16 %v3736_v22, %v3735_v11  ;;  %v3740_v43 = vld [vmem:[%s6623_s1 + $0x448] sm:$0xff]  ;;  %v2727_v11 = vld [vmem:[#allocation2 + $0x190] sm:$0xff] }
  0xe6   : > { %4778 = vmatprep.mubr.f32.mxu0 %v2717_v19  ;;  %5033 = vmatpush3.bf16.msra.mxu1 %v5030_v15  ;;  %v2720_v15 = vld [vmem:[#allocation2 + $0x158] sm:$0xff] }
  0xe7   : > { %5194 = vmatprep.subr.bf16.mxu1 %v5626_v40  ;;  %v3738_v19 = vld [vmem:[%s6623_s1 + $0x438] sm:$0xff] }
  0xe8   : > { %4403 = vmatmul.mubr.f32.gmra.mrb[16].mxu1 %v6048_v8  ;;  %v3737_v8 = vld [vmem:[%s6623_s1 + $0x430] sm:$0xff] }
  0xe9   : > { %4779 = vmatmul.mubr.f32.vlgmr.msra.gmra.mrb[0].mxu0 %v2718_v61  ;;  %4405 = vmatprep.mubr.f32.mxu1 %v5499_v49  ;;  %v5174_v2 = vpack.c.bf16 %v3738_v19, %v3737_v8  ;;  %v2725_v61 = vld [vmem:[#allocation2 + $0x180] sm:$0xff]  ;;  %v3744_v49 = vld [vmem:[%s6623_s1 + $0x468] sm:$0xff]  ;;  %v6419_v8 = vld [vmem:[#allocation2 + $0x1b0] sm:$0xff] }
  0xea   : > { %5165 = vmatpush3.bf16.msra.mxu0 %v6288_v18  ;;  %4781 = vmatprep.mubr.f32.mxu0 %v2719_v48  ;;  %v2722_v18 = vld [vmem:[#allocation2 + $0x168] sm:$0xff] }
  0xeb   : > { %5167 = vmatprep.subr.bf16.mxu0 %v5166_v10 }
  0xec   : > { %4406 = vmatmul.mubr.f32.gmra.mrb[18].mxu1 %v6060_v21  ;;  %v3739_v21 = vld [vmem:[%s6623_s1 + $0x440] sm:$0xff] }
  0xed   : > { %4782 = vmatmul.mubr.f32.gmra.mrb[2].mxu0 %v2720_v15  ;;  %4408 = vmatprep.mubr.f32.mxu1 %v5875_v41  ;;  %v2724_v41 = vld [vmem:[#allocation2 + $0x178] sm:$0xff]  ;;  %v5178_v48 = vpack.c.bf16 %v3740_v43, %v3739_v21  ;;  %v2729_v15 = vld [vmem:[#allocation2 + $0x1a0] sm:$0xff]  ;;  %v3030_v21 = vld [vmem:[#allocation2 + $0x290] sm:$0xff] }
  0xee   : > { %4784 = vmatprep.mubr.f32.mxu0 %v2721_v55  ;;  %5169 = vmatpush3.bf16.msra.mxu0 %v5166_v10  ;;  %v3742_v10 = vld [vmem:[%s6623_s1 + $0x458] sm:$0xff]  ;;  %v3032_v43 = vld [vmem:[#allocation2 + $0x2a0] sm:$0xff] }
  0xef   : > { %5171 = vmatprep.subr.bf16.mxu0 %v5170_v6 }
  0xf0   : > { %4409 = vmatmul.mubr.f32.gmra.mrb[20].mxu1 %v6077_v27  ;;  %v3741_v27 = vld [vmem:[%s6623_s1 + $0x450] sm:$0xff] }
  0xf1   : > { %4785 = vmatmul.mubr.f32.gmra.mrb[4].mxu0 %v2722_v18  ;;  %4411 = vmatprep.mubr.f32.mxu1 %v5878_v4  ;;  %v2726_v4 = vld [vmem:[#allocation2 + $0x188] sm:$0xff]  ;;  %v5182_v22 = vpack.c.bf16 %v3742_v10, %v3741_v27  ;;  %v6426_v18 = vld [vmem:[#allocation2 + $0x1c0] sm:$0xff]  ;;  %v3050_v27 = vld [vmem:[#allocation2 + $0x330] sm:$0xff] }
  0xf2   : > { %4787 = vmatprep.mubr.f32.mxu0 %v2723_v28  ;;  %5173 = vmatpush3.bf16.msra.mxu0 %v5170_v6  ;;  %v3746_v6 = vld [vmem:[%s6623_s1 + $0x478] sm:$0xff] }
  0xf3   : > { %5175 = vmatprep.subr.bf16.mxu0 %v5174_v2  ;;  %v3027_v28 = vld [vmem:[#allocation2 + $0x278] sm:$0xff] }
  0xf4   : > { %4412 = vmatmul.mubr.f32.gmra.mrb[22].mxu1 %v6093_v38  ;;  %v3743_v38 = vld [vmem:[%s6623_s1 + $0x460] sm:$0xff]  ;;  %v3051_v10 = vld [vmem:[#allocation2 + $0x338] sm:$0xff] }
  0xf5   : > { %4788 = vmatmul.mubr.f32.gmra.mrb[6].mxu0 %v2724_v41  ;;  %4414 = vmatprep.mubr.f32.mxu1 %v5895_v60  ;;  %v2728_v60 = vld [vmem:[#allocation2 + $0x198] sm:$0xff]  ;;  %v5186_v55 = vpack.c.bf16 %v3744_v49, %v3743_v38 }
  0xf6   : > { %4790 = vmatprep.mubr.f32.mxu0 %v2725_v61  ;;  %5177 = vmatpush3.bf16.msra.mxu0 %v5174_v2  ;;  %v3028_v2 = vld [vmem:[#allocation2 + $0x280] sm:$0xff]  ;;  %v3047_v41 = vld [vmem:[#allocation2 + $0x318] sm:$0xff] }
  0xf7   : > { %5179 = vmatprep.subr.bf16.mxu0 %v5178_v48  ;;  %v3048_v61 = vld [vmem:[#allocation2 + $0x320] sm:$0xff]  ;;  %v3055_v38 = vld [vmem:[#allocation2 + $0x358] sm:$0xff] }
  0xf8   : > { %4415 = vmatmul.mubr.f32.gmra.mrb[24].mxu1 %v6109_v47  ;;  %v3745_v47 = vld [vmem:[%s6623_s1 + $0x470] sm:$0xff] }
  0xf9   : > { %4791 = vmatmul.mubr.f32.gmra.mrb[8].mxu0 %v2726_v4  ;;  %4417 = vmatprep.mubr.f32.mxu1 %v5904_v13  ;;  %v2730_v13 = vld [vmem:[#allocation2 + $0x1a8] sm:$0xff]  ;;  %v5190_v19 = vpack.c.bf16 %v3746_v6, %v3745_v47  ;;  %v3052_v4 = vld [vmem:[#allocation2 + $0x340] sm:$0xff] }
  0xfa   : > { %4793 = vmatprep.mubr.f32.mxu0 %v2727_v11  ;;  %5181 = vmatpush3.bf16.msra.mxu0 %v5178_v48  ;;  %v3049_v48 = vld [vmem:[#allocation2 + $0x328] sm:$0xff] }
  0xfb   : > { %5183 = vmatprep.subr.bf16.mxu0 %v5182_v22  ;;  %v3053_v11 = vld [vmem:[#allocation2 + $0x348] sm:$0xff] }
  0xfc   : > { %4418 = vmatmul.mubr.f32.gmra.mrb[26].mxu1 %v6125_v17  ;;  %v6424_v17 = vld [vmem:[#allocation2 + $0x1b8] sm:$0xff] }
  0xfd   : > { %4794 = vmatmul.mubr.f32.gmra.mrb[10].mxu0 %v2728_v60  ;;  %4420 = vmatprep.mubr.f32.mxu1 %v5921_v29  ;;  %v6432_v29 = vld [vmem:[#allocation2 + $0x1c8] sm:$0xff] }
  0xfe   : > { %4796 = vmatprep.mubr.f32.mxu0 %v2729_v15  ;;  %5185 = vmatpush3.bf16.msra.mxu0 %v5182_v22  ;;  %v5500_v22 = vld [vmem:[#allocation2 + $0x101] sm:$0xff] }
  0xff   : > { %5187 = vmatprep.subr.bf16.mxu0 %v5186_v55 }
 0x100   : > { %4421 = vmatmul.mubr.f32.gmra.mrb[28].mxu1 %v6141_v14  ;;  %v6441_v14 = vld [vmem:[#allocation2 + $0x1d8] sm:$0xff] }
 0x101   : > { %4797 = vmatmul.mubr.f32.gmra.mrb[12].mxu0 %v2730_v13  ;;  %4423 = vmatprep.mubr.f32.mxu1 %v5932_v39  ;;  %v6434_v39 = vld [vmem:[#allocation2 + $0x1d0] sm:$0xff] }
 0x102   : > { %4799 = vmatprep.mubr.f32.mxu0 %v6419_v8  ;;  %5189 = vmatpush3.bf16.msra.mxu0 %v5186_v55 }
 0x103   : > { %5191 = vmatprep.subr.bf16.mxu0 %v5190_v19 }
 0x104   : > { %4424 = vmatmul.mubr.f32.gmra.mrb[30].mxu1 %v6157_v20  ;;  %v6648_v20 = vld [vmem:[#allocation14_spill] sm:$0xff] }
 0x105   : > { %4800 = vmatmul.mubr.f32.gmra.mrb[14].mxu0 %v6424_v17  ;;  %4458 = vmatprep.mubr.f32.mxu1 %v6062_v12  ;;  %v6443_v12 = vld [vmem:[#allocation2 + $0x1e0] sm:$0xff] }
 0x106   : > { %4802 = vmatprep.mubr.f32.mxu0 %v6426_v18  ;;  %5193 = vmatpush3.bf16.msra.mxu0 %v5190_v19 }
 0x108   : > { %4459 = vmatmul.mubr.f32.vlgmr.msra.gmra.mrb[0].mxu1 %v6073_v26  ;;  %v6450_v26 = vld [vmem:[#allocation2 + $0x1e8] sm:$0xff] }
 0x109   : > { %4803 = vmatmul.mubr.f32.gmra.mrb[16].mxu0 %v6432_v29  ;;  %5202 = vmatpush3.bf16.msra.mxu1 %v5626_v40  ;;  %v6453_v40 = vld [vmem:[#allocation2 + $0x1f0] sm:$0xff] }
 0x10a   : > { %4461 = vmatprep.mubr.f32.mxu1 %v6079_v30  ;;  %4805 = vmatprep.mubr.f32.mxu0 %v6434_v39  ;;  %v6460_v30 = vld [vmem:[#allocation2 + $0x1f8] sm:$0xff] }
 0x10b   : > { %5195 = vmatprep.subr.bf16.mxu1 %v5637_v45 }
 0x10c   : > { %4462 = vmatmul.mubr.f32.gmra.mrb[2].mxu1 %v6090_v35  ;;  %v6463_v35 = vld [vmem:[#allocation2 + $0x200] sm:$0xff] }
 0x10d   : > { %4806 = vmatmul.mubr.f32.gmra.mrb[18].mxu0 %v6441_v14  ;;  %4464 = vmatprep.mubr.f32.mxu1 %v6095_v36  ;;  %v6473_v36 = vld [vmem:[#allocation2 + $0x210] sm:$0xff] }
 0x10e   : > { %4808 = vmatprep.mubr.f32.mxu0 %v6443_v12  ;;  %5203 = vmatpush3.bf16.msra.mxu1 %v5637_v45  ;;  %v6470_v45 = vld [vmem:[#allocation2 + $0x208] sm:$0xff] }
 0x10f   : > { %5196 = vmatprep.subr.bf16.mxu1 %v5651_v50 }
 0x110   : > { %4465 = vmatmul.mubr.f32.gmra.mrb[4].mxu1 %v6106_v44  ;;  %v6488_v44 = vld [vmem:[#allocation2 + $0x228] sm:$0xff] }
 0x111   : > { %4809 = vmatmul.mubr.f32.gmra.mrb[20].mxu0 %v6450_v26  ;;  %4467 = vmatprep.mubr.f32.mxu1 %v6111_v54  ;;  %v6643_v54 = vld [vmem:[#allocation8_spill] sm:$0xff] }
 0x112   : > { %4811 = vmatprep.mubr.f32.mxu0 %v6453_v40  ;;  %5204 = vmatpush3.bf16.msra.mxu1 %v5651_v50  ;;  %v6480_v50 = vld [vmem:[#allocation2 + $0x218] sm:$0xff] }
 0x113   : > { %5197 = vmatprep.subr.bf16.mxu1 %v5667_v56 }
 0x114   : > { %4468 = vmatmul.mubr.f32.gmra.mrb[6].mxu1 %v6122_v52  ;;  %v6644_v52 = vld [vmem:[#allocation12_spill] sm:$0xff] }
 0x115   : > { %4812 = vmatmul.mubr.f32.gmra.mrb[22].mxu0 %v6460_v30  ;;  %4470 = vmatprep.mubr.f32.mxu1 %v6127_v7  ;;  %v6646_v7 = vld [vmem:[#allocation11_spill] sm:$0xff] }
 0x116   : > { %4814 = vmatprep.mubr.f32.mxu0 %v6463_v35  ;;  %5205 = vmatpush3.bf16.msra.mxu1 %v5667_v56  ;;  %v6642_v56 = vld [vmem:[#allocation10_spill] sm:$0xff] }
 0x117   : > { %5198 = vmatprep.subr.bf16.mxu1 %v5689_v1 }
 0x118   : > { %4471 = vmatmul.mubr.f32.gmra.mrb[8].mxu1 %v6138_v62  ;;  %v2748_v62 = vld [vmem:[#allocation2 + $0x238] sm:$0xff] }
 0x119   : > { %4815 = vmatmul.mubr.f32.gmra.mrb[24].mxu0 %v6470_v45  ;;  %4473 = vmatprep.mubr.f32.mxu1 %v6143_v16  ;;  %v3024_v16 = vld [vmem:[#allocation2 + $0x260] sm:$0xff] }
 0x11a   : > { %4817 = vmatprep.mubr.f32.mxu0 %v6473_v36  ;;  %5206 = vmatpush3.bf16.msra.mxu1 %v5689_v1  ;;  %v6645_v1 = vld [vmem:[#allocation13_spill] sm:$0xff] }
 0x11b   : > { %5199 = vmatprep.subr.bf16.mxu1 %v5712_v9 }
 0x11c   : > { %4474 = vmatmul.mubr.f32.gmra.mrb[10].mxu1 %v6154_v25  ;;  %v6647_v25 = vld [vmem:[#allocation9_spill] sm:$0xff] }
 0x11d   : > { %4818 = vmatmul.mubr.f32.gmra.mrb[26].mxu0 %v6480_v50  ;;  %4476 = vmatprep.mubr.f32.mxu1 %v6159_v0  ;;  %v3026_v0 = vld [vmem:[#allocation2 + $0x270] sm:$0xff] }
 0x11e   : > { %4820 = vmatprep.mubr.f32.mxu0 %v6642_v56  ;;  %5207 = vmatpush3.bf16.msra.mxu1 %v5712_v9  ;;  %v3025_v9 = vld [vmem:[#allocation2 + $0x268] sm:$0xff] }
 0x11f   : > { %5200 = vmatprep.subr.bf16.mxu1 %v6643_v54 }
 0x120   : > { %4477 = vmatmul.mubr.f32.gmra.mrb[12].mxu1 %v6644_v52 }
 0x121   : > { %4821 = vmatmul.mubr.f32.gmra.mrb[28].mxu0 %v6488_v44  ;;  %4479 = vmatprep.mubr.f32.mxu1 %v6645_v1 }
 0x122   : > { %4823 = vmatprep.mubr.f32.mxu0 %v6646_v7  ;;  %5208 = vmatpush3.bf16.msra.mxu1 %v6643_v54 }
 0x123   : > { %5201 = vmatprep.subr.bf16.mxu1 %v6647_v25 }
 0x124   : > { %4480 = vmatmul.mubr.f32.gmra.mrb[14].mxu1 %v6648_v20 }
 0x125   : > { %4824 = vmatmul.mubr.f32.gmra.mrb[30].mxu0 %v2748_v62  ;;  %4482 = vmatprep.mubr.f32.mxu1 %v6188_v58  ;;  %v3029_v58 = vld [vmem:[#allocation2 + $0x288] sm:$0xff] }
 0x126   : > { %4858 = vmatprep.mubr.f32.mxu0 %v3024_v16  ;;  %5209 = vmatpush3.bf16.msra.mxu1 %v6647_v25 }
 0x128   : > { %4483 = vmatmul.mubr.f32.gmra.mrb[16].mxu1 %v6200_v63  ;;  %v3031_v63 = vld [vmem:[#allocation2 + $0x298] sm:$0xff] }
 0x129   : > { %4859 = vmatmul.mubr.f32.vlgmr.msra.gmra.mrb[0].mxu0 %v3025_v9  ;;  %4485 = vmatprep.mubr.f32.mxu1 %v6204_v5  ;;  %v3033_v5 = vld [vmem:[#allocation2 + $0x2a8] sm:$0xff] }
 0x12a   : > { %4861 = vmatprep.mubr.f32.mxu0 %v3026_v0 }
 0x12c   : > { %4486 = vmatmul.mubr.f32.gmra.mrb[18].mxu1 %v6215_v24  ;;  %v3034_v24 = vld [vmem:[#allocation2 + $0x2b0] sm:$0xff] }
 0x12d   : > { %4862 = vmatmul.mubr.f32.gmra.mrb[2].mxu0 %v3027_v28  ;;  %4488 = vmatprep.mubr.f32.mxu1 %v6218_v33  ;;  %v3035_v33 = vld [vmem:[#allocation2 + $0x2b8] sm:$0xff] }
 0x12e   : > { %4864 = vmatprep.mubr.f32.mxu0 %v3028_v2 }
 0x130   : > { %4489 = vmatmul.mubr.f32.gmra.mrb[20].mxu1 %v6229_v57  ;;  %v3036_v57 = vld [vmem:[#allocation2 + $0x2c0] sm:$0xff] }
 0x131   : > { %4865 = vmatmul.mubr.f32.gmra.mrb[4].mxu0 %v3029_v58  ;;  %4491 = vmatprep.mubr.f32.mxu1 %v6232_v51  ;;  %v3037_v51 = vld [vmem:[#allocation2 + $0x2c8] sm:$0xff] }
 0x132   : > { %4867 = vmatprep.mubr.f32.mxu0 %v3030_v21 }
 0x134   : > { %4492 = vmatmul.mubr.f32.gmra.mrb[22].mxu1 %v6243_v31  ;;  %v3038_v31 = vld [vmem:[#allocation2 + $0x2d0] sm:$0xff] }
 0x135   : > { %4868 = vmatmul.mubr.f32.gmra.mrb[6].mxu0 %v3031_v63  ;;  %4494 = vmatprep.mubr.f32.mxu1 %v6246_v23  ;;  %v3040_v23 = vld [vmem:[#allocation2 + $0x2e0] sm:$0xff] }
 0x136   : > { %4870 = vmatprep.mubr.f32.mxu0 %v3032_v43 }
 0x138   : > { %4495 = vmatmul.mubr.f32.gmra.mrb[24].mxu1 %v6257_v59  ;;  %v3039_v59 = vld [vmem:[#allocation2 + $0x2d8] sm:$0xff] }
 0x139   : > { %4871 = vmatmul.mubr.f32.gmra.mrb[8].mxu0 %v3033_v5  ;;  %4497 = vmatprep.mubr.f32.mxu1 %v6260_v34  ;;  %v3042_v34 = vld [vmem:[#allocation2 + $0x2f0] sm:$0xff] }
 0x13a   : > { %4873 = vmatprep.mubr.f32.mxu0 %v3034_v24 }
 0x13c   : > { %4498 = vmatmul.mubr.f32.gmra.mrb[26].mxu1 %v6271_v53  ;;  %v3041_v53 = vld [vmem:[#allocation2 + $0x2e8] sm:$0xff] }
 0x13d   : > { %4874 = vmatmul.mubr.f32.gmra.mrb[10].mxu0 %v3035_v33  ;;  %4500 = vmatprep.mubr.f32.mxu1 %v6274_v3  ;;  %v3044_v3 = vld [vmem:[#allocation2 + $0x300] sm:$0xff] }
 0x13e   : > { %4876 = vmatprep.mubr.f32.mxu0 %v3036_v57 }
 0x140   : > { %4501 = vmatmul.mubr.f32.gmra.mrb[28].mxu1 %v6285_v42  ;;  %v3043_v42 = vld [vmem:[#allocation2 + $0x2f8] sm:$0xff] }
 0x141   : > { %4877 = vmatmul.mubr.f32.gmra.mrb[12].mxu0 %v3037_v51  ;;  %4503 = vmatprep.mubr.f32.mxu1 %v6346_v46  ;;  %v3045_v46 = vld [vmem:[#allocation2 + $0x308] sm:$0xff] }
 0x142   : > { %4879 = vmatprep.mubr.f32.mxu0 %v3038_v31 }
 0x144   : > { %4504 = vmatmul.mubr.f32.gmra.mrb[30].mxu1 %v6357_v37  ;;  %v3046_v37 = vld [vmem:[#allocation2 + $0x310] sm:$0xff] }
 0x145   : > { %4880 = vmatmul.mubr.f32.gmra.mrb[14].mxu0 %v3039_v59  ;;  %4562 = vmatprep.mubr.f32.mxu1 %v6419_v8 }
 0x146   : > { %4882 = vmatprep.mubr.f32.mxu0 %v3040_v23 }
 0x148   : > { %4563 = vmatmul.mubr.f32.vlgmr.msra.gmra.mrb[16].mxu1 %v6424_v17 }
 0x149   : > { %4883 = vmatmul.mubr.f32.gmra.mrb[16].mxu0 %v3041_v53  ;;  %4565 = vmatprep.mubr.f32.mxu1 %v6426_v18 }
 0x14a   : > { %4885 = vmatprep.mubr.f32.mxu0 %v3042_v34 }
 0x14c   : > { %4566 = vmatmul.mubr.f32.gmra.mrb[18].mxu1 %v6432_v29 }
 0x14d   : > { %4886 = vmatmul.mubr.f32.gmra.mrb[18].mxu0 %v3043_v42  ;;  %4568 = vmatprep.mubr.f32.mxu1 %v6434_v39 }
 0x14e   : > { %4888 = vmatprep.mubr.f32.mxu0 %v3044_v3 }
 0x150   : > { %4569 = vmatmul.mubr.f32.gmra.mrb[20].mxu1 %v6441_v14 }
 0x151   : > { %4889 = vmatmul.mubr.f32.gmra.mrb[20].mxu0 %v3045_v46  ;;  %4571 = vmatprep.mubr.f32.mxu1 %v6443_v12 }
 0x152   : > { %4891 = vmatprep.mubr.f32.mxu0 %v3046_v37 }
 0x154   : > { %4572 = vmatmul.mubr.f32.gmra.mrb[22].mxu1 %v6450_v26 }
 0x155   : > { %4892 = vmatmul.mubr.f32.gmra.mrb[22].mxu0 %v3047_v41  ;;  %4574 = vmatprep.mubr.f32.mxu1 %v6453_v40  ;;  %v6543_v40 = vld [vmem:[%s6624_s2] ss:$0 sm:$0xff] }
 0x156   : > { %4894 = vmatprep.mubr.f32.mxu0 %v3048_v61 }
 0x158   : > { %4575 = vmatmul.mubr.f32.gmra.mrb[24].mxu1 %v6460_v30 }
 0x159   : > { %4895 = vmatmul.mubr.f32.gmra.mrb[24].mxu0 %v3049_v48  ;;  %4577 = vmatprep.mubr.f32.mxu1 %v6463_v35 }
 0x15a   : > { %4897 = vmatprep.mubr.f32.mxu0 %v3050_v27 }
 0x15c   : > { %4578 = vmatmul.mubr.f32.gmra.mrb[26].mxu1 %v6470_v45 }
 0x15d   : > { %4898 = vmatmul.mubr.f32.gmra.mrb[26].mxu0 %v3051_v10  ;;  %4580 = vmatprep.mubr.f32.mxu1 %v6473_v36 }
 0x15e   : > { %4900 = vmatprep.mubr.f32.mxu0 %v3052_v4 }
 0x160   : > { %4581 = vmatmul.mubr.f32.gmra.mrb[28].mxu1 %v6480_v50 }
 0x161   : > { %4901 = vmatmul.mubr.f32.gmra.mrb[28].mxu0 %v3053_v11  ;;  %4583 = vmatprep.mubr.f32.mxu1 %v5500_v22 }
 0x162   : > { %4903 = vmatprep.mubr.f32.mxu0 %v6361_v32 }
 0x164   : > { %4584 = vmatmul.mubr.f32.gmra.mrb[30].mxu1 %v6488_v44 }
 0x165   : > { %4904 = vmatmul.mubr.f32.gmra.mrb[30].mxu0 %v3055_v38 }
 0x1db   : > { %v4460_v49 = vpop.f32.mrb[0].mxu1 }
 0x1dc   : > { %v1604_v60 = vpop.f32.mrb[1].mxu1 }
 0x1df   : > { %v4463_v15 = vpop.f32.mrb[2].mxu1 }
 0x1e0   : > { %v1614_v55 = vpop.f32.mrb[3].mxu1 }
 0x1e3   : > { %v4466_v47 = vpop.f32.mrb[4].mxu1 }
 0x1e4   : > { %v1624_v6 = vpop.f32.mrb[5].mxu1 }
 0x1e7   : > { %v4469_v13 = vpop.f32.mrb[6].mxu1 }
 0x1e8   : > { %v1634_v8 = vpop.f32.mrb[7].mxu1 }
 0x1eb   : > { %v4472_v19 = vpop.f32.mrb[8].mxu1 }
 0x1ec   : > { %v1644_v17 = vpop.f32.mrb[9].mxu1 }
 0x1ef   : > { %v4475_v18 = vpop.f32.mrb[10].mxu1 }
 0x1f0   : > { %v1654_v29 = vpop.f32.mrb[11].mxu1 }
 0x1f3   : > { %v6532_v39 = vpop.f32.mrb[12].mxu1 }
 0x1f4   : > { %v6534_v14 = vpop.f32.mrb[13].mxu1 }
 0x1f7   : > { %v6536_v32 = vpop.f32.mrb[14].mxu1 }
 0x1f8   : > { %v6538_v12 = vpop.f32.mrb[15].mxu1 }
 0x1fc   : > { %v4860_v26 = vpop.f32.mrb[0].mxu0 }
 0x1fd   : > { %v5210_v30 = vadd.f32 %v4860_v26, %v4460_v49  ;;  %v3139_v35 = vpop.f32.mrb[1].mxu0 }
 0x1fe   : > { %v5211_v45 = vadd.f32 %v3139_v35, %v1604_v60 }
 0x1ff   : > { %v3338_v36 = vadd.f32 %v5210_v30, %v6543_v40 }
 0x200   : > { %v3337_v50 = vadd.f32 %v5211_v45, %v6543_v40  ;;  %v4863_v56 = vpop.f32.mrb[2].mxu0 }
 0x201   : > { %v3370_v44 = vmax.f32 %v3338_v36, 0.0  ;;  %v5212_v54 = vadd.f32 %v4863_v56, %v4463_v15  ;;  %v3149_v52 = vpop.f32.mrb[3].mxu0 }
 0x202   : > { %v3369_v1 = vmax.f32 %v3337_v50, 0.0  ;;  %v5213_v7 = vadd.f32 %v3149_v52, %v1614_v55 }
 0x203   : > { %3402 = vst [vmem:[%s5583_s23 + $0x8] sm:$0xff] %v3370_v44  ;;  %v3340_v62 = vadd.f32 %v5212_v54, %v6543_v40 }
 0x204   : > { %3401 = vst [vmem:[%s5583_s23] sm:$0xff] %v3369_v1  ;;  %v3339_v16 = vadd.f32 %v5213_v7, %v6543_v40  ;;  %v4866_v25 = vpop.f32.mrb[4].mxu0 }
 0x205   : > { %v3372_v20 = vmax.f32 %v3340_v62, 0.0  ;;  %v5214_v9 = vadd.f32 %v4866_v25, %v4466_v47  ;;  %v3159_v0 = vpop.f32.mrb[5].mxu0 }
 0x206   : > { %v3371_v28 = vmax.f32 %v3339_v16, 0.0  ;;  %v5215_v2 = vadd.f32 %v3159_v0, %v1624_v6 }
 0x207   : > { %3404 = vst [vmem:[%s5583_s23 + $0x18] sm:$0xff] %v3372_v20  ;;  %v3342_v58 = vadd.f32 %v5214_v9, %v6543_v40 }
 0x208   : > { %3403 = vst [vmem:[%s5583_s23 + $0x10] sm:$0xff] %v3371_v28  ;;  %v3341_v21 = vadd.f32 %v5215_v2, %v6543_v40  ;;  %v4869_v63 = vpop.f32.mrb[6].mxu0 }
 0x209   : > { %v3374_v43 = vmax.f32 %v3342_v58, 0.0  ;;  %v5216_v5 = vadd.f32 %v4869_v63, %v4469_v13  ;;  %v3169_v24 = vpop.f32.mrb[7].mxu0 }
 0x20a   : > { %v3373_v33 = vmax.f32 %v3341_v21, 0.0  ;;  %v5217_v57 = vadd.f32 %v3169_v24, %v1634_v8 }
 0x20b   : > { %3406 = vst [vmem:[%s5583_s23 + $0x28] sm:$0xff] %v3374_v43  ;;  %v3344_v51 = vadd.f32 %v5216_v5, %v6543_v40 }
 0x20c   : > { %3405 = vst [vmem:[%s5583_s23 + $0x20] sm:$0xff] %v3373_v33  ;;  %v3343_v31 = vadd.f32 %v5217_v57, %v6543_v40  ;;  %v4872_v59 = vpop.f32.mrb[8].mxu0 }
 0x20d   : > { %v3376_v23 = vmax.f32 %v3344_v51, 0.0  ;;  %v5218_v53 = vadd.f32 %v4872_v59, %v4472_v19  ;;  %v3179_v34 = vpop.f32.mrb[9].mxu0 }
 0x20e   : > { %v3375_v42 = vmax.f32 %v3343_v31, 0.0  ;;  %v5219_v3 = vadd.f32 %v3179_v34, %v1644_v17 }
 0x20f   : > { %3408 = vst [vmem:[%s5583_s23 + $0x38] sm:$0xff] %v3376_v23  ;;  %v3346_v46 = vadd.f32 %v5218_v53, %v6543_v40 }
 0x210   : > { %3407 = vst [vmem:[%s5583_s23 + $0x30] sm:$0xff] %v3375_v42  ;;  %v3345_v37 = vadd.f32 %v5219_v3, %v6543_v40  ;;  %v4875_v41 = vpop.f32.mrb[10].mxu0 }
 0x211   : > { %v3378_v61 = vmax.f32 %v3346_v46, 0.0  ;;  %v5220_v48 = vadd.f32 %v4875_v41, %v4475_v18  ;;  %v3189_v27 = vpop.f32.mrb[11].mxu0 }
 0x212   : > { %v3377_v10 = vmax.f32 %v3345_v37, 0.0  ;;  %v5221_v4 = vadd.f32 %v3189_v27, %v1654_v29 }
 0x213   : > { %3410 = vst [vmem:[%s5583_s23 + $0x48] sm:$0xff] %v3378_v61  ;;  %v3348_v11 = vadd.f32 %v5220_v48, %v6543_v40 }
 0x214   : > { %3409 = vst [vmem:[%s5583_s23 + $0x40] sm:$0xff] %v3377_v10  ;;  %v3347_v22 = vadd.f32 %v5221_v4, %v6543_v40  ;;  %v4878_v38 = vpop.f32.mrb[12].mxu0 }
 0x215   : > { %v3380_v49 = vmax.f32 %v3348_v11, 0.0  ;;  %v5222_v60 = vadd.f32 %v4878_v38, %v6532_v39  ;;  %v3199_v15 = vpop.f32.mrb[13].mxu0 }
 0x216   : > { %v3379_v55 = vmax.f32 %v3347_v22, 0.0  ;;  %v5223_v47 = vadd.f32 %v3199_v15, %v6534_v14 }
 0x217   : > { %3412 = vst [vmem:[%s5583_s23 + $0x58] sm:$0xff] %v3380_v49  ;;  %v3350_v6 = vadd.f32 %v5222_v60, %v6543_v40 }
 0x218   : > { %3411 = vst [vmem:[%s5583_s23 + $0x50] sm:$0xff] %v3379_v55  ;;  %v3349_v13 = vadd.f32 %v5223_v47, %v6543_v40  ;;  %v4881_v8 = vpop.f32.mrb[14].mxu0 }
 0x219   : > { %v3382_v19 = vmax.f32 %v3350_v6, 0.0  ;;  %v5224_v17 = vadd.f32 %v4881_v8, %v6536_v32  ;;  %v3209_v18 = vpop.f32.mrb[15].mxu0 }
 0x21a   : > { %v3381_v29 = vmax.f32 %v3349_v13, 0.0  ;;  %v5225_v39 = vadd.f32 %v3209_v18, %v6538_v12 }
 0x21b   : > { %3414 = vst [vmem:[%s5583_s23 + $0x68] sm:$0xff] %v3382_v19  ;;  %v3352_v26 = vadd.f32 %v5224_v17, %v6543_v40  ;;  %v4564_v14 = vpop.f32.mrb[16].mxu1 }
 0x21c   : > { %3413 = vst [vmem:[%s5583_s23 + $0x60] sm:$0xff] %v3381_v29  ;;  %v3351_v30 = vadd.f32 %v5225_v39, %v6543_v40  ;;  %v4884_v35 = vpop.f32.mrb[16].mxu0  ;;  %v1991_v45 = vpop.f32.mrb[17].mxu1 }
 0x21d   : > { %v3384_v36 = vmax.f32 %v3352_v26, 0.0  ;;  %v5226_v50 = vadd.f32 %v4884_v35, %v4564_v14  ;;  %v3219_v56 = vpop.f32.mrb[17].mxu0 }
 0x21e   : > { %v3383_v32 = vmax.f32 %v3351_v30, 0.0  ;;  %v5227_v44 = vadd.f32 %v3219_v56, %v1991_v45 }
 0x21f   : > { %3416 = vst [vmem:[%s5583_s23 + $0x78] sm:$0xff] %v3384_v36  ;;  %v3354_v12 = vadd.f32 %v5226_v50, %v6543_v40  ;;  %v4567_v54 = vpop.f32.mrb[18].mxu1 }
 0x220   : > { %3415 = vst [vmem:[%s5583_s23 + $0x70] sm:$0xff] %v3383_v32  ;;  %v3353_v52 = vadd.f32 %v5227_v44, %v6543_v40  ;;  %v4887_v1 = vpop.f32.mrb[18].mxu0  ;;  %v2001_v7 = vpop.f32.mrb[19].mxu1 }
 0x221   : > { %v3386_v62 = vmax.f32 %v3354_v12, 0.0  ;;  %v5228_v16 = vadd.f32 %v4887_v1, %v4567_v54  ;;  %v3229_v25 = vpop.f32.mrb[19].mxu0 }
 0x222   : > { %v3385_v20 = vmax.f32 %v3353_v52, 0.0  ;;  %v5229_v9 = vadd.f32 %v3229_v25, %v2001_v7 }
 0x223   : > { %3418 = vst [vmem:[%s5583_s23 + $0x88] sm:$0xff] %v3386_v62  ;;  %v3356_v0 = vadd.f32 %v5228_v16, %v6543_v40  ;;  %v4570_v28 = vpop.f32.mrb[20].mxu1 }
 0x224   : > { %3417 = vst [vmem:[%s5583_s23 + $0x80] sm:$0xff] %v3385_v20  ;;  %v3355_v2 = vadd.f32 %v5229_v9, %v6543_v40  ;;  %v4890_v58 = vpop.f32.mrb[20].mxu0  ;;  %v2011_v21 = vpop.f32.mrb[21].mxu1 }
 0x225   : > { %v3388_v63 = vmax.f32 %v3356_v0, 0.0  ;;  %v5230_v43 = vadd.f32 %v4890_v58, %v4570_v28  ;;  %v3239_v5 = vpop.f32.mrb[21].mxu0 }
 0x226   : > { %v3387_v24 = vmax.f32 %v3355_v2, 0.0  ;;  %v5231_v33 = vadd.f32 %v3239_v5, %v2011_v21 }
 0x227   : > { %3420 = vst [vmem:[%s5583_s23 + $0x98] sm:$0xff] %v3388_v63  ;;  %v3358_v57 = vadd.f32 %v5230_v43, %v6543_v40  ;;  %v4573_v51 = vpop.f32.mrb[22].mxu1 }
 0x228   : > { %3419 = vst [vmem:[%s5583_s23 + $0x90] sm:$0xff] %v3387_v24  ;;  %v3357_v31 = vadd.f32 %v5231_v33, %v6543_v40  ;;  %v4893_v59 = vpop.f32.mrb[22].mxu0  ;;  %v2021_v23 = vpop.f32.mrb[23].mxu1 }
 0x229   : > { %v3390_v53 = vmax.f32 %v3358_v57, 0.0  ;;  %v5232_v34 = vadd.f32 %v4893_v59, %v4573_v51  ;;  %v3249_v42 = vpop.f32.mrb[23].mxu0 }
 0x22a   : > { %v3389_v3 = vmax.f32 %v3357_v31, 0.0  ;;  %v5233_v46 = vadd.f32 %v3249_v42, %v2021_v23 }
 0x22b   : > { %3422 = vst [vmem:[%s5583_s23 + $0xa8] sm:$0xff] %v3390_v53  ;;  %v3360_v37 = vadd.f32 %v5232_v34, %v6543_v40  ;;  %v4576_v41 = vpop.f32.mrb[24].mxu1 }
 0x22c   : > { %3421 = vst [vmem:[%s5583_s23 + $0xa0] sm:$0xff] %v3389_v3  ;;  %v3359_v61 = vadd.f32 %v5233_v46, %v6543_v40  ;;  %v4896_v48 = vpop.f32.mrb[24].mxu0  ;;  %v2031_v27 = vpop.f32.mrb[25].mxu1 }
 0x22d   : > { %v3392_v10 = vmax.f32 %v3360_v37, 0.0  ;;  %v5234_v4 = vadd.f32 %v4896_v48, %v4576_v41  ;;  %v3259_v11 = vpop.f32.mrb[25].mxu0 }
 0x22e   : > { %v3391_v22 = vmax.f32 %v3359_v61, 0.0  ;;  %v5235_v38 = vadd.f32 %v3259_v11, %v2031_v27 }
 0x22f   : > { %3424 = vst [vmem:[%s5583_s23 + $0xb8] sm:$0xff] %v3392_v10  ;;  %v3362_v49 = vadd.f32 %v5234_v4, %v6543_v40  ;;  %v4579_v60 = vpop.f32.mrb[26].mxu1 }
 0x230   : > { %3423 = vst [vmem:[%s5583_s23 + $0xb0] sm:$0xff] %v3391_v22  ;;  %v3361_v15 = vadd.f32 %v5235_v38, %v6543_v40  ;;  %v4899_v55 = vpop.f32.mrb[26].mxu0  ;;  %v2041_v47 = vpop.f32.mrb[27].mxu1 }
 0x231   : > { %v3394_v6 = vmax.f32 %v3362_v49, 0.0  ;;  %v5236_v13 = vadd.f32 %v4899_v55, %v4579_v60  ;;  %v3269_v8 = vpop.f32.mrb[27].mxu0 }
 0x232   : > { %v3393_v19 = vmax.f32 %v3361_v15, 0.0  ;;  %v5237_v17 = vadd.f32 %v3269_v8, %v2041_v47 }
 0x233   : > { %3426 = vst [vmem:[%s5583_s23 + $0xc8] sm:$0xff] %v3394_v6  ;;  %v3364_v18 = vadd.f32 %v5236_v13, %v6543_v40  ;;  %v4582_v29 = vpop.f32.mrb[28].mxu1 }
 0x234   : > { %3425 = vst [vmem:[%s5583_s23 + $0xc0] sm:$0xff] %v3393_v19  ;;  %v3363_v39 = vadd.f32 %v5237_v17, %v6543_v40  ;;  %v4902_v26 = vpop.f32.mrb[28].mxu0  ;;  %v2051_v14 = vpop.f32.mrb[29].mxu1 }
 0x235   : > { %v3396_v30 = vmax.f32 %v3364_v18, 0.0  ;;  %v5238_v35 = vadd.f32 %v4902_v26, %v4582_v29  ;;  %v3279_v45 = vpop.f32.mrb[29].mxu0 }
 0x236   : > { %v3395_v36 = vmax.f32 %v3363_v39, 0.0  ;;  %v5239_v50 = vadd.f32 %v3279_v45, %v2051_v14 }
 0x237   : > { %3428 = vst [vmem:[%s5583_s23 + $0xd8] sm:$0xff] %v3396_v30  ;;  %v3366_v56 = vadd.f32 %v5238_v35, %v6543_v40  ;;  %v4585_v32 = vpop.f32.mrb[30].mxu1 }
 0x238   : > { %3427 = vst [vmem:[%s5583_s23 + $0xd0] sm:$0xff] %v3395_v36  ;;  %v3365_v44 = vadd.f32 %v5239_v50, %v6543_v40  ;;  %v4905_v12 = vpop.f32.mrb[30].mxu0  ;;  %v2061_v54 = vpop.f32.mrb[31].mxu1 }
 0x239   : > { %v3398_v52 = vmax.f32 %v3366_v56, 0.0  ;;  %v5240_v1 = vadd.f32 %v4905_v12, %v4585_v32  ;;  %v3289_v7 = vpop.f32.mrb[31].mxu0 }
 0x23a   : > { %v3397_v62 = vmax.f32 %v3365_v44, 0.0  ;;  %v5241_v16 = vadd.f32 %v3289_v7, %v2061_v54 }
 0x23b   : > { %3430 = vst [vmem:[%s5583_s23 + $0xe8] sm:$0xff] %v3398_v52  ;;  %v3368_v25 = vadd.f32 %v5240_v1, %v6543_v40 }
 0x23c   : > { %3429 = vst [vmem:[%s5583_s23 + $0xe0] sm:$0xff] %v3397_v62  ;;  %v3367_v20 = vadd.f32 %v5241_v16, %v6543_v40 }
 0x23d   : > { %v3400_v9 = vmax.f32 %v3368_v25, 0.0 }
 0x23e   : > { %v3399_v0 = vmax.f32 %v3367_v20, 0.0 }
 0x23f   : > { %3432 = vst [vmem:[%s5583_s23 + $0xf8] sm:$0xff] %v3400_v9 }
 0x240   : > { %3431 = vst [vmem:[%s5583_s23 + $0xf0] sm:$0xff] %v3399_v0 }
 0x241 PF: > { %s13_s14 = sadd.s32 1, %s5525_s14   ;;  %s6649_s12 = smov %s5521_s13 }
 0x242   : > { %p10_p5 = scmp.ge.s32.totalorder %s13_s14, 4   ;;  %s6650_s13 = smov %s6652_s15 }
 0x244   :  { %12 = sbr.rel (!%p10_p5) target bundleno = 2 (0x2), region = 247 }
 0x24b   :  { %3471 = vsyncmov [#allocation3] }
 0x24e   :  { %s3472_s11 = vpop.sfrf %3471 }
 0x24f   :  { %p3750_p6 = scmp.ne.s32.totalorder %s3472_s11, 0 }
 0x251   :  { %3476 = shalt.err (%p3750_p6)  }
 0x252   :  { %3478 = vsyncmov [#allocation3 + $0x1] }
 0x255   :  { %s3479_s16 = vpop.sfrf %3478 }
 0x256   :  { %p3751_p7 = scmp.ne.s32.totalorder %s3479_s16, 0 }
 0x258   :  { %3483 = shalt.err (%p3751_p7)  }
 0x259   :  { %3485 = vsyncmov [#allocation3 + $0x2] }
 0x25c   :  { %s3486_s23 = vpop.sfrf %3485 }
 0x25d   :  { %p3752_p8 = scmp.ne.s32.totalorder %s3486_s23, 0 }
 0x25f   :  { %3490 = shalt.err (%p3752_p8)  }

</bundles_post_ra>
